<compile_context>
chip_gen: v7x
topology: tpu7x:2x2x1
jax: 0.10.0
libtpu: 0.0.40
codegen_flags: <defaults>
</compile_context>

<pallas_src>
import functools

import jax
import jax.numpy as jnp
from jax import lax
from jax.experimental import pallas as pl
from jax.experimental.pallas import tpu as pltpu


# ----------------------------------------------------------------------------
# small helpers
# ----------------------------------------------------------------------------
def _round_up(x, m):
    return ((x + m - 1) // m) * m


def _bn(y, relu):
    # nn.BatchNorm1d in training mode at init: batch stats, biased variance, eps=1e-5,
    # identity affine (gamma=1, beta=0); last layer uses affine=False (same forward).
    mean = jnp.mean(y, axis=0, keepdims=True)
    var = jnp.mean(jnp.square(y - mean), axis=0, keepdims=True)
    y = (y - mean) * lax.rsqrt(var + 1e-5)
    return jnp.maximum(y, 0.0) if relu else y


def _full2d(a):
    return pl.BlockSpec(a.shape, lambda i: (0, 0))


# ----------------------------------------------------------------------------
# fused encoder kernel (patch-embed + pool + projector head [+ mask] [+ predictor])
# ----------------------------------------------------------------------------
def _encoder_kernel(*refs, apply_mask, apply_pred, want_tok):
    it = iter(refs)
    patches_ref = next(it)     # [1, Kp, B*L]  transposed patch pixels (K zero-padded)
    pw_ref = next(it)          # [hidden, Kp]  patch-embed weight, transposed
    cls_ref = next(it)         # [1, hidden]
    pool_ref = next(it)        # [B, B*L]      mean-pool matrix (1/L per token)
    w0_ref = next(it)          # [hidden, mlp]
    w1_ref = next(it)          # [mlp, mlp]
    w2_ref = next(it)          # [mlp, dim]
    mask_ref = next(it) if apply_mask else None    # [1, p*p, B*L] raw saliency pixels
    pw0_ref = next(it) if apply_pred else None     # [dim, mlp]
    pw1_ref = next(it) if apply_pred else None     # [mlp, dim]
    q_ref = next(it)                               # [1, B, dim]
    tok_ref = next(it) if want_tok else None       # [1, hidden, B*L]

    # patch embedding, kept transposed so the token axis (multiple of 128) is on lanes
    tok_t = jnp.dot(pw_ref[...], patches_ref[0],
                    preferred_element_type=jnp.float32)            # [hidden, B*L]

    if apply_mask:
        # max-pool the raw saliency map over each p*p patch window (sublane reduce),
        # used as a per-token mask (synthetic stand-in for the ViT's internal use of mp).
        mp = jnp.max(mask_ref[0], axis=0, keepdims=True)            # [1, B*L]
        tok_t = tok_t * mp

    if want_tok:
        tok_ref[0] = tok_t                                          # lane-dense store

    # CLS token: learned embedding + mean over tokens (mean expressed as a tiny matmul)
    pooled = lax.dot_general(pool_ref[...], tok_t, (((1,), (1,)), ((), ())),
                             preferred_element_type=jnp.float32)    # [B, hidden]
    cls = cls_ref[...] + pooled

    # 3-layer projector head: Linear->BN->ReLU, Linear->BN->ReLU, Linear->BN
    h = _bn(jnp.dot(cls, w0_ref[...], preferred_element_type=jnp.float32), relu=True)
    h = _bn(jnp.dot(h, w1_ref[...], preferred_element_type=jnp.float32), relu=True)
    t = _bn(jnp.dot(h, w2_ref[...], preferred_element_type=jnp.float32), relu=False)

    if apply_pred:
        # 2-layer predictor: Linear->BN->ReLU, Linear->BN (fused in the same kernel)
        h = _bn(jnp.dot(t, pw0_ref[...], preferred_element_type=jnp.float32), relu=True)
        t = _bn(jnp.dot(h, pw1_ref[...], preferred_element_type=jnp.float32), relu=False)

    q_ref[0] = t


def _run_encoder(prep, patches_t, *, mask_t=None, pred=None, want_tok=False):
    V, Kp, BL = patches_t.shape
    hidden = prep["w0"].shape[0]
    B = prep["pool"].shape[0]
    dim = pred[1].shape[1] if pred is not None else prep["w2"].shape[1]

    inputs = [patches_t, prep["pw_t"], prep["cls"], prep["pool"],
              prep["w0"], prep["w1"], prep["w2"]]
    in_specs = [pl.BlockSpec((1, Kp, BL), lambda i: (i, 0, 0)),
                _full2d(prep["pw_t"]), _full2d(prep["cls"]), _full2d(prep["pool"]),
                _full2d(prep["w0"]), _full2d(prep["w1"]), _full2d(prep["w2"])]
    if mask_t is not None:
        pp = mask_t.shape[1]
        inputs.append(mask_t)
        in_specs.append(pl.BlockSpec((1, pp, BL), lambda i: (i, 0, 0)))
    if pred is not None:
        inputs += [pred[0], pred[1]]
        in_specs += [_full2d(pred[0]), _full2d(pred[1])]

    out_shape = [jax.ShapeDtypeStruct((V, B, dim), jnp.float32)]
    out_specs = [pl.BlockSpec((1, B, dim), lambda i: (i, 0, 0))]
    if want_tok:
        out_shape.append(jax.ShapeDtypeStruct((V, hidden, BL), jnp.float32))
        out_specs.append(pl.BlockSpec((1, hidden, BL), lambda i: (i, 0, 0)))

    return pl.pallas_call(
        functools.partial(_encoder_kernel,
                          apply_mask=mask_t is not None,
                          apply_pred=pred is not None,
                          want_tok=want_tok),
        grid=(V,),
        out_shape=tuple(out_shape),
        in_specs=in_specs,
        out_specs=tuple(out_specs),
        compiler_params=pltpu.CompilerParams(dimension_semantics=("parallel",)),
    )(*inputs)


# ----------------------------------------------------------------------------
# contrastive loss: both (q1,k2) and (q2,k1) pairs in one kernel
# ----------------------------------------------------------------------------
def _contrastive_kernel(q_ref, k_ref, o_ref, *, T):
    def ce(q, k):
        qn = q * lax.rsqrt(jnp.maximum(jnp.sum(q * q, axis=1, keepdims=True), 1e-24))
        kn = k * lax.rsqrt(jnp.maximum(jnp.sum(k * k, axis=1, keepdims=True), 1e-24))
        logits = lax.dot_general(qn, kn, (((1,), (1,)), ((), ())),
                                 preferred_element_type=jnp.float32) / T
        n = logits.shape[0]
        row_max = jnp.max(logits, axis=1, keepdims=True)
        lse = jnp.log(jnp.sum(jnp.exp(logits - row_max), axis=1, keepdims=True)) + row_max
        rows = lax.broadcasted_iota(jnp.int32, (n, n), 0)
        cols = lax.broadcasted_iota(jnp.int32, (n, n), 1)
        diag = jnp.sum(jnp.where(rows == cols, logits, 0.0), axis=1, keepdims=True)
        return jnp.mean(lse - diag) * (2.0 * T)

    o_ref[0, 0] = ce(q_ref[0], k_ref[1]) + ce(q_ref[1], k_ref[0])


def contrastive_loss(q_stack, k_stack, T):
    # TODO(synk): concat_all_gather is a single-device no-op here (no torch.distributed).
    return pl.pallas_call(
        functools.partial(_contrastive_kernel, T=T),
        out_shape=jax.ShapeDtypeStruct((1, 1), jnp.float32),
        in_specs=[pl.BlockSpec(memory_space=pltpu.MemorySpace.VMEM)] * 2,
        out_specs=pl.BlockSpec(memory_space=pltpu.MemorySpace.SMEM),
    )(q_stack, k_stack)[0, 0]


# ----------------------------------------------------------------------------
# saliency segmentation loss (1x1 conv + PixelShuffle pairing + BCE), both views fused
# ----------------------------------------------------------------------------
def _saliency_kernel(tok_ref, w_ref, b_ref, y_ref, o_ref, *, thresh):
    def bce(v):
        # z[p*p, B*L]: 1x1 conv over channels in the transposed (lane-dense) layout
        z = jnp.dot(w_ref[...], tok_ref[v], preferred_element_type=jnp.float32) + b_ref[...]
        y = (y_ref[v] > thresh).astype(jnp.float32)
        e = jnp.maximum(z, 0.0) - z * y + jnp.log(1.0 + jnp.exp(-jnp.abs(z)))
        return jnp.mean(e)

    o_ref[0, 0] = bce(0) + bce(1)


def saliency_loss(tok_t, mask_t, seg_w, seg_b, thresh):
    # PixelShuffle is folded into the mask rearrangement (BCE is a mean over all pixels,
    # so a consistent element pairing between logits and targets suffices).
    w_t = seg_w.T                    # [p*p, hidden]
    b_t = seg_b.reshape(-1, 1)       # [p*p, 1]
    return pl.pallas_call(
        functools.partial(_saliency_kernel, thresh=thresh),
        out_shape=jax.ShapeDtypeStruct((1, 1), jnp.float32),
        in_specs=[pl.BlockSpec(memory_space=pltpu.MemorySpace.VMEM)] * 4,
        out_specs=pl.BlockSpec(memory_space=pltpu.MemorySpace.SMEM),
    )(tok_t, w_t, b_t, mask_t)[0, 0]


# ----------------------------------------------------------------------------
# wrapper-level (one-time) data rearrangement into kernel-preferred layouts
# ----------------------------------------------------------------------------
def _rearrange_patches(x_stack, p, kp_pad):
    # [V,B,C,H*p,W*p] -> [V, C*p*p (zero-padded to kp_pad), B*H*W]
    V, B, C, Hp, Wp = x_stack.shape
    H, W = Hp // p, Wp // p
    xt = x_stack.reshape(V, B, C, H, p, W, p).transpose(0, 2, 4, 6, 1, 3, 5)
    xt = xt.reshape(V, C * p * p, B * H * W)
    return jnp.pad(xt, ((0, 0), (0, kp_pad - C * p * p), (0, 0)))


def _rearrange_mask(m_stack, p):
    # [V,B,1,H*p,W*p] -> [V, p*p, B*H*W]; y[v, i*p+j, b*L + h*W+w] = m[v,b,0,h*p+i,w*p+j]
    V, B, _, Hp, Wp = m_stack.shape
    H, W = Hp // p, Wp // p
    mt = m_stack.reshape(V, B, H, p, W, p).transpose(0, 3, 5, 1, 2, 4)
    return mt.reshape(V, p * p, B * H * W)


def _prep_encoder(enc, kp_pad, pool):
    k_in = enc["patch_w"].shape[0]
    return dict(
        pw_t=jnp.pad(enc["patch_w"].T, ((0, 0), (0, kp_pad - k_in))),
        cls=enc["cls"][None, :],
        pool=pool,
        w0=enc["head_w0"], w1=enc["head_w1"], w2=enc["head_w2"],
    )


# ----------------------------------------------------------------------------
# GSSL forward
# ----------------------------------------------------------------------------
def gssl_forward(params, x1, x2, m1, m2, momentum, *, patch=4, T=1.0, thresh=0.25):
    base = params["base"]
    # momentum (EMA) update of the momentum encoder; returned so the caller keeps state
    new_mom = jax.tree_util.tree_map(
        lambda pm, pb: pm * momentum + pb * (1.0 - momentum), params["momentum"], base)

    B = x1.shape[0]
    p = patch
    H = x1.shape[2] // p
    L = H * H
    kp_pad = _round_up(x1.shape[1] * p * p, 64)   # aligned K for the patch-embed matmul

    x_stack = jnp.stack([x1, x2], axis=0)
    m_stack = jnp.stack([m1, m2], axis=0)
    patches_t = _rearrange_patches(x_stack, p, kp_pad)   # [2, Kp, B*L]
    mask_t = _rearrange_mask(m_stack, p)                 # [2, p*p, B*L]

    pool = jnp.repeat(jnp.eye(B, dtype=jnp.float32), L, axis=1) * (1.0 / L)

    prep_b = _prep_encoder(base, kp_pad, pool)
    prep_m = _prep_encoder(new_mom, kp_pad, pool)

    # base encoder + projector + predictor (both views in one call): q = [q1, q2]
    q_stack, tok_t = _run_encoder(prep_b, patches_t,
                                  pred=(params["pred_w0"], params["pred_w1"]),
                                  want_tok=True)
    # momentum encoder with in-kernel max-pooled token mask: k = [k1, k2]
    (k_stack,) = _run_encoder(prep_m, patches_t, mask_t=mask_t)
    k_stack = lax.stop_gradient(k_stack)                 # torch.no_grad() branch

    cl_loss = contrastive_loss(q_stack, k_stack, T)
    sp_loss = saliency_loss(tok_t, mask_t, params["seg_w"], params["seg_b"], thresh)
    return (cl_loss, sp_loss), new_mom


# ----------------------------------------------------------------------------
# deterministic parameter init
# ----------------------------------------------------------------------------
def init_params(key, *, in_ch=3, patch=4, hidden=64, mlp_dim=256, dim=128):
    ks = jax.random.split(key, 9)
    s = 0.02
    enc = dict(
        patch_w=jax.random.normal(ks[0], (in_ch * patch * patch, hidden), jnp.float32) * s,
        cls=jax.random.normal(ks[1], (hidden,), jnp.float32) * s,
        head_w0=jax.random.normal(ks[2], (hidden, mlp_dim), jnp.float32) * s,
        head_w1=jax.random.normal(ks[3], (mlp_dim, mlp_dim), jnp.float32) * s,
        head_w2=jax.random.normal(ks[4], (mlp_dim, dim), jnp.float32) * s,
    )
    return dict(
        base=enc,
        momentum=jax.tree_util.tree_map(lambda a: a.copy(), enc),  # exact copy at init
        pred_w0=jax.random.normal(ks[5], (dim, mlp_dim), jnp.float32) * s,
        pred_w1=jax.random.normal(ks[6], (mlp_dim, dim), jnp.float32) * s,
        seg_w=jax.random.normal(ks[7], (hidden, patch * patch), jnp.float32) * s,
        seg_b=jax.random.normal(ks[8], (1, patch * patch), jnp.float32) * s,
    )


# ----------------------------------------------------------------------------
if __name__ == "__main__":
    B, C_IN, S, PATCH = 8, 3, 16, 4          # 4x4 patch grid -> 16 tokens per image
    key = jax.random.PRNGKey(0)
    kx1, kx2, km1, km2, kp = jax.random.split(key, 5)

    x1 = jax.random.normal(kx1, (B, C_IN, S, S), jnp.float32)
    x2 = jax.random.normal(kx2, (B, C_IN, S, S), jnp.float32)
    m1 = jax.random.uniform(km1, (B, 1, S, S), jnp.float32)   # saliency maps in [0,1]
    m2 = jax.random.uniform(km2, (B, 1, S, S), jnp.float32)
    params = init_params(kp, in_ch=C_IN, patch=PATCH, hidden=64, mlp_dim=256, dim=128)

    fwd = jax.jit(functools.partial(gssl_forward, patch=PATCH, T=1.0, thresh=0.25))
    (cl_loss, sp_loss), new_mom = fwd(params, x1, x2, m1, m2, 0.99)
    jax.block_until_ready((cl_loss, sp_loss, new_mom))
    assert jnp.isfinite(cl_loss) and jnp.isfinite(sp_loss)
    print("KERNEL_OK")
</pallas_src>

<mosaic_0001>
module attributes {stable_mosaic.version = 11 : i64} {
  func.func @_encoder_kernel(%arg0: i32, %arg1: memref<1x64x128xf32, #tpu.memory_space<vmem>>, %arg2: memref<64x64xf32, #tpu.memory_space<vmem>>, %arg3: memref<1x64xf32, #tpu.memory_space<vmem>>, %arg4: memref<8x128xf32, #tpu.memory_space<vmem>>, %arg5: memref<64x256xf32, #tpu.memory_space<vmem>>, %arg6: memref<256x256xf32, #tpu.memory_space<vmem>>, %arg7: memref<256x128xf32, #tpu.memory_space<vmem>>, %arg8: memref<128x256xf32, #tpu.memory_space<vmem>>, %arg9: memref<256x128xf32, #tpu.memory_space<vmem>>, %arg10: memref<1x8x128xf32, #tpu.memory_space<vmem>>, %arg11: memref<1x64x128xf32, #tpu.memory_space<vmem>>) attributes {dimension_semantics = [#tpu.dimension_semantics<parallel>], iteration_bounds = array<i64: 2>, scalar_prefetch = 0 : i64, scratch_operands = 0 : i64, tpu.core_type = #tpu.core_type<tc>, window_params = [{transform_indices = @transform_0, window_bounds = array<i64: 1, 64, 128>}, {pipeline_mode = #tpu.pipeline_mode<synchronous>, transform_indices = @transform_1, window_bounds = array<i64: 64, 64>}, {pipeline_mode = #tpu.pipeline_mode<synchronous>, transform_indices = @transform_2, window_bounds = array<i64: 1, 64>}, {pipeline_mode = #tpu.pipeline_mode<synchronous>, transform_indices = @transform_3, window_bounds = array<i64: 8, 128>}, {pipeline_mode = #tpu.pipeline_mode<synchronous>, transform_indices = @transform_4, window_bounds = array<i64: 64, 256>}, {pipeline_mode = #tpu.pipeline_mode<synchronous>, transform_indices = @transform_5, window_bounds = array<i64: 256, 256>}, {pipeline_mode = #tpu.pipeline_mode<synchronous>, transform_indices = @transform_6, window_bounds = array<i64: 256, 128>}, {pipeline_mode = #tpu.pipeline_mode<synchronous>, transform_indices = @transform_7, window_bounds = array<i64: 128, 256>}, {pipeline_mode = #tpu.pipeline_mode<synchronous>, transform_indices = @transform_8, window_bounds = array<i64: 256, 128>}, {transform_indices = @transform_9, window_bounds = array<i64: 1, 8, 128>}, {transform_indices = @transform_10, window_bounds = array<i64: 1, 64, 128>}]} {
    %c0 = arith.constant 0 : index
    %c0_0 = arith.constant 0 : index
    %0 = vector.load %arg2[%c0, %c0_0] : memref<64x64xf32, #tpu.memory_space<vmem>>, vector<64x64xf32>
    %c0_1 = arith.constant 0 : index
    %c0_2 = arith.constant 0 : index
    %c0_3 = arith.constant 0 : index
    %1 = vector.load %arg1[%c0_1, %c0_2, %c0_3] : memref<1x64x128xf32, #tpu.memory_space<vmem>>, vector<1x64x128xf32>
    %2 = vector.shape_cast %1 : vector<1x64x128xf32> to vector<64x128xf32>
    %cst = arith.constant dense<0.000000e+00> : vector<64x128xf32>
    %3 = tpu.matmul %0, %2, %cst {dimension_numbers = #tpu.dot_dimension_numbers<[1], [0], [0], [1], [0, 0, 1, 1], [], []>} : vector<64x64xf32>, vector<64x128xf32>, vector<64x128xf32> -> vector<64x128xf32>
    %c0_4 = arith.constant 0 : index
    %c0_5 = arith.constant 0 : index
    %c0_6 = arith.constant 0 : index
    %4 = vector.load %arg11[%c0_4, %c0_5, %c0_6] : memref<1x64x128xf32, #tpu.memory_space<vmem>>, vector<1x64x128xf32>
    %5 = vector.shape_cast %4 : vector<1x64x128xf32> to vector<64x128xf32>
    %6 = vector.shape_cast %3 : vector<64x128xf32> to vector<1x64x128xf32>
    tpu.vector_store %arg11[%c0_4, %c0_5, %c0_6], %6 {strides = array<i32>} : memref<1x64x128xf32, #tpu.memory_space<vmem>>, vector<1x64x128xf32>,
    %c0_7 = arith.constant 0 : index
    %c0_8 = arith.constant 0 : index
    %7 = vector.load %arg4[%c0_7, %c0_8] : memref<8x128xf32, #tpu.memory_space<vmem>>, vector<8x128xf32>
    %cst_9 = arith.constant dense<0.000000e+00> : vector<8x64xf32>
    %8 = tpu.matmul %7, %3, %cst_9 {dimension_numbers = #tpu.dot_dimension_numbers<[1], [1], [0], [0], [0, 0, 1, 0], [], []>} : vector<8x128xf32>, vector<64x128xf32>, vector<8x64xf32> -> vector<8x64xf32>
    %c0_10 = arith.constant 0 : index
    %c0_11 = arith.constant 0 : index
    %9 = vector.load %arg3[%c0_10, %c0_11] : memref<1x64xf32, #tpu.memory_space<vmem>>, vector<1x64xf32>
    %10 = vector.broadcast %9 : vector<1x64xf32> to vector<8x64xf32>
    %11 = arith.addf %10, %8 : vector<8x64xf32>
    %c0_12 = arith.constant 0 : index
    %c0_13 = arith.constant 0 : index
    %12 = vector.load %arg5[%c0_12, %c0_13] : memref<64x256xf32, #tpu.memory_space<vmem>>, vector<64x256xf32>
    %cst_14 = arith.constant dense<0.000000e+00> : vector<8x256xf32>
    %13 = tpu.matmul %11, %12, %cst_14 {dimension_numbers = #tpu.dot_dimension_numbers<[1], [0], [0], [1], [0, 0, 1, 1], [], []>} : vector<8x64xf32>, vector<64x256xf32>, vector<8x256xf32> -> vector<8x256xf32>
    %cst_15 = arith.constant dense<0.000000e+00> : vector<256xf32>
    %14 = vector.multi_reduction <add>, %13, %cst_15 [0] : vector<8x256xf32> to vector<256xf32>
    %15 = vector.shape_cast %14 : vector<256xf32> to vector<1x256xf32>
    %cst_16 = arith.constant 8.000000e+00 : f32
    %16 = vector.broadcast %cst_16 : f32 to vector<1x256xf32>
    %17 = arith.divf %15, %16 : vector<1x256xf32>
    %18 = vector.broadcast %17 : vector<1x256xf32> to vector<8x256xf32>
    %19 = arith.subf %13, %18 : vector<8x256xf32>
    %20 = arith.mulf %19, %19 : vector<8x256xf32>
    %cst_17 = arith.constant dense<0.000000e+00> : vector<256xf32>
    %21 = vector.multi_reduction <add>, %20, %cst_17 [0] : vector<8x256xf32> to vector<256xf32>
    %22 = vector.shape_cast %21 : vector<256xf32> to vector<1x256xf32>
    %cst_18 = arith.constant 8.000000e+00 : f32
    %23 = vector.broadcast %cst_18 : f32 to vector<1x256xf32>
    %24 = arith.divf %22, %23 : vector<1x256xf32>
    %25 = vector.broadcast %17 : vector<1x256xf32> to vector<8x256xf32>
    %26 = arith.subf %13, %25 : vector<8x256xf32>
    %cst_19 = arith.constant 9.99999974E-6 : f32
    %27 = vector.broadcast %cst_19 : f32 to vector<1x256xf32>
    %28 = arith.addf %24, %27 : vector<1x256xf32>
    %29 = math.rsqrt %28 : vector<1x256xf32>
    %30 = vector.broadcast %29 : vector<1x256xf32> to vector<8x256xf32>
    %31 = arith.mulf %26, %30 : vector<8x256xf32>
    %cst_20 = arith.constant 0.000000e+00 : f32
    %32 = vector.broadcast %cst_20 : f32 to vector<8x256xf32>
    %33 = arith.maximumf %31, %32 : vector<8x256xf32>
    %c0_21 = arith.constant 0 : index
    %c0_22 = arith.constant 0 : index
    %34 = vector.load %arg6[%c0_21, %c0_22] : memref<256x256xf32, #tpu.memory_space<vmem>>, vector<256x256xf32>
    %cst_23 = arith.constant dense<0.000000e+00> : vector<8x256xf32>
    %35 = tpu.matmul %33, %34, %cst_23 {dimension_numbers = #tpu.dot_dimension_numbers<[1], [0], [0], [1], [0, 0, 1, 1], [], []>} : vector<8x256xf32>, vector<256x256xf32>, vector<8x256xf32> -> vector<8x256xf32>
    %cst_24 = arith.constant dense<0.000000e+00> : vector<256xf32>
    %36 = vector.multi_reduction <add>, %35, %cst_24 [0] : vector<8x256xf32> to vector<256xf32>
    %37 = vector.shape_cast %36 : vector<256xf32> to vector<1x256xf32>
    %cst_25 = arith.constant 8.000000e+00 : f32
    %38 = vector.broadcast %cst_25 : f32 to vector<1x256xf32>
    %39 = arith.divf %37, %38 : vector<1x256xf32>
    %40 = vector.broadcast %39 : vector<1x256xf32> to vector<8x256xf32>
    %41 = arith.subf %35, %40 : vector<8x256xf32>
    %42 = arith.mulf %41, %41 : vector<8x256xf32>
    %cst_26 = arith.constant dense<0.000000e+00> : vector<256xf32>
    %43 = vector.multi_reduction <add>, %42, %cst_26 [0] : vector<8x256xf32> to vector<256xf32>
    %44 = vector.shape_cast %43 : vector<256xf32> to vector<1x256xf32>
    %cst_27 = arith.constant 8.000000e+00 : f32
    %45 = vector.broadcast %cst_27 : f32 to vector<1x256xf32>
    %46 = arith.divf %44, %45 : vector<1x256xf32>
    %47 = vector.broadcast %39 : vector<1x256xf32> to vector<8x256xf32>
    %48 = arith.subf %35, %47 : vector<8x256xf32>
    %cst_28 = arith.constant 9.99999974E-6 : f32
    %49 = vector.broadcast %cst_28 : f32 to vector<1x256xf32>
    %50 = arith.addf %46, %49 : vector<1x256xf32>
    %51 = math.rsqrt %50 : vector<1x256xf32>
    %52 = vector.broadcast %51 : vector<1x256xf32> to vector<8x256xf32>
    %53 = arith.mulf %48, %52 : vector<8x256xf32>
    %cst_29 = arith.constant 0.000000e+00 : f32
    %54 = vector.broadcast %cst_29 : f32 to vector<8x256xf32>
    %55 = arith.maximumf %53, %54 : vector<8x256xf32>
    %c0_30 = arith.constant 0 : index
    %c0_31 = arith.constant 0 : index
    %56 = vector.load %arg7[%c0_30, %c0_31] : memref<256x128xf32, #tpu.memory_space<vmem>>, vector<256x128xf32>
    %cst_32 = arith.constant dense<0.000000e+00> : vector<8x128xf32>
    %57 = tpu.matmul %55, %56, %cst_32 {dimension_numbers = #tpu.dot_dimension_numbers<[1], [0], [0], [1], [0, 0, 1, 1], [], []>} : vector<8x256xf32>, vector<256x128xf32>, vector<8x128xf32> -> vector<8x128xf32>
    %cst_33 = arith.constant dense<0.000000e+00> : vector<128xf32>
    %58 = vector.multi_reduction <add>, %57, %cst_33 [0] : vector<8x128xf32> to vector<128xf32>
    %59 = vector.shape_cast %58 : vector<128xf32> to vector<1x128xf32>
    %cst_34 = arith.constant 8.000000e+00 : f32
    %60 = vector.broadcast %cst_34 : f32 to vector<1x128xf32>
    %61 = arith.divf %59, %60 : vector<1x128xf32>
    %62 = vector.broadcast %61 : vector<1x128xf32> to vector<8x128xf32>
    %63 = arith.subf %57, %62 : vector<8x128xf32>
    %64 = arith.mulf %63, %63 : vector<8x128xf32>
    %cst_35 = arith.constant dense<0.000000e+00> : vector<128xf32>
    %65 = vector.multi_reduction <add>, %64, %cst_35 [0] : vector<8x128xf32> to vector<128xf32>
    %66 = vector.shape_cast %65 : vector<128xf32> to vector<1x128xf32>
    %cst_36 = arith.constant 8.000000e+00 : f32
    %67 = vector.broadcast %cst_36 : f32 to vector<1x128xf32>
    %68 = arith.divf %66, %67 : vector<1x128xf32>
    %69 = vector.broadcast %61 : vector<1x128xf32> to vector<8x128xf32>
    %70 = arith.subf %57, %69 : vector<8x128xf32>
    %cst_37 = arith.constant 9.99999974E-6 : f32
    %71 = vector.broadcast %cst_37 : f32 to vector<1x128xf32>
    %72 = arith.addf %68, %71 : vector<1x128xf32>
    %73 = math.rsqrt %72 : vector<1x128xf32>
    %74 = vector.broadcast %73 : vector<1x128xf32> to vector<8x128xf32>
    %75 = arith.mulf %70, %74 : vector<8x128xf32>
    %c0_38 = arith.constant 0 : index
    %c0_39 = arith.constant 0 : index
    %76 = vector.load %arg8[%c0_38, %c0_39] : memref<128x256xf32, #tpu.memory_space<vmem>>, vector<128x256xf32>
    %cst_40 = arith.constant dense<0.000000e+00> : vector<8x256xf32>
    %77 = tpu.matmul %75, %76, %cst_40 {dimension_numbers = #tpu.dot_dimension_numbers<[1], [0], [0], [1], [0, 0, 1, 1], [], []>} : vector<8x128xf32>, vector<128x256xf32>, vector<8x256xf32> -> vector<8x256xf32>
    %cst_41 = arith.constant dense<0.000000e+00> : vector<256xf32>
    %78 = vector.multi_reduction <add>, %77, %cst_41 [0] : vector<8x256xf32> to vector<256xf32>
    %79 = vector.shape_cast %78 : vector<256xf32> to vector<1x256xf32>
    %cst_42 = arith.constant 8.000000e+00 : f32
    %80 = vector.broadcast %cst_42 : f32 to vector<1x256xf32>
    %81 = arith.divf %79, %80 : vector<1x256xf32>
    %82 = vector.broadcast %81 : vector<1x256xf32> to vector<8x256xf32>
    %83 = arith.subf %77, %82 : vector<8x256xf32>
    %84 = arith.mulf %83, %83 : vector<8x256xf32>
    %cst_43 = arith.constant dense<0.000000e+00> : vector<256xf32>
    %85 = vector.multi_reduction <add>, %84, %cst_43 [0] : vector<8x256xf32> to vector<256xf32>
    %86 = vector.shape_cast %85 : vector<256xf32> to vector<1x256xf32>
    %cst_44 = arith.constant 8.000000e+00 : f32
    %87 = vector.broadcast %cst_44 : f32 to vector<1x256xf32>
    %88 = arith.divf %86, %87 : vector<1x256xf32>
    %89 = vector.broadcast %81 : vector<1x256xf32> to vector<8x256xf32>
    %90 = arith.subf %77, %89 : vector<8x256xf32>
    %cst_45 = arith.constant 9.99999974E-6 : f32
    %91 = vector.broadcast %cst_45 : f32 to vector<1x256xf32>
    %92 = arith.addf %88, %91 : vector<1x256xf32>
    %93 = math.rsqrt %92 : vector<1x256xf32>
    %94 = vector.broadcast %93 : vector<1x256xf32> to vector<8x256xf32>
    %95 = arith.mulf %90, %94 : vector<8x256xf32>
    %cst_46 = arith.constant 0.000000e+00 : f32
    %96 = vector.broadcast %cst_46 : f32 to vector<8x256xf32>
    %97 = arith.maximumf %95, %96 : vector<8x256xf32>
    %c0_47 = arith.constant 0 : index
    %c0_48 = arith.constant 0 : index
    %98 = vector.load %arg9[%c0_47, %c0_48] : memref<256x128xf32, #tpu.memory_space<vmem>>, vector<256x128xf32>
    %cst_49 = arith.constant dense<0.000000e+00> : vector<8x128xf32>
    %99 = tpu.matmul %97, %98, %cst_49 {dimension_numbers = #tpu.dot_dimension_numbers<[1], [0], [0], [1], [0, 0, 1, 1], [], []>} : vector<8x256xf32>, vector<256x128xf32>, vector<8x128xf32> -> vector<8x128xf32>
    %cst_50 = arith.constant dense<0.000000e+00> : vector<128xf32>
    %100 = vector.multi_reduction <add>, %99, %cst_50 [0] : vector<8x128xf32> to vector<128xf32>
    %101 = vector.shape_cast %100 : vector<128xf32> to vector<1x128xf32>
    %cst_51 = arith.constant 8.000000e+00 : f32
    %102 = vector.broadcast %cst_51 : f32 to vector<1x128xf32>
    %103 = arith.divf %101, %102 : vector<1x128xf32>
    %104 = vector.broadcast %103 : vector<1x128xf32> to vector<8x128xf32>
    %105 = arith.subf %99, %104 : vector<8x128xf32>
    %106 = arith.mulf %105, %105 : vector<8x128xf32>
    %cst_52 = arith.constant dense<0.000000e+00> : vector<128xf32>
    %107 = vector.multi_reduction <add>, %106, %cst_52 [0] : vector<8x128xf32> to vector<128xf32>
    %108 = vector.shape_cast %107 : vector<128xf32> to vector<1x128xf32>
    %cst_53 = arith.constant 8.000000e+00 : f32
    %109 = vector.broadcast %cst_53 : f32 to vector<1x128xf32>
    %110 = arith.divf %108, %109 : vector<1x128xf32>
    %111 = vector.broadcast %103 : vector<1x128xf32> to vector<8x128xf32>
    %112 = arith.subf %99, %111 : vector<8x128xf32>
    %cst_54 = arith.constant 9.99999974E-6 : f32
    %113 = vector.broadcast %cst_54 : f32 to vector<1x128xf32>
    %114 = arith.addf %110, %113 : vector<1x128xf32>
    %115 = math.rsqrt %114 : vector<1x128xf32>
    %116 = vector.broadcast %115 : vector<1x128xf32> to vector<8x128xf32>
    %117 = arith.mulf %112, %116 : vector<8x128xf32>
    %c0_55 = arith.constant 0 : index
    %c0_56 = arith.constant 0 : index
    %c0_57 = arith.constant 0 : index
    %118 = vector.load %arg10[%c0_55, %c0_56, %c0_57] : memref<1x8x128xf32, #tpu.memory_space<vmem>>, vector<1x8x128xf32>
    %119 = vector.shape_cast %118 : vector<1x8x128xf32> to vector<8x128xf32>
    %120 = vector.shape_cast %117 : vector<8x128xf32> to vector<1x8x128xf32>
    tpu.vector_store %arg10[%c0_55, %c0_56, %c0_57], %120 {strides = array<i32>} : memref<1x8x128xf32, #tpu.memory_space<vmem>>, vector<1x8x128xf32>,
    return
  }
  func.func @transform_0(%arg0: i32) -> (i32, i32, i32) {
    %c0_i32 = arith.constant 0 : i32
    %c0_i32_0 = arith.constant 0 : i32
    %c0_i32_1 = arith.constant 0 : i32
    return %arg0, %c0_i32, %c0_i32_0 : i32, i32, i32
  }
  func.func @transform_1(%arg0: i32) -> (i32, i32) {
    %c0_i32 = arith.constant 0 : i32
    %c0_i32_0 = arith.constant 0 : i32
    %c0_i32_1 = arith.constant 0 : i32
    return %c0_i32, %c0_i32_0 : i32, i32
  }
  func.func @transform_2(%arg0: i32) -> (i32, i32) {
    %c0_i32 = arith.constant 0 : i32
    %c0_i32_0 = arith.constant 0 : i32
    %c0_i32_1 = arith.constant 0 : i32
    return %c0_i32, %c0_i32_0 : i32, i32
  }
  func.func @transform_3(%arg0: i32) -> (i32, i32) {
    %c0_i32 = arith.constant 0 : i32
    %c0_i32_0 = arith.constant 0 : i32
    %c0_i32_1 = arith.constant 0 : i32
    return %c0_i32, %c0_i32_0 : i32, i32
  }
  func.func @transform_4(%arg0: i32) -> (i32, i32) {
    %c0_i32 = arith.constant 0 : i32
    %c0_i32_0 = arith.constant 0 : i32
    %c0_i32_1 = arith.constant 0 : i32
    return %c0_i32, %c0_i32_0 : i32, i32
  }
  func.func @transform_5(%arg0: i32) -> (i32, i32) {
    %c0_i32 = arith.constant 0 : i32
    %c0_i32_0 = arith.constant 0 : i32
    %c0_i32_1 = arith.constant 0 : i32
    return %c0_i32, %c0_i32_0 : i32, i32
  }
  func.func @transform_6(%arg0: i32) -> (i32, i32) {
    %c0_i32 = arith.constant 0 : i32
    %c0_i32_0 = arith.constant 0 : i32
    %c0_i32_1 = arith.constant 0 : i32
    return %c0_i32, %c0_i32_0 : i32, i32
  }
  func.func @transform_7(%arg0: i32) -> (i32, i32) {
    %c0_i32 = arith.constant 0 : i32
    %c0_i32_0 = arith.constant 0 : i32
    %c0_i32_1 = arith.constant 0 : i32
    return %c0_i32, %c0_i32_0 : i32, i32
  }
  func.func @transform_8(%arg0: i32) -> (i32, i32) {
    %c0_i32 = arith.constant 0 : i32
    %c0_i32_0 = arith.constant 0 : i32
    %c0_i32_1 = arith.constant 0 : i32
    return %c0_i32, %c0_i32_0 : i32, i32
  }
  func.func @transform_9(%arg0: i32) -> (i32, i32, i32) {
    %c0_i32 = arith.constant 0 : i32
    %c0_i32_0 = arith.constant 0 : i32
    %c0_i32_1 = arith.constant 0 : i32
    return %arg0, %c0_i32, %c0_i32_0 : i32, i32, i32
  }
  func.func @transform_10(%arg0: i32) -> (i32, i32, i32) {
    %c0_i32 = arith.constant 0 : i32
    %c0_i32_0 = arith.constant 0 : i32
    %c0_i32_1 = arith.constant 0 : i32
    return %arg0, %c0_i32, %c0_i32_0 : i32, i32, i32
  }
}

module attributes {stable_mosaic.version = 11 : i64} {
  func.func @_encoder_kernel(%arg0: i32, %arg1: memref<1x64x128xf32, #tpu.memory_space<vmem>>, %arg2: memref<64x64xf32, #tpu.memory_space<vmem>>, %arg3: memref<1x64xf32, #tpu.memory_space<vmem>>, %arg4: memref<8x128xf32, #tpu.memory_space<vmem>>, %arg5: memref<64x256xf32, #tpu.memory_space<vmem>>, %arg6: memref<256x256xf32, #tpu.memory_space<vmem>>, %arg7: memref<256x128xf32, #tpu.memory_space<vmem>>, %arg8: memref<1x16x128xf32, #tpu.memory_space<vmem>>, %arg9: memref<1x8x128xf32, #tpu.memory_space<vmem>>) attributes {dimension_semantics = [#tpu.dimension_semantics<parallel>], iteration_bounds = array<i64: 2>, scalar_prefetch = 0 : i64, scratch_operands = 0 : i64, tpu.core_type = #tpu.core_type<tc>, window_params = [{transform_indices = @transform_0, window_bounds = array<i64: 1, 64, 128>}, {pipeline_mode = #tpu.pipeline_mode<synchronous>, transform_indices = @transform_1, window_bounds = array<i64: 64, 64>}, {pipeline_mode = #tpu.pipeline_mode<synchronous>, transform_indices = @transform_2, window_bounds = array<i64: 1, 64>}, {pipeline_mode = #tpu.pipeline_mode<synchronous>, transform_indices = @transform_3, window_bounds = array<i64: 8, 128>}, {pipeline_mode = #tpu.pipeline_mode<synchronous>, transform_indices = @transform_4, window_bounds = array<i64: 64, 256>}, {pipeline_mode = #tpu.pipeline_mode<synchronous>, transform_indices = @transform_5, window_bounds = array<i64: 256, 256>}, {pipeline_mode = #tpu.pipeline_mode<synchronous>, transform_indices = @transform_6, window_bounds = array<i64: 256, 128>}, {transform_indices = @transform_7, window_bounds = array<i64: 1, 16, 128>}, {transform_indices = @transform_8, window_bounds = array<i64: 1, 8, 128>}]} {
    %c0 = arith.constant 0 : index
    %c0_0 = arith.constant 0 : index
    %0 = vector.load %arg2[%c0, %c0_0] : memref<64x64xf32, #tpu.memory_space<vmem>>, vector<64x64xf32>
    %c0_1 = arith.constant 0 : index
    %c0_2 = arith.constant 0 : index
    %c0_3 = arith.constant 0 : index
    %1 = vector.load %arg1[%c0_1, %c0_2, %c0_3] : memref<1x64x128xf32, #tpu.memory_space<vmem>>, vector<1x64x128xf32>
    %2 = vector.shape_cast %1 : vector<1x64x128xf32> to vector<64x128xf32>
    %cst = arith.constant dense<0.000000e+00> : vector<64x128xf32>
    %3 = tpu.matmul %0, %2, %cst {dimension_numbers = #tpu.dot_dimension_numbers<[1], [0], [0], [1], [0, 0, 1, 1], [], []>} : vector<64x64xf32>, vector<64x128xf32>, vector<64x128xf32> -> vector<64x128xf32>
    %c0_4 = arith.constant 0 : index
    %c0_5 = arith.constant 0 : index
    %c0_6 = arith.constant 0 : index
    %4 = vector.load %arg8[%c0_4, %c0_5, %c0_6] : memref<1x16x128xf32, #tpu.memory_space<vmem>>, vector<1x16x128xf32>
    %5 = vector.shape_cast %4 : vector<1x16x128xf32> to vector<16x128xf32>
    %cst_7 = arith.constant dense<0xFF800000> : vector<128xf32>
    %6 = vector.multi_reduction <maximumf>, %5, %cst_7 [0] : vector<16x128xf32> to vector<128xf32>
    %7 = vector.shape_cast %6 : vector<128xf32> to vector<1x128xf32>
    %8 = vector.broadcast %7 : vector<1x128xf32> to vector<64x128xf32>
    %9 = arith.mulf %3, %8 : vector<64x128xf32>
    %c0_8 = arith.constant 0 : index
    %c0_9 = arith.constant 0 : index
    %10 = vector.load %arg4[%c0_8, %c0_9] : memref<8x128xf32, #tpu.memory_space<vmem>>, vector<8x128xf32>
    %cst_10 = arith.constant dense<0.000000e+00> : vector<8x64xf32>
    %11 = tpu.matmul %10, %9, %cst_10 {dimension_numbers = #tpu.dot_dimension_numbers<[1], [1], [0], [0], [0, 0, 1, 0], [], []>} : vector<8x128xf32>, vector<64x128xf32>, vector<8x64xf32> -> vector<8x64xf32>
    %c0_11 = arith.constant 0 : index
    %c0_12 = arith.constant 0 : index
    %12 = vector.load %arg3[%c0_11, %c0_12] : memref<1x64xf32, #tpu.memory_space<vmem>>, vector<1x64xf32>
    %13 = vector.broadcast %12 : vector<1x64xf32> to vector<8x64xf32>
    %14 = arith.addf %13, %11 : vector<8x64xf32>
    %c0_13 = arith.constant 0 : index
    %c0_14 = arith.constant 0 : index
    %15 = vector.load %arg5[%c0_13, %c0_14] : memref<64x256xf32, #tpu.memory_space<vmem>>, vector<64x256xf32>
    %cst_15 = arith.constant dense<0.000000e+00> : vector<8x256xf32>
    %16 = tpu.matmul %14, %15, %cst_15 {dimension_numbers = #tpu.dot_dimension_numbers<[1], [0], [0], [1], [0, 0, 1, 1], [], []>} : vector<8x64xf32>, vector<64x256xf32>, vector<8x256xf32> -> vector<8x256xf32>
    %cst_16 = arith.constant dense<0.000000e+00> : vector<256xf32>
    %17 = vector.multi_reduction <add>, %16, %cst_16 [0] : vector<8x256xf32> to vector<256xf32>
    %18 = vector.shape_cast %17 : vector<256xf32> to vector<1x256xf32>
    %cst_17 = arith.constant 8.000000e+00 : f32
    %19 = vector.broadcast %cst_17 : f32 to vector<1x256xf32>
    %20 = arith.divf %18, %19 : vector<1x256xf32>
    %21 = vector.broadcast %20 : vector<1x256xf32> to vector<8x256xf32>
    %22 = arith.subf %16, %21 : vector<8x256xf32>
    %23 = arith.mulf %22, %22 : vector<8x256xf32>
    %cst_18 = arith.constant dense<0.000000e+00> : vector<256xf32>
    %24 = vector.multi_reduction <add>, %23, %cst_18 [0] : vector<8x256xf32> to vector<256xf32>
    %25 = vector.shape_cast %24 : vector<256xf32> to vector<1x256xf32>
    %cst_19 = arith.constant 8.000000e+00 : f32
    %26 = vector.broadcast %cst_19 : f32 to vector<1x256xf32>
    %27 = arith.divf %25, %26 : vector<1x256xf32>
    %28 = vector.broadcast %20 : vector<1x256xf32> to vector<8x256xf32>
    %29 = arith.subf %16, %28 : vector<8x256xf32>
    %cst_20 = arith.constant 9.99999974E-6 : f32
    %30 = vector.broadcast %cst_20 : f32 to vector<1x256xf32>
    %31 = arith.addf %27, %30 : vector<1x256xf32>
    %32 = math.rsqrt %31 : vector<1x256xf32>
    %33 = vector.broadcast %32 : vector<1x256xf32> to vector<8x256xf32>
    %34 = arith.mulf %29, %33 : vector<8x256xf32>
    %cst_21 = arith.constant 0.000000e+00 : f32
    %35 = vector.broadcast %cst_21 : f32 to vector<8x256xf32>
    %36 = arith.maximumf %34, %35 : vector<8x256xf32>
    %c0_22 = arith.constant 0 : index
    %c0_23 = arith.constant 0 : index
    %37 = vector.load %arg6[%c0_22, %c0_23] : memref<256x256xf32, #tpu.memory_space<vmem>>, vector<256x256xf32>
    %cst_24 = arith.constant dense<0.000000e+00> : vector<8x256xf32>
    %38 = tpu.matmul %36, %37, %cst_24 {dimension_numbers = #tpu.dot_dimension_numbers<[1], [0], [0], [1], [0, 0, 1, 1], [], []>} : vector<8x256xf32>, vector<256x256xf32>, vector<8x256xf32> -> vector<8x256xf32>
    %cst_25 = arith.constant dense<0.000000e+00> : vector<256xf32>
    %39 = vector.multi_reduction <add>, %38, %cst_25 [0] : vector<8x256xf32> to vector<256xf32>
    %40 = vector.shape_cast %39 : vector<256xf32> to vector<1x256xf32>
    %cst_26 = arith.constant 8.000000e+00 : f32
    %41 = vector.broadcast %cst_26 : f32 to vector<1x256xf32>
    %42 = arith.divf %40, %41 : vector<1x256xf32>
    %43 = vector.broadcast %42 : vector<1x256xf32> to vector<8x256xf32>
    %44 = arith.subf %38, %43 : vector<8x256xf32>
    %45 = arith.mulf %44, %44 : vector<8x256xf32>
    %cst_27 = arith.constant dense<0.000000e+00> : vector<256xf32>
    %46 = vector.multi_reduction <add>, %45, %cst_27 [0] : vector<8x256xf32> to vector<256xf32>
    %47 = vector.shape_cast %46 : vector<256xf32> to vector<1x256xf32>
    %cst_28 = arith.constant 8.000000e+00 : f32
    %48 = vector.broadcast %cst_28 : f32 to vector<1x256xf32>
    %49 = arith.divf %47, %48 : vector<1x256xf32>
    %50 = vector.broadcast %42 : vector<1x256xf32> to vector<8x256xf32>
    %51 = arith.subf %38, %50 : vector<8x256xf32>
    %cst_29 = arith.constant 9.99999974E-6 : f32
    %52 = vector.broadcast %cst_29 : f32 to vector<1x256xf32>
    %53 = arith.addf %49, %52 : vector<1x256xf32>
    %54 = math.rsqrt %53 : vector<1x256xf32>
    %55 = vector.broadcast %54 : vector<1x256xf32> to vector<8x256xf32>
    %56 = arith.mulf %51, %55 : vector<8x256xf32>
    %cst_30 = arith.constant 0.000000e+00 : f32
    %57 = vector.broadcast %cst_30 : f32 to vector<8x256xf32>
    %58 = arith.maximumf %56, %57 : vector<8x256xf32>
    %c0_31 = arith.constant 0 : index
    %c0_32 = arith.constant 0 : index
    %59 = vector.load %arg7[%c0_31, %c0_32] : memref<256x128xf32, #tpu.memory_space<vmem>>, vector<256x128xf32>
    %cst_33 = arith.constant dense<0.000000e+00> : vector<8x128xf32>
    %60 = tpu.matmul %58, %59, %cst_33 {dimension_numbers = #tpu.dot_dimension_numbers<[1], [0], [0], [1], [0, 0, 1, 1], [], []>} : vector<8x256xf32>, vector<256x128xf32>, vector<8x128xf32> -> vector<8x128xf32>
    %cst_34 = arith.constant dense<0.000000e+00> : vector<128xf32>
    %61 = vector.multi_reduction <add>, %60, %cst_34 [0] : vector<8x128xf32> to vector<128xf32>
    %62 = vector.shape_cast %61 : vector<128xf32> to vector<1x128xf32>
    %cst_35 = arith.constant 8.000000e+00 : f32
    %63 = vector.broadcast %cst_35 : f32 to vector<1x128xf32>
    %64 = arith.divf %62, %63 : vector<1x128xf32>
    %65 = vector.broadcast %64 : vector<1x128xf32> to vector<8x128xf32>
    %66 = arith.subf %60, %65 : vector<8x128xf32>
    %67 = arith.mulf %66, %66 : vector<8x128xf32>
    %cst_36 = arith.constant dense<0.000000e+00> : vector<128xf32>
    %68 = vector.multi_reduction <add>, %67, %cst_36 [0] : vector<8x128xf32> to vector<128xf32>
    %69 = vector.shape_cast %68 : vector<128xf32> to vector<1x128xf32>
    %cst_37 = arith.constant 8.000000e+00 : f32
    %70 = vector.broadcast %cst_37 : f32 to vector<1x128xf32>
    %71 = arith.divf %69, %70 : vector<1x128xf32>
    %72 = vector.broadcast %64 : vector<1x128xf32> to vector<8x128xf32>
    %73 = arith.subf %60, %72 : vector<8x128xf32>
    %cst_38 = arith.constant 9.99999974E-6 : f32
    %74 = vector.broadcast %cst_38 : f32 to vector<1x128xf32>
    %75 = arith.addf %71, %74 : vector<1x128xf32>
    %76 = math.rsqrt %75 : vector<1x128xf32>
    %77 = vector.broadcast %76 : vector<1x128xf32> to vector<8x128xf32>
    %78 = arith.mulf %73, %77 : vector<8x128xf32>
    %c0_39 = arith.constant 0 : index
    %c0_40 = arith.constant 0 : index
    %c0_41 = arith.constant 0 : index
    %79 = vector.load %arg9[%c0_39, %c0_40, %c0_41] : memref<1x8x128xf32, #tpu.memory_space<vmem>>, vector<1x8x128xf32>
    %80 = vector.shape_cast %79 : vector<1x8x128xf32> to vector<8x128xf32>
    %81 = vector.shape_cast %78 : vector<8x128xf32> to vector<1x8x128xf32>
    tpu.vector_store %arg9[%c0_39, %c0_40, %c0_41], %81 {strides = array<i32>} : memref<1x8x128xf32, #tpu.memory_space<vmem>>, vector<1x8x128xf32>,
    return
  }
  func.func @transform_0(%arg0: i32) -> (i32, i32, i32) {
    %c0_i32 = arith.constant 0 : i32
    %c0_i32_0 = arith.constant 0 : i32
    %c0_i32_1 = arith.constant 0 : i32
    return %arg0, %c0_i32, %c0_i32_0 : i32, i32, i32
  }
  func.func @transform_1(%arg0: i32) -> (i32, i32) {
    %c0_i32 = arith.constant 0 : i32
    %c0_i32_0 = arith.constant 0 : i32
    %c0_i32_1 = arith.constant 0 : i32
    return %c0_i32, %c0_i32_0 : i32, i32
  }
  func.func @transform_2(%arg0: i32) -> (i32, i32) {
    %c0_i32 = arith.constant 0 : i32
    %c0_i32_0 = arith.constant 0 : i32
    %c0_i32_1 = arith.constant 0 : i32
    return %c0_i32, %c0_i32_0 : i32, i32
  }
  func.func @transform_3(%arg0: i32) -> (i32, i32) {
    %c0_i32 = arith.constant 0 : i32
    %c0_i32_0 = arith.constant 0 : i32
    %c0_i32_1 = arith.constant 0 : i32
    return %c0_i32, %c0_i32_0 : i32, i32
  }
  func.func @transform_4(%arg0: i32) -> (i32, i32) {
    %c0_i32 = arith.constant 0 : i32
    %c0_i32_0 = arith.constant 0 : i32
    %c0_i32_1 = arith.constant 0 : i32
    return %c0_i32, %c0_i32_0 : i32, i32
  }
  func.func @transform_5(%arg0: i32) -> (i32, i32) {
    %c0_i32 = arith.constant 0 : i32
    %c0_i32_0 = arith.constant 0 : i32
    %c0_i32_1 = arith.constant 0 : i32
    return %c0_i32, %c0_i32_0 : i32, i32
  }
  func.func @transform_6(%arg0: i32) -> (i32, i32) {
    %c0_i32 = arith.constant 0 : i32
    %c0_i32_0 = arith.constant 0 : i32
    %c0_i32_1 = arith.constant 0 : i32
    return %c0_i32, %c0_i32_0 : i32, i32
  }
  func.func @transform_7(%arg0: i32) -> (i32, i32, i32) {
    %c0_i32 = arith.constant 0 : i32
    %c0_i32_0 = arith.constant 0 : i32
    %c0_i32_1 = arith.constant 0 : i32
    return %arg0, %c0_i32, %c0_i32_0 : i32, i32, i32
  }
  func.func @transform_8(%arg0: i32) -> (i32, i32, i32) {
    %c0_i32 = arith.constant 0 : i32
    %c0_i32_0 = arith.constant 0 : i32
    %c0_i32_1 = arith.constant 0 : i32
    return %arg0, %c0_i32, %c0_i32_0 : i32, i32, i32
  }
}

module attributes {stable_mosaic.version = 11 : i64} {
  func.func @_contrastive_kernel(%arg0: memref<2x8x128xf32, #tpu.memory_space<vmem>>, %arg1: memref<2x8x128xf32, #tpu.memory_space<vmem>>, %arg2: memref<1x1xf32, #tpu.memory_space<smem>>) attributes {dimension_semantics = [], scalar_prefetch = 0 : i64, scratch_operands = 0 : i64, tpu.core_type = #tpu.core_type<tc>} {
    %c0 = arith.constant 0 : index
    %c0_0 = arith.constant 0 : index
    %c0_1 = arith.constant 0 : index
    %0 = vector.load %arg0[%c0, %c0_0, %c0_1] : memref<2x8x128xf32, #tpu.memory_space<vmem>>, vector<1x8x128xf32>
    %1 = vector.shape_cast %0 : vector<1x8x128xf32> to vector<8x128xf32>
    %c1 = arith.constant 1 : index
    %c0_2 = arith.constant 0 : index
    %c0_3 = arith.constant 0 : index
    %2 = vector.load %arg1[%c1, %c0_2, %c0_3] : memref<2x8x128xf32, #tpu.memory_space<vmem>>, vector<1x8x128xf32>
    %3 = vector.shape_cast %2 : vector<1x8x128xf32> to vector<8x128xf32>
    %4 = arith.mulf %1, %1 : vector<8x128xf32>
    %cst = arith.constant dense<0.000000e+00> : vector<8xf32>
    %5 = vector.multi_reduction <add>, %4, %cst [1] : vector<8x128xf32> to vector<8xf32>
    %6 = vector.shape_cast %5 : vector<8xf32> to vector<8x1xf32>
    %cst_4 = arith.constant 1.000000e-24 : f32
    %7 = vector.broadcast %cst_4 : f32 to vector<8x1xf32>
    %8 = arith.maximumf %6, %7 : vector<8x1xf32>
    %9 = math.rsqrt %8 : vector<8x1xf32>
    %10 = vector.broadcast %9 : vector<8x1xf32> to vector<8x128xf32>
    %11 = arith.mulf %1, %10 : vector<8x128xf32>
    %12 = arith.mulf %3, %3 : vector<8x128xf32>
    %cst_5 = arith.constant dense<0.000000e+00> : vector<8xf32>
    %13 = vector.multi_reduction <add>, %12, %cst_5 [1] : vector<8x128xf32> to vector<8xf32>
    %14 = vector.shape_cast %13 : vector<8xf32> to vector<8x1xf32>
    %cst_6 = arith.constant 1.000000e-24 : f32
    %15 = vector.broadcast %cst_6 : f32 to vector<8x1xf32>
    %16 = arith.maximumf %14, %15 : vector<8x1xf32>
    %17 = math.rsqrt %16 : vector<8x1xf32>
    %18 = vector.broadcast %17 : vector<8x1xf32> to vector<8x128xf32>
    %19 = arith.mulf %3, %18 : vector<8x128xf32>
    %cst_7 = arith.constant dense<0.000000e+00> : vector<8x8xf32>
    %20 = tpu.matmul %11, %19, %cst_7 {dimension_numbers = #tpu.dot_dimension_numbers<[1], [1], [0], [0], [0, 0, 1, 0], [], []>} : vector<8x128xf32>, vector<8x128xf32>, vector<8x8xf32> -> vector<8x8xf32>
    %cst_8 = arith.constant 1.000000e+00 : f32
    %21 = vector.broadcast %cst_8 : f32 to vector<8x8xf32>
    %22 = arith.divf %20, %21 : vector<8x8xf32>
    %cst_9 = arith.constant dense<0xFF800000> : vector<8xf32>
    %23 = vector.multi_reduction <maximumf>, %22, %cst_9 [1] : vector<8x8xf32> to vector<8xf32>
    %24 = vector.shape_cast %23 : vector<8xf32> to vector<8x1xf32>
    %25 = vector.broadcast %24 : vector<8x1xf32> to vector<8x8xf32>
    %26 = arith.subf %22, %25 : vector<8x8xf32>
    %27 = math.exp %26 : vector<8x8xf32>
    %cst_10 = arith.constant dense<0.000000e+00> : vector<8xf32>
    %28 = vector.multi_reduction <add>, %27, %cst_10 [1] : vector<8x8xf32> to vector<8xf32>
    %29 = vector.shape_cast %28 : vector<8xf32> to vector<8x1xf32>
    %30 = math.log %29 : vector<8x1xf32>
    %31 = arith.addf %30, %24 : vector<8x1xf32>
    %32 = tpu.iota {dimensions = array<i32: 0>} : vector<8x8xi32>
    %33 = tpu.iota {dimensions = array<i32: 1>} : vector<8x8xi32>
    %34 = arith.cmpi eq, %32, %33 : vector<8x8xi32>
    %cst_11 = arith.constant 0.000000e+00 : f32
    %35 = vector.broadcast %cst_11 : f32 to vector<8x8xf32>
    %36 = arith.select %34, %22, %35 : vector<8x8xi1>, vector<8x8xf32>
    %cst_12 = arith.constant dense<0.000000e+00> : vector<8xf32>
    %37 = vector.multi_reduction <add>, %36, %cst_12 [1] : vector<8x8xf32> to vector<8xf32>
    %38 = vector.shape_cast %37 : vector<8xf32> to vector<8x1xf32>
    %39 = arith.subf %31, %38 : vector<8x1xf32>
    %40 = vector.shape_cast %39 : vector<8x1xf32> to vector<1x8x1xf32>
    %cst_13 = arith.constant dense<0.000000e+00> : vector<1xf32>
    %41 = vector.multi_reduction <add>, %40, %cst_13 [1, 2] : vector<1x8x1xf32> to vector<1xf32>
    %42 = vector.shape_cast %41 : vector<1xf32> to vector<1x1x1xf32>
    %43 = vector.extract %42[0, 0, 0] : f32 from vector<1x1x1xf32>
    %cst_14 = arith.constant 8.000000e+00 : f32
    %44 = arith.divf %43, %cst_14 : f32
    %cst_15 = arith.constant 2.000000e+00 : f32
    %45 = arith.mulf %44, %cst_15 : f32
    %c1_16 = arith.constant 1 : index
    %c0_17 = arith.constant 0 : index
    %c0_18 = arith.constant 0 : index
    %46 = vector.load %arg0[%c1_16, %c0_17, %c0_18] : memref<2x8x128xf32, #tpu.memory_space<vmem>>, vector<1x8x128xf32>
    %47 = vector.shape_cast %46 : vector<1x8x128xf32> to vector<8x128xf32>
    %c0_19 = arith.constant 0 : index
    %c0_20 = arith.constant 0 : index
    %c0_21 = arith.constant 0 : index
    %48 = vector.load %arg1[%c0_19, %c0_20, %c0_21] : memref<2x8x128xf32, #tpu.memory_space<vmem>>, vector<1x8x128xf32>
    %49 = vector.shape_cast %48 : vector<1x8x128xf32> to vector<8x128xf32>
    %50 = arith.mulf %47, %47 : vector<8x128xf32>
    %cst_22 = arith.constant dense<0.000000e+00> : vector<8xf32>
    %51 = vector.multi_reduction <add>, %50, %cst_22 [1] : vector<8x128xf32> to vector<8xf32>
    %52 = vector.shape_cast %51 : vector<8xf32> to vector<8x1xf32>
    %cst_23 = arith.constant 1.000000e-24 : f32
    %53 = vector.broadcast %cst_23 : f32 to vector<8x1xf32>
    %54 = arith.maximumf %52, %53 : vector<8x1xf32>
    %55 = math.rsqrt %54 : vector<8x1xf32>
    %56 = vector.broadcast %55 : vector<8x1xf32> to vector<8x128xf32>
    %57 = arith.mulf %47, %56 : vector<8x128xf32>
    %58 = arith.mulf %49, %49 : vector<8x128xf32>
    %cst_24 = arith.constant dense<0.000000e+00> : vector<8xf32>
    %59 = vector.multi_reduction <add>, %58, %cst_24 [1] : vector<8x128xf32> to vector<8xf32>
    %60 = vector.shape_cast %59 : vector<8xf32> to vector<8x1xf32>
    %cst_25 = arith.constant 1.000000e-24 : f32
    %61 = vector.broadcast %cst_25 : f32 to vector<8x1xf32>
    %62 = arith.maximumf %60, %61 : vector<8x1xf32>
    %63 = math.rsqrt %62 : vector<8x1xf32>
    %64 = vector.broadcast %63 : vector<8x1xf32> to vector<8x128xf32>
    %65 = arith.mulf %49, %64 : vector<8x128xf32>
    %cst_26 = arith.constant dense<0.000000e+00> : vector<8x8xf32>
    %66 = tpu.matmul %57, %65, %cst_26 {dimension_numbers = #tpu.dot_dimension_numbers<[1], [1], [0], [0], [0, 0, 1, 0], [], []>} : vector<8x128xf32>, vector<8x128xf32>, vector<8x8xf32> -> vector<8x8xf32>
    %cst_27 = arith.constant 1.000000e+00 : f32
    %67 = vector.broadcast %cst_27 : f32 to vector<8x8xf32>
    %68 = arith.divf %66, %67 : vector<8x8xf32>
    %cst_28 = arith.constant dense<0xFF800000> : vector<8xf32>
    %69 = vector.multi_reduction <maximumf>, %68, %cst_28 [1] : vector<8x8xf32> to vector<8xf32>
    %70 = vector.shape_cast %69 : vector<8xf32> to vector<8x1xf32>
    %71 = vector.broadcast %70 : vector<8x1xf32> to vector<8x8xf32>
    %72 = arith.subf %68, %71 : vector<8x8xf32>
    %73 = math.exp %72 : vector<8x8xf32>
    %cst_29 = arith.constant dense<0.000000e+00> : vector<8xf32>
    %74 = vector.multi_reduction <add>, %73, %cst_29 [1] : vector<8x8xf32> to vector<8xf32>
    %75 = vector.shape_cast %74 : vector<8xf32> to vector<8x1xf32>
    %76 = math.log %75 : vector<8x1xf32>
    %77 = arith.addf %76, %70 : vector<8x1xf32>
    %78 = tpu.iota {dimensions = array<i32: 0>} : vector<8x8xi32>
    %79 = tpu.iota {dimensions = array<i32: 1>} : vector<8x8xi32>
    %80 = arith.cmpi eq, %78, %79 : vector<8x8xi32>
    %cst_30 = arith.constant 0.000000e+00 : f32
    %81 = vector.broadcast %cst_30 : f32 to vector<8x8xf32>
    %82 = arith.select %80, %68, %81 : vector<8x8xi1>, vector<8x8xf32>
    %cst_31 = arith.constant dense<0.000000e+00> : vector<8xf32>
    %83 = vector.multi_reduction <add>, %82, %cst_31 [1] : vector<8x8xf32> to vector<8xf32>
    %84 = vector.shape_cast %83 : vector<8xf32> to vector<8x1xf32>
    %85 = arith.subf %77, %84 : vector<8x1xf32>
    %86 = vector.shape_cast %85 : vector<8x1xf32> to vector<1x8x1xf32>
    %cst_32 = arith.constant dense<0.000000e+00> : vector<1xf32>
    %87 = vector.multi_reduction <add>, %86, %cst_32 [1, 2] : vector<1x8x1xf32> to vector<1xf32>
    %88 = vector.shape_cast %87 : vector<1xf32> to vector<1x1x1xf32>
    %89 = vector.extract %88[0, 0, 0] : f32 from vector<1x1x1xf32>
    %cst_33 = arith.constant 8.000000e+00 : f32
    %90 = arith.divf %89, %cst_33 : f32
    %cst_34 = arith.constant 2.000000e+00 : f32
    %91 = arith.mulf %90, %cst_34 : f32
    %92 = arith.addf %45, %91 : f32
    %c0_35 = arith.constant 0 : index
    %c0_36 = arith.constant 0 : index
    %93 = memref.load %arg2[%c0_35, %c0_36] : memref<1x1xf32, #tpu.memory_space<smem>>
    memref.store %92, %arg2[%c0_35, %c0_36] : memref<1x1xf32, #tpu.memory_space<smem>>
    return
  }
}

module attributes {stable_mosaic.version = 11 : i64} {
  func.func @_saliency_kernel(%arg0: memref<2x64x128xf32, #tpu.memory_space<vmem>>, %arg1: memref<16x64xf32, #tpu.memory_space<vmem>>, %arg2: memref<16x1xf32, #tpu.memory_space<vmem>>, %arg3: memref<2x16x128xf32, #tpu.memory_space<vmem>>, %arg4: memref<1x1xf32, #tpu.memory_space<smem>>) attributes {dimension_semantics = [], scalar_prefetch = 0 : i64, scratch_operands = 0 : i64, tpu.core_type = #tpu.core_type<tc>} {
    %c0 = arith.constant 0 : index
    %c0_0 = arith.constant 0 : index
    %0 = vector.load %arg1[%c0, %c0_0] : memref<16x64xf32, #tpu.memory_space<vmem>>, vector<16x64xf32>
    %c0_1 = arith.constant 0 : index
    %c0_2 = arith.constant 0 : index
    %c0_3 = arith.constant 0 : index
    %1 = vector.load %arg0[%c0_1, %c0_2, %c0_3] : memref<2x64x128xf32, #tpu.memory_space<vmem>>, vector<1x64x128xf32>
    %2 = vector.shape_cast %1 : vector<1x64x128xf32> to vector<64x128xf32>
    %cst = arith.constant dense<0.000000e+00> : vector<16x128xf32>
    %3 = tpu.matmul %0, %2, %cst {dimension_numbers = #tpu.dot_dimension_numbers<[1], [0], [0], [1], [0, 0, 1, 1], [], []>} : vector<16x64xf32>, vector<64x128xf32>, vector<16x128xf32> -> vector<16x128xf32>
    %c0_4 = arith.constant 0 : index
    %c0_5 = arith.constant 0 : index
    %4 = vector.load %arg2[%c0_4, %c0_5] : memref<16x1xf32, #tpu.memory_space<vmem>>, vector<16x1xf32>
    %5 = vector.broadcast %4 : vector<16x1xf32> to vector<16x128xf32>
    %6 = arith.addf %3, %5 : vector<16x128xf32>
    %c0_6 = arith.constant 0 : index
    %c0_7 = arith.constant 0 : index
    %c0_8 = arith.constant 0 : index
    %7 = vector.load %arg3[%c0_6, %c0_7, %c0_8] : memref<2x16x128xf32, #tpu.memory_space<vmem>>, vector<1x16x128xf32>
    %8 = vector.shape_cast %7 : vector<1x16x128xf32> to vector<16x128xf32>
    %cst_9 = arith.constant 2.500000e-01 : f32
    %9 = vector.broadcast %cst_9 : f32 to vector<16x128xf32>
    %10 = arith.cmpf ogt, %8, %9 : vector<16x128xf32>
    %11 = arith.extui %10 : vector<16x128xi1> to vector<16x128xi32>
    %12 = arith.sitofp %11 : vector<16x128xi32> to vector<16x128xf32>
    %cst_10 = arith.constant 0.000000e+00 : f32
    %13 = vector.broadcast %cst_10 : f32 to vector<16x128xf32>
    %14 = arith.maximumf %6, %13 : vector<16x128xf32>
    %15 = arith.mulf %6, %12 : vector<16x128xf32>
    %16 = arith.subf %14, %15 : vector<16x128xf32>
    %17 = math.absf %6 : vector<16x128xf32>
    %cst_11 = arith.constant 0.000000e+00 : f32
    %18 = vector.broadcast %cst_11 : f32 to vector<16x128xf32>
    %19 = arith.subf %18, %17 : vector<16x128xf32>
    %20 = math.exp %19 : vector<16x128xf32>
    %cst_12 = arith.constant 1.000000e+00 : f32
    %21 = vector.broadcast %cst_12 : f32 to vector<16x128xf32>
    %22 = arith.addf %21, %20 : vector<16x128xf32>
    %23 = math.log %22 : vector<16x128xf32>
    %24 = arith.addf %16, %23 : vector<16x128xf32>
    %25 = vector.shape_cast %24 : vector<16x128xf32> to vector<1x16x128xf32>
    %cst_13 = arith.constant dense<0.000000e+00> : vector<1xf32>
    %26 = vector.multi_reduction <add>, %25, %cst_13 [1, 2] : vector<1x16x128xf32> to vector<1xf32>
    %27 = vector.shape_cast %26 : vector<1xf32> to vector<1x1x1xf32>
    %28 = vector.extract %27[0, 0, 0] : f32 from vector<1x1x1xf32>
    %cst_14 = arith.constant 2.048000e+03 : f32
    %29 = arith.divf %28, %cst_14 : f32
    %c0_15 = arith.constant 0 : index
    %c0_16 = arith.constant 0 : index
    %30 = vector.load %arg1[%c0_15, %c0_16] : memref<16x64xf32, #tpu.memory_space<vmem>>, vector<16x64xf32>
    %c1 = arith.constant 1 : index
    %c0_17 = arith.constant 0 : index
    %c0_18 = arith.constant 0 : index
    %31 = vector.load %arg0[%c1, %c0_17, %c0_18] : memref<2x64x128xf32, #tpu.memory_space<vmem>>, vector<1x64x128xf32>
    %32 = vector.shape_cast %31 : vector<1x64x128xf32> to vector<64x128xf32>
    %cst_19 = arith.constant dense<0.000000e+00> : vector<16x128xf32>
    %33 = tpu.matmul %30, %32, %cst_19 {dimension_numbers = #tpu.dot_dimension_numbers<[1], [0], [0], [1], [0, 0, 1, 1], [], []>} : vector<16x64xf32>, vector<64x128xf32>, vector<16x128xf32> -> vector<16x128xf32>
    %c0_20 = arith.constant 0 : index
    %c0_21 = arith.constant 0 : index
    %34 = vector.load %arg2[%c0_20, %c0_21] : memref<16x1xf32, #tpu.memory_space<vmem>>, vector<16x1xf32>
    %35 = vector.broadcast %34 : vector<16x1xf32> to vector<16x128xf32>
    %36 = arith.addf %33, %35 : vector<16x128xf32>
    %c1_22 = arith.constant 1 : index
    %c0_23 = arith.constant 0 : index
    %c0_24 = arith.constant 0 : index
    %37 = vector.load %arg3[%c1_22, %c0_23, %c0_24] : memref<2x16x128xf32, #tpu.memory_space<vmem>>, vector<1x16x128xf32>
    %38 = vector.shape_cast %37 : vector<1x16x128xf32> to vector<16x128xf32>
    %cst_25 = arith.constant 2.500000e-01 : f32
    %39 = vector.broadcast %cst_25 : f32 to vector<16x128xf32>
    %40 = arith.cmpf ogt, %38, %39 : vector<16x128xf32>
    %41 = arith.extui %40 : vector<16x128xi1> to vector<16x128xi32>
    %42 = arith.sitofp %41 : vector<16x128xi32> to vector<16x128xf32>
    %cst_26 = arith.constant 0.000000e+00 : f32
    %43 = vector.broadcast %cst_26 : f32 to vector<16x128xf32>
    %44 = arith.maximumf %36, %43 : vector<16x128xf32>
    %45 = arith.mulf %36, %42 : vector<16x128xf32>
    %46 = arith.subf %44, %45 : vector<16x128xf32>
    %47 = math.absf %36 : vector<16x128xf32>
    %cst_27 = arith.constant 0.000000e+00 : f32
    %48 = vector.broadcast %cst_27 : f32 to vector<16x128xf32>
    %49 = arith.subf %48, %47 : vector<16x128xf32>
    %50 = math.exp %49 : vector<16x128xf32>
    %cst_28 = arith.constant 1.000000e+00 : f32
    %51 = vector.broadcast %cst_28 : f32 to vector<16x128xf32>
    %52 = arith.addf %51, %50 : vector<16x128xf32>
    %53 = math.log %52 : vector<16x128xf32>
    %54 = arith.addf %46, %53 : vector<16x128xf32>
    %55 = vector.shape_cast %54 : vector<16x128xf32> to vector<1x16x128xf32>
    %cst_29 = arith.constant dense<0.000000e+00> : vector<1xf32>
    %56 = vector.multi_reduction <add>, %55, %cst_29 [1, 2] : vector<1x16x128xf32> to vector<1xf32>
    %57 = vector.shape_cast %56 : vector<1xf32> to vector<1x1x1xf32>
    %58 = vector.extract %57[0, 0, 0] : f32 from vector<1x1x1xf32>
    %cst_30 = arith.constant 2.048000e+03 : f32
    %59 = arith.divf %58, %cst_30 : f32
    %60 = arith.addf %29, %59 : f32
    %c0_31 = arith.constant 0 : index
    %c0_32 = arith.constant 0 : index
    %61 = memref.load %arg4[%c0_31, %c0_32] : memref<1x1xf32, #tpu.memory_space<smem>>
    memref.store %60, %arg4[%c0_31, %c0_32] : memref<1x1xf32, #tpu.memory_space<smem>>
    return
  }
}

</mosaic_0001>

<bundles_post_ra>
// kernel: gssl_forward.4
= control target key start
LH: loop header
LB: loop body
LE: loop exit
PB: predicated region body
PF: predicated region fallthrough
CT: control target
= control target key end

     0   :  { %s1845_s13 = smov 0   ;;  %s2443_s0 = inlined_call_operand.vmem [shape: f32[2,64,128], index: 0, kind: input, shape index: {}]   ;;  %s2444_s1 = inlined_call_operand.vmem [shape: f32[64,64], index: 1, kind: input, shape index: {}]   ;;  %s2445_s2 = inlined_call_operand.vmem [shape: f32[1,64], index: 2, kind: input, shape index: {}]   ;;  %s2446_s3 = inlined_call_operand.vmem [shape: f32[8,128], index: 3, kind: input, shape index: {}]   ;;  %s2447_s4 = inlined_call_operand.vmem [shape: f32[64,256], index: 4, kind: input, shape index: {}]   ;;  %s2448_s5 = inlined_call_operand.vmem [shape: f32[256,256], index: 5, kind: input, shape index: {}]   ;;  %s2449_s6 = inlined_call_operand.vmem [shape: f32[256,128], index: 6, kind: input, shape index: {}]   ;;  %s2450_s7 = inlined_call_operand.vmem [shape: f32[128,256], index: 7, kind: input, shape index: {}]   ;;  %s2451_s8 = inlined_call_operand.vmem [shape: f32[256,128], index: 8, kind: input, shape index: {}]   ;;  %s2452_s9 = inlined_call_operand.vmem [shape: f32[2,8,128], index: 9, kind: output, shape index: {0}]   ;;  %s2453_s10 = inlined_call_operand.vmem [shape: f32[2,64,128], index: 10, kind: output, shape index: {1}]  }
   0x1 LB: > { %s1382_s14 = sadd.s32 4294967295, %s1785_s13   ;;  %p1386_p0 = scmp.ge.s32.totalorder %s1785_s13, 1  ;;  %s1785_s13 = sphi %s1845_s13, %s21_s13  }
   0x2   : > { %p315_p1 = scmp.lt.s32.totalorder %s1785_s13, 3 }
   0x4   : > { %p316_p2 = pnand %p1386_p0, %p315_p1 }
   0x5   : > { %p357_p3 = scmp.lt.s32.totalorder (!%p316_p2), %s1382_s14, 1  ;;  %v371_v0 = vld [vmem:[%s2444_s1] sm:$0xff] (!%p316_p2)  ;;  %vm387_vm0 = vcmask (!%p316_p2), 523264   ;;  %v372_v13 = vld [vmem:[%s2444_s1 + $0x8] sm:$0xff] (!%p316_p2)  ;;  %v373_v14 = vld [vmem:[%s2444_s1 + $0x10] sm:$0xff] (!%p316_p2)  ;;  %v1787_v20 = vmov (!%p316_p2), 0.0|0.0  }
   0x6   : > { %319 = sbr.rel (%p316_p2) target bundleno = 1809 (0x711), region = 56  ;;  %1517 = vmatprep.mubr.msk.f32.mxu1 (!%p316_p2), %vm387_vm0, %v371_v0  ;;  %v374_v15 = vld [vmem:[%s2444_s1 + $0x18] sm:$0xff] (!%p316_p2)  ;;  %v375_v16 = vld [vmem:[%s2444_s1 + $0x20] sm:$0xff] (!%p316_p2)  ;;  %v376_v17 = vld [vmem:[%s2444_s1 + $0x28] sm:$0xff] (!%p316_p2)  ;;  %vm1788_vm1 = vmmov (!%p316_p2), 0   ;;  %v1789_v21 = vmov (!%p316_p2), 0.0  }
   0x7   : > { %v377_v18 = vld [vmem:[%s2444_s1 + $0x30] sm:$0xff] (!%p316_p2)  ;;  %v378_v19 = vld [vmem:[%s2444_s1 + $0x38] sm:$0xff] (!%p316_p2)  ;;  %687 = vmatprep.mubr.f32.mxu0 (!%p316_p2), %v1789_v21  ;;  %v605_v22 = vld [vmem:[%s2447_s4 + $0x8] sm:$0xff] (!%p316_p2) }
   0x8   : > { %v607_v23 = vld [vmem:[%s2447_s4 + $0x18] sm:$0xff] (!%p316_p2)  ;;  %v604_v24 = vld [vmem:[%s2447_s4] sm:$0xff] (!%p316_p2)  ;;  %v606_v26 = vld [vmem:[%s2447_s4 + $0x10] sm:$0xff] (!%p316_p2) }
   0x9   : > { %v1576_v25 = vpack.c.bf16 (!%p316_p2), %v607_v23, %v605_v22  ;;  %v609_v27 = vld [vmem:[%s2447_s4 + $0x28] sm:$0xff] (!%p316_p2)  ;;  %v611_v28 = vld [vmem:[%s2447_s4 + $0x38] sm:$0xff] (!%p316_p2)  ;;  %v1578_v29 = vpack.c.bf16 (!%p316_p2), %v606_v26, %v604_v24  ;;  %v608_v31 = vld [vmem:[%s2447_s4 + $0x20] sm:$0xff] (!%p316_p2) }
   0xa   : > { %v1580_v30 = vpack.c.bf16 (!%p316_p2), %v611_v28, %v609_v27  ;;  %v610_v32 = vld [vmem:[%s2447_s4 + $0x30] sm:$0xff] (!%p316_p2)  ;;  %v613_v33 = vld [vmem:[%s2447_s4 + $0x48] sm:$0xff] (!%p316_p2)  ;;  %v615_v34 = vld [vmem:[%s2447_s4 + $0x58] sm:$0xff] (!%p316_p2) }
   0xb   : > { %1577 = vmatprep.subr.bf16.mxu0 (!%p316_p2), %v1576_v25  ;;  %v1582_v35 = vpack.c.bf16 (!%p316_p2), %v610_v32, %v608_v31  ;;  %v1584_v36 = vpack.c.bf16 (!%p316_p2), %v615_v34, %v613_v33  ;;  %v612_v37 = vld [vmem:[%s2447_s4 + $0x40] sm:$0xff] (!%p316_p2)  ;;  %v614_v38 = vld [vmem:[%s2447_s4 + $0x50] sm:$0xff] (!%p316_p2)  ;;  %v617_v39 = vld [vmem:[%s2447_s4 + $0x68] sm:$0xff] (!%p316_p2) }
   0xc   : > { %1579 = vmatpush1.bf16.msra.mxu0 (!%p316_p2), %v1578_v29  ;;  %v619_v40 = vld [vmem:[%s2447_s4 + $0x78] sm:$0xff] (!%p316_p2)  ;;  %v1586_v41 = vpack.c.bf16 (!%p316_p2), %v614_v38, %v612_v37  ;;  %v525_v55 = vld [vmem:[%s2446_s3] sm:$0xff] (!%p316_p2)  ;;  %v618_v57 = vld [vmem:[%s2447_s4 + $0x70] sm:$0xff] (!%p316_p2) }
   0xd   : > { %s2455_s14 = smov (!%p357_p3, %s1382_s14), 1  ;;  %1581 = vmatprep.subr.bf16.mxu0 %v1580_v30  ;;  %v1588_v42 = vpack.c.bf16 %v619_v40, %v617_v39  ;;  %v616_v56 = vld [vmem:[%s2447_s4 + $0x60] sm:$0xff]  ;;  %v736_v59 = vld [vmem:[%s2448_s5 + $0x8] sm:$0xff]  ;;  %v738_v60 = vld [vmem:[%s2448_s5 + $0x18] sm:$0xff] }
   0xe   : > { %s1404_s17 = sshll.u32 %s2455_s14, 6  ;;  %v1590_v58 = vpack.c.bf16 %v618_v57, %v616_v56  ;;  %v1592_v61 = vpack.c.bf16 %v738_v60, %v736_v59  ;;  %v735_v62 = vld [vmem:[%s2448_s5] sm:$0xff]  ;;  %v737_v63 = vld [vmem:[%s2448_s5 + $0x10] sm:$0xff]  ;;  %v752_v24 = vld [vmem:[%s2448_s5 + $0x88] sm:$0xff]  ;;  %s1389_s18 = sshll.u32 %s2455_s14, 3 }
   0xf   : > { %s361_s20 = scalar_lea.vmem %s2443_s0, %s1404_s17  ;;  %s370_s11 = scalar_lea.vmem %s2453_s10, %s1404_s17  ;;  %v1400_v0 = vld [vmem:[%s2445_s2] ss:$0 sm:$0xff]  ;;  %v749_v22 = vld [vmem:[%s2448_s5 + $0x70] sm:$0xff]  ;;  %v754_v25 = vld [vmem:[%s2448_s5 + $0x98] sm:$0xff] }
  0x10   : > { %v379_v1 = vld [vmem:[%s361_s20] sm:$0xff]  ;;  %v380_v2 = vld [vmem:[%s361_s20 + $0x8] sm:$0xff]  ;;  %v381_v3 = vld [vmem:[%s361_s20 + $0x10] sm:$0xff]  ;;  %1583 = vmatpush1.bf16.msra.mxu0 %v1582_v35  ;;  %v1608_v26 = vpack.c.bf16 %v754_v25, %v752_v24  ;;  %s365_s21 = scalar_lea.vmem %s2452_s9, %s1389_s18 }
  0x11   : > { %v1548_v4 = vpack.c.bf16 %v380_v2, %v379_v1  ;;  %v382_v5 = vld [vmem:[%s361_s20 + $0x18] sm:$0xff]  ;;  %v383_v7 = vld [vmem:[%s361_s20 + $0x20] sm:$0xff]  ;;  %v384_v8 = vld [vmem:[%s361_s20 + $0x28] sm:$0xff]  ;;  %1585 = vmatprep.subr.bf16.mxu0 %v1584_v36 }
  0x12   : > { %v1552_v6 = vpack.c.bf16 %v382_v5, %v381_v3  ;;  %v1556_v9 = vpack.c.bf16 %v384_v8, %v383_v7  ;;  %v385_v10 = vld [vmem:[%s361_s20 + $0x30] sm:$0xff]  ;;  %v386_v11 = vld [vmem:[%s361_s20 + $0x38] sm:$0xff]  ;;  %v740_v1 = vld [vmem:[%s2448_s5 + $0x28] sm:$0xff] }
  0x13   : > { %1549 = vmatprep.subr.bf16.mxu1 %v1548_v4  ;;  %v1560_v12 = vpack.c.bf16 %v386_v11, %v385_v10  ;;  %v742_v2 = vld [vmem:[%s2448_s5 + $0x38] sm:$0xff]  ;;  %v739_v8 = vld [vmem:[%s2448_s5 + $0x20] sm:$0xff]  ;;  %v744_v10 = vld [vmem:[%s2448_s5 + $0x48] sm:$0xff] }
  0x14   : > { %1551 = vmatpush3.bf16.msra.mxu1 %v1548_v4  ;;  %1587 = vmatpush1.bf16.msra.mxu0 %v1586_v41  ;;  %v1594_v4 = vpack.c.bf16 %v737_v63, %v735_v62  ;;  %v1596_v7 = vpack.c.bf16 %v742_v2, %v740_v1  ;;  %v746_v11 = vld [vmem:[%s2448_s5 + $0x58] sm:$0xff]  ;;  %v751_v27 = vld [vmem:[%s2448_s5 + $0x80] sm:$0xff]  ;;  %v753_v28 = vld [vmem:[%s2448_s5 + $0x90] sm:$0xff] }
  0x15   : > { %1553 = vmatprep.subr.bf16.mxu1 %v1552_v6  ;;  %1589 = vmatprep.subr.bf16.mxu0 %v1588_v42  ;;  %v1610_v29 = vpack.c.bf16 %v753_v28, %v751_v27  ;;  %v756_v30 = vld [vmem:[%s2448_s5 + $0xa8] sm:$0xff]  ;;  %v758_v31 = vld [vmem:[%s2448_s5 + $0xb8] sm:$0xff]  ;;  %v755_v33 = vld [vmem:[%s2448_s5 + $0xa0] sm:$0xff] }
  0x16   : > { %v1612_v32 = vpack.c.bf16 %v758_v31, %v756_v30  ;;  %v757_v34 = vld [vmem:[%s2448_s5 + $0xb0] sm:$0xff]  ;;  %v760_v36 = vld [vmem:[%s2448_s5 + $0xc8] sm:$0xff]  ;;  %v762_v37 = vld [vmem:[%s2448_s5 + $0xd8] sm:$0xff] }
  0x17   : > { %v1614_v35 = vpack.c.bf16 %v757_v34, %v755_v33  ;;  %v1616_v38 = vpack.c.bf16 %v762_v37, %v760_v36  ;;  %v759_v39 = vld [vmem:[%s2448_s5 + $0xc0] sm:$0xff]  ;;  %v761_v40 = vld [vmem:[%s2448_s5 + $0xd0] sm:$0xff]  ;;  %v764_v42 = vld [vmem:[%s2448_s5 + $0xe8] sm:$0xff] }
  0x18   : > { %1555 = vmatpush3.bf16.msra.mxu1 %v1552_v6  ;;  %1591 = vmatpush1.bf16.msra.mxu0 %v1590_v58  ;;  %v1618_v41 = vpack.c.bf16 %v761_v40, %v759_v39  ;;  %v771_v57 = vld [vmem:[%s2448_s5 + $0x120] sm:$0xff]  ;;  %v773_v58 = vld [vmem:[%s2448_s5 + $0x130] sm:$0xff]  ;;  %v776_v60 = vld [vmem:[%s2448_s5 + $0x148] sm:$0xff] }
  0x19   : > { %1557 = vmatprep.subr.bf16.mxu1 %v1556_v9  ;;  %1593 = vmatprep.subr.bf16.mxu0 %v1592_v61  ;;  %v1630_v59 = vpack.c.bf16 %v773_v58, %v771_v57  ;;  %v778_v61 = vld [vmem:[%s2448_s5 + $0x158] sm:$0xff]  ;;  %v775_v63 = vld [vmem:[%s2448_s5 + $0x140] sm:$0xff]  ;;  %v780_v2 = vld [vmem:[%s2448_s5 + $0x168] sm:$0xff] }
  0x1a   : > { %v1632_v62 = vpack.c.bf16 %v778_v61, %v776_v60  ;;  %v791_v24 = vld [vmem:[%s2448_s5 + $0x1c0] sm:$0xff]  ;;  %v793_v25 = vld [vmem:[%s2448_s5 + $0x1d0] sm:$0xff]  ;;  %v796_v27 = vld [vmem:[%s2448_s5 + $0x1e8] sm:$0xff] }
  0x1b   : > { %v798_v28 = vld [vmem:[%s2448_s5 + $0x1f8] sm:$0xff]  ;;  %v795_v30 = vld [vmem:[%s2448_s5 + $0x1e0] sm:$0xff]  ;;  %v797_v31 = vld [vmem:[%s2448_s5 + $0x1f0] sm:$0xff] }
  0x1c   : > { %1559 = vmatpush3.bf16.msra.mxu1 %v1556_v9  ;;  %v741_v9 = vld [vmem:[%s2448_s5 + $0x30] sm:$0xff] }
  0x1d   : > { %1561 = vmatprep.subr.bf16.mxu1 %v1560_v12 }
  0x20   : > { %1563 = vmatpush3.bf16.msra.mxu1 %v1560_v12  ;;  %v1598_v12 = vpack.c.bf16 %v741_v9, %v739_v8  ;;  %v784_v8 = vld [vmem:[%s2448_s5 + $0x188] sm:$0xff]  ;;  %v786_v9 = vld [vmem:[%s2448_s5 + $0x198] sm:$0xff] }
  0x21   : > { %1564 = vmatprep.subr.bf16.mxu1 %v1787_v20 }
  0x23   : > { %1518 = vmatmul.mubr.msk.f32.vlgmr.msra.gmra.mrb[0].mxu1 %vm387_vm0, %v372_v13  ;;  %v1600_v13 = vpack.c.bf16 %v746_v11, %v744_v10  ;;  %v1640_v10 = vpack.c.bf16 %v786_v9, %v784_v8  ;;  %v783_v11 = vld [vmem:[%s2448_s5 + $0x180] sm:$0xff] }
  0x24   : > { %1520 = vmatprep.mubr.msk.f32.mxu1 %vm387_vm0, %v373_v14  ;;  %v743_v14 = vld [vmem:[%s2448_s5 + $0x40] sm:$0xff] }
  0x27   : > { %1521 = vmatmul.mubr.msk.f32.gmra.mrb[2].mxu1 %vm387_vm0, %v374_v15  ;;  %v745_v15 = vld [vmem:[%s2448_s5 + $0x50] sm:$0xff] }
  0x28   : > { %1523 = vmatprep.mubr.msk.f32.mxu1 %vm387_vm0, %v375_v16  ;;  %v1602_v16 = vpack.c.bf16 %v745_v15, %v743_v14  ;;  %v788_v14 = vld [vmem:[%s2448_s5 + $0x1a8] sm:$0xff]  ;;  %v790_v15 = vld [vmem:[%s2448_s5 + $0x1b8] sm:$0xff] }
  0x2b   : > { %1524 = vmatmul.mubr.msk.f32.gmra.mrb[4].mxu1 %vm387_vm0, %v376_v17  ;;  %v748_v17 = vld [vmem:[%s2448_s5 + $0x68] sm:$0xff] }
  0x2c   : > { %1526 = vmatprep.mubr.msk.f32.mxu1 %vm387_vm0, %v377_v18  ;;  %v750_v18 = vld [vmem:[%s2448_s5 + $0x78] sm:$0xff] }
  0x2f   : > { %1527 = vmatmul.mubr.msk.f32.gmra.mrb[6].mxu1 %vm387_vm0, %v378_v19  ;;  %v1604_v19 = vpack.c.bf16 %v750_v18, %v748_v17  ;;  %v787_v17 = vld [vmem:[%s2448_s5 + $0x1a0] sm:$0xff]  ;;  %v789_v18 = vld [vmem:[%s2448_s5 + $0x1b0] sm:$0xff] }
  0x30   : > { %1545 = vmatprep.mubr.msk.f32.mxu1 %vm1788_vm1, %v1789_v21 }
  0xf6   : > { %v1519_v43 = vpop.f32.mrb[0].mxu1 }
  0xf7   : > { %518 = vst [vmem:[%s370_s11 + $0x8] sm:$0xff] %v1519_v43  ;;  %v478_v44 = vpop.f32.mrb[1].mxu1 }
  0xf8   : > { %517 = vst [vmem:[%s370_s11] sm:$0xff] %v478_v44  ;;  %v1565_v45 = vpack.c.bf16 %v1519_v43, %v478_v44  ;;  %v766_v43 = vld [vmem:[%s2448_s5 + $0xf8] sm:$0xff] }
  0xf9   : > { %v1620_v44 = vpack.c.bf16 %v766_v43, %v764_v42 }
  0xfa   : > { %1566 = vmatpush3.bf16.xpose.msra.mxu1 %v1565_v45  ;;  %v1522_v46 = vpop.f32.mrb[2].mxu1  ;;  %v763_v45 = vld [vmem:[%s2448_s5 + $0xe0] sm:$0xff] }
  0xfb   : > { %520 = vst [vmem:[%s370_s11 + $0x18] sm:$0xff] %v1522_v46  ;;  %v488_v47 = vpop.f32.mrb[3].mxu1  ;;  %1567 = vmatprep.subr.bf16.mxu1 %v1787_v20 }
  0xfc   : > { %519 = vst [vmem:[%s370_s11 + $0x10] sm:$0xff] %v488_v47  ;;  %v1568_v48 = vpack.c.bf16 %v1522_v46, %v488_v47  ;;  %v765_v46 = vld [vmem:[%s2448_s5 + $0xf0] sm:$0xff] }
  0xfd   : > { %v1622_v47 = vpack.c.bf16 %v765_v46, %v763_v45 }
  0xfe   : > { %v1525_v49 = vpop.f32.mrb[4].mxu1 }
  0xff   : > { %522 = vst [vmem:[%s370_s11 + $0x28] sm:$0xff] %v1525_v49  ;;  %v498_v50 = vpop.f32.mrb[5].mxu1 }
 0x100   : > { %521 = vst [vmem:[%s370_s11 + $0x20] sm:$0xff] %v498_v50  ;;  %v1571_v51 = vpack.c.bf16 %v1525_v49, %v498_v50  ;;  %v770_v49 = vld [vmem:[%s2448_s5 + $0x118] sm:$0xff] }
 0x102   : > { %1569 = vmatpush3.bf16.xpose.msra.mxu1 %v1568_v48  ;;  %v1528_v52 = vpop.f32.mrb[6].mxu1  ;;  %v768_v48 = vld [vmem:[%s2448_s5 + $0x108] sm:$0xff] }
 0x103   : > { %1570 = vmatprep.subr.bf16.mxu1 %v1787_v20  ;;  %524 = vst [vmem:[%s370_s11 + $0x38] sm:$0xff] %v1528_v52  ;;  %v508_v53 = vpop.f32.mrb[7].mxu1  ;;  %v1624_v50 = vpack.c.bf16 %v770_v49, %v768_v48 }
 0x104   : > { %523 = vst [vmem:[%s370_s11 + $0x30] sm:$0xff] %v508_v53  ;;  %v1574_v54 = vpack.c.bf16 %v1528_v52, %v508_v53  ;;  %v769_v52 = vld [vmem:[%s2448_s5 + $0x110] sm:$0xff] }
 0x10a   : > { %1572 = vmatpush3.bf16.xpose.msra.mxu1 %v1571_v51  ;;  %v767_v51 = vld [vmem:[%s2448_s5 + $0x100] sm:$0xff] }
 0x10b   : > { %1573 = vmatprep.subr.bf16.mxu1 %v1787_v20  ;;  %v747_v20 = vld [vmem:[%s2448_s5 + $0x60] sm:$0xff]  ;;  %v1626_v53 = vpack.c.bf16 %v769_v52, %v767_v51 }
 0x10c   : > { %v1606_v23 = vpack.c.bf16 %v749_v22, %v747_v20  ;;  %v792_v20 = vld [vmem:[%s2448_s5 + $0x1c8] sm:$0xff]  ;;  %v794_v22 = vld [vmem:[%s2448_s5 + $0x1d8] sm:$0xff] }
 0x112   : > { %1575 = vmatpush3.bf16.xpose.msra.mxu1 %v1574_v54  ;;  %v772_v54 = vld [vmem:[%s2448_s5 + $0x128] sm:$0xff] }
 0x119   : > { %1546 = vmatmul.mubr.f32.vlgmr.msra.gmra.mrb[8].mxu1 %v525_v55  ;;  %v774_v55 = vld [vmem:[%s2448_s5 + $0x138] sm:$0xff] }
 0x11a   : > { %v1628_v56 = vpack.c.bf16 %v774_v55, %v772_v54 }
 0x1ec   : > { %v592_v3 = vpop.f32.mrb[8].mxu1 }
 0x1ed   : > { %v603_v5 = vadd.f32 %v1400_v0, %v592_v3  ;;  %v1547_v6 = vpop.f32.mrb[9].mxu1  ;;  %v777_v0 = vld [vmem:[%s2448_s5 + $0x150] sm:$0xff]  ;;  %v782_v3 = vld [vmem:[%s2448_s5 + $0x178] sm:$0xff] }
 0x1ee   : > { %v1634_v1 = vpack.c.bf16 %v777_v0, %v775_v63  ;;  %v781_v6 = vld [vmem:[%s2448_s5 + $0x170] sm:$0xff] }
 0x1ef   : > { %1401 = vmatmul.mubr.msk.f32.vlgmr.msra.gmra.mrb[0].mxu0 %vm387_vm0, %v603_v5  ;;  %v779_v5 = vld [vmem:[%s2448_s5 + $0x160] sm:$0xff] }
 0x1f0   : > { %1595 = vmatpush1.bf16.msra.mxu0 %v1594_v4  ;;  %v1636_v4 = vpack.c.bf16 %v782_v3, %v780_v2 }
 0x1f1   : > { %1597 = vmatprep.subr.bf16.mxu0 %v1596_v7  ;;  %v1638_v7 = vpack.c.bf16 %v781_v6, %v779_v5 }
 0x1f4   : > { %1599 = vmatpush1.bf16.msra.mxu0 %v1598_v12  ;;  %v785_v12 = vld [vmem:[%s2448_s5 + $0x190] sm:$0xff] }
 0x1f5   : > { %1601 = vmatprep.subr.bf16.mxu0 %v1600_v13  ;;  %v1642_v13 = vpack.c.bf16 %v785_v12, %v783_v11  ;;  %v926_v11 = vld [vmem:[%s2449_s6 + $0x80] sm:$0xff]  ;;  %v927_v12 = vld [vmem:[%s2449_s6 + $0x88] sm:$0xff] }
 0x1f8   : > { %1603 = vmatpush1.bf16.msra.mxu0 %v1602_v16  ;;  %v1644_v16 = vpack.c.bf16 %v790_v15, %v788_v14  ;;  %v910_v14 = vld [vmem:[%s2449_s6] sm:$0xff]  ;;  %v911_v15 = vld [vmem:[%s2449_s6 + $0x8] sm:$0xff] }
 0x1f9   : > { %1605 = vmatprep.subr.bf16.mxu0 %v1604_v19  ;;  %v1646_v19 = vpack.c.bf16 %v789_v18, %v787_v17  ;;  %v928_v17 = vld [vmem:[%s2449_s6 + $0x90] sm:$0xff]  ;;  %v929_v18 = vld [vmem:[%s2449_s6 + $0x98] sm:$0xff] }
 0x1fc   : > { %1607 = vmatpush1.bf16.msra.mxu0 %v1606_v23  ;;  %v1648_v23 = vpack.c.bf16 %v794_v22, %v792_v20  ;;  %v912_v20 = vld [vmem:[%s2449_s6 + $0x10] sm:$0xff]  ;;  %v913_v22 = vld [vmem:[%s2449_s6 + $0x18] sm:$0xff] }
 0x1fd   : > { %1609 = vmatprep.subr.bf16.mxu0 %v1608_v26  ;;  %v1650_v26 = vpack.c.bf16 %v793_v25, %v791_v24  ;;  %v930_v24 = vld [vmem:[%s2449_s6 + $0xa0] sm:$0xff]  ;;  %v931_v25 = vld [vmem:[%s2449_s6 + $0xa8] sm:$0xff] }
 0x200   : > { %1611 = vmatpush1.bf16.msra.mxu0 %v1610_v29  ;;  %v1652_v29 = vpack.c.bf16 %v798_v28, %v796_v27  ;;  %v914_v27 = vld [vmem:[%s2449_s6 + $0x20] sm:$0xff]  ;;  %v915_v28 = vld [vmem:[%s2449_s6 + $0x28] sm:$0xff] }
 0x201   : > { %1613 = vmatprep.subr.bf16.mxu0 %v1612_v32  ;;  %v1654_v32 = vpack.c.bf16 %v797_v31, %v795_v30  ;;  %v932_v30 = vld [vmem:[%s2449_s6 + $0xb0] sm:$0xff]  ;;  %v933_v31 = vld [vmem:[%s2449_s6 + $0xb8] sm:$0xff] }
 0x204   : > { %1615 = vmatpush1.bf16.msra.mxu0 %v1614_v35 }
 0x205   : > { %1617 = vmatprep.subr.bf16.mxu0 %v1616_v38 }
 0x208   : > { %1619 = vmatpush1.bf16.msra.mxu0 %v1618_v41 }
 0x209   : > { %1621 = vmatprep.subr.bf16.mxu0 %v1620_v44 }
 0x20c   : > { %1623 = vmatpush1.bf16.msra.mxu0 %v1622_v47 }
 0x20d   : > { %1625 = vmatprep.subr.bf16.mxu0 %v1624_v50 }
 0x210   : > { %1627 = vmatpush1.bf16.msra.mxu0 %v1626_v53 }
 0x211   : > { %1629 = vmatprep.subr.bf16.mxu0 %v1628_v56 }
 0x214   : > { %1631 = vmatpush1.bf16.msra.mxu0 %v1630_v59 }
 0x215   : > { %1633 = vmatprep.subr.bf16.mxu0 %v1632_v62 }
 0x218   : > { %1635 = vmatpush1.bf16.msra.mxu0 %v1634_v1 }
 0x219   : > { %1637 = vmatprep.subr.bf16.mxu0 %v1636_v4 }
 0x21c   : > { %1639 = vmatpush1.bf16.msra.mxu0 %v1638_v7 }
 0x21d   : > { %1641 = vmatprep.subr.bf16.mxu0 %v1640_v10 }
 0x220   : > { %1643 = vmatpush1.bf16.msra.mxu0 %v1642_v13  ;;  %v1656_v13 = vpack.c.bf16 %v927_v12, %v926_v11 }
 0x221   : > { %1645 = vmatprep.subr.bf16.mxu0 %v1644_v16  ;;  %v1658_v16 = vpack.c.bf16 %v911_v15, %v910_v14 }
 0x222   : > { %1657 = vmatprep.subr.bf16.mxu1 %v1656_v13 }
 0x223   : > { %1659 = vmatpush3.bf16.msra.mxu1 %v1658_v16 }
 0x224   : > { %1647 = vmatpush1.bf16.msra.mxu0 %v1646_v19  ;;  %v1660_v19 = vpack.c.bf16 %v929_v18, %v928_v17 }
 0x225   : > { %1649 = vmatprep.subr.bf16.mxu0 %v1648_v23  ;;  %v1662_v23 = vpack.c.bf16 %v913_v22, %v912_v20 }
 0x226   : > { %1661 = vmatprep.subr.bf16.mxu1 %v1660_v19 }
 0x227   : > { %1663 = vmatpush3.bf16.msra.mxu1 %v1662_v23 }
 0x228   : > { %1651 = vmatpush1.bf16.msra.mxu0 %v1650_v26  ;;  %v1664_v26 = vpack.c.bf16 %v931_v25, %v930_v24 }
 0x229   : > { %1653 = vmatprep.subr.bf16.mxu0 %v1652_v29  ;;  %v1666_v29 = vpack.c.bf16 %v915_v28, %v914_v27 }
 0x22a   : > { %1665 = vmatprep.subr.bf16.mxu1 %v1664_v26 }
 0x22b   : > { %1667 = vmatpush3.bf16.msra.mxu1 %v1666_v29 }
 0x22c   : > { %1655 = vmatpush1.bf16.msra.mxu0 %v1654_v32  ;;  %v1668_v32 = vpack.c.bf16 %v933_v31, %v932_v30 }
 0x22e   : > { %1669 = vmatprep.subr.bf16.mxu1 %v1668_v32 }
 0x2c2   : > { %v689_v33 = vpop.f32.mrb[0].mxu0 }
 0x2c3   : > { %v694_v34 = vrot.slane %v689_v33, 4  ;;  %v691_v35 = vpop.f32.mrb[1].mxu0 }
 0x2c4   : > { %v700_v36 = vrot.slane %v691_v35, 4 }
 0x2c5   : > { %v695_v37 = vadd.f32 %v694_v34, %v689_v33  ;;  %v917_v34 = vld [vmem:[%s2449_s6 + $0x38] sm:$0xff] }
 0x2c6   : > { %v701_v38 = vadd.f32 %v700_v36, %v691_v35  ;;  %v934_v36 = vld [vmem:[%s2449_s6 + $0xc0] sm:$0xff] }
 0x2c7   : > { %v696_v39 = vrot.slane %v695_v37, 2 }
 0x2c8   : > { %v702_v40 = vrot.slane %v701_v38, 2 }
 0x2c9   : > { %v697_v41 = vadd.f32 %v696_v39, %v695_v37  ;;  %v935_v37 = vld [vmem:[%s2449_s6 + $0xc8] sm:$0xff]  ;;  %v918_v39 = vld [vmem:[%s2449_s6 + $0x40] sm:$0xff] }
 0x2ca   : > { %v703_v42 = vadd.f32 %v702_v40, %v701_v38  ;;  %v1672_v38 = vpack.c.bf16 %v935_v37, %v934_v36  ;;  %v919_v40 = vld [vmem:[%s2449_s6 + $0x48] sm:$0xff] }
 0x2cb   : > { %v698_v43 = vrot.slane %v697_v41, 1 }
 0x2cc   : > { %v704_v44 = vrot.slane %v703_v42, 1 }
 0x2cd   : > { %v699_v45 = vadd.f32 %v698_v43, %v697_v41  ;;  %v1674_v41 = vpack.c.bf16 %v919_v40, %v918_v39  ;;  %v937_v43 = vld [vmem:[%s2449_s6 + $0xd8] sm:$0xff]  ;;  %v1032_v39 = vld [vmem:[%s2450_s7 + $0x8] sm:$0xff] }
 0x2ce   : > { %v705_v46 = vadd.f32 %v704_v44, %v703_v42  ;;  %v936_v42 = vld [vmem:[%s2449_s6 + $0xd0] sm:$0xff]  ;;  %v1034_v40 = vld [vmem:[%s2450_s7 + $0x18] sm:$0xff] }
 0x2cf   : > { %v707_v47 = vmul.f32 0.125, %v699_v45  ;;  %v1676_v44 = vpack.c.bf16 %v937_v43, %v936_v42  ;;  %v920_v45 = vld [vmem:[%s2449_s6 + $0x50] sm:$0xff]  ;;  %v1031_v42 = vld [vmem:[%s2450_s7] sm:$0xff] }
 0x2d0   : > { %v708_v48 = vmul.f32 0.125, %v705_v46  ;;  %v921_v46 = vld [vmem:[%s2449_s6 + $0x58] sm:$0xff]  ;;  %v1033_v43 = vld [vmem:[%s2450_s7 + $0x10] sm:$0xff] }
 0x2d1   : > { %v709_v49 = vsub.f32 %v689_v33, %v707_v47  ;;  %v916_v33 = vld [vmem:[%s2449_s6 + $0x30] sm:$0xff]  ;;  %v1678_v47 = vpack.c.bf16 %v921_v46, %v920_v45  ;;  %v1038_v45 = vld [vmem:[%s2450_s7 + $0x38] sm:$0xff] }
 0x2d2   : > { %v710_v50 = vsub.f32 %v691_v35, %v708_v48  ;;  %v1670_v35 = vpack.c.bf16 %v917_v34, %v916_v33  ;;  %v938_v48 = vld [vmem:[%s2449_s6 + $0xe0] sm:$0xff] }
 0x2d3   : > { %v711_v51 = vmul.f32 %v709_v49, %v709_v49 }
 0x2d4   : > { %v712_v52 = vmul.f32 %v710_v50, %v710_v50  ;;  %1671 = vmatpush3.bf16.msra.mxu1 %v1670_v35 }
 0x2d5   : > { %v713_v53 = vrot.slane %v711_v51, 4  ;;  %1673 = vmatprep.subr.bf16.mxu1 %v1672_v38 }
 0x2d6   : > { %v719_v54 = vrot.slane %v712_v52, 4 }
 0x2d7   : > { %v714_v55 = vadd.f32 %v713_v53, %v711_v51  ;;  %v922_v51 = vld [vmem:[%s2449_s6 + $0x60] sm:$0xff] }
 0x2d8   : > { %v720_v56 = vadd.f32 %v719_v54, %v712_v52  ;;  %1675 = vmatpush3.bf16.msra.mxu1 %v1674_v41  ;;  %v923_v52 = vld [vmem:[%s2449_s6 + $0x68] sm:$0xff]  ;;  %v940_v54 = vld [vmem:[%s2449_s6 + $0xf0] sm:$0xff]  ;;  %v1688_v41 = vpack.c.bf16 %v1034_v40, %v1032_v39 }
 0x2d9   : > { %v715_v57 = vrot.slane %v714_v55, 2  ;;  %1677 = vmatprep.subr.bf16.mxu1 %v1676_v44  ;;  %v1682_v53 = vpack.c.bf16 %v923_v52, %v922_v51  ;;  %v1690_v44 = vpack.c.bf16 %v1033_v43, %v1031_v42  ;;  %v1042_v51 = vld [vmem:[%s2450_s7 + $0x58] sm:$0xff] }
 0x2da   : > { %v721_v58 = vrot.slane %v720_v56, 2 }
 0x2db   : > { %v716_v59 = vadd.f32 %v715_v57, %v714_v55  ;;  %v941_v55 = vld [vmem:[%s2449_s6 + $0xf8] sm:$0xff]  ;;  %v924_v57 = vld [vmem:[%s2449_s6 + $0x70] sm:$0xff] }
 0x2dc   : > { %v722_v60 = vadd.f32 %v721_v58, %v720_v56  ;;  %1679 = vmatpush3.bf16.msra.mxu1 %v1678_v47  ;;  %v1684_v56 = vpack.c.bf16 %v941_v55, %v940_v54  ;;  %v925_v58 = vld [vmem:[%s2449_s6 + $0x78] sm:$0xff]  ;;  %v1035_v47 = vld [vmem:[%s2450_s7 + $0x20] sm:$0xff]  ;;  %v1041_v54 = vld [vmem:[%s2450_s7 + $0x50] sm:$0xff] }
 0x2dd   : > { %v717_v61 = vrot.slane %v716_v59, 1 }
 0x2de   : > { %v723_v62 = vrot.slane %v722_v60, 1 }
 0x2df   : > { %v718_v63 = vadd.f32 %v717_v61, %v716_v59  ;;  %v1686_v59 = vpack.c.bf16 %v925_v58, %v924_v57  ;;  %v1046_v57 = vld [vmem:[%s2450_s7 + $0x78] sm:$0xff] }
 0x2e0   : > { %v724_v0 = vadd.f32 %v723_v62, %v722_v60 }
 0x2e1   : > { %v725_v1 = vmul.f32 0.125, %v718_v63 }
 0x2e2   : > { %v726_v2 = vmul.f32 0.125, %v724_v0 }
 0x2e3   : > { %v727_v3 = vadd.f32 1e-05, %v725_v1 }
 0x2e4   : > { %v728_v4 = vadd.f32 1e-05, %v726_v2 }
 0x2e5   : > { %1763 = vrsqrt.f32 %v727_v3 }
 0x2e6   : > { %1765 = vrsqrt.f32 %v728_v4 }
 0x2ef   : > { %v1764_v5 = vpop.eup %1763 }
 0x2f0   : > { %v1766_v6 = vpop.eup %1765  ;;  %v731_v7 = vmul.f32 %v1764_v5, %v709_v49  ;;  %v939_v49 = vld [vmem:[%s2449_s6 + $0xe8] sm:$0xff] }
 0x2f1   : > { %v732_v8 = vmul.f32 %v1766_v6, %v710_v50  ;;  %v1680_v50 = vpack.c.bf16 %v939_v49, %v938_v48  ;;  %v1037_v48 = vld [vmem:[%s2450_s7 + $0x30] sm:$0xff] }
 0x2f2   : > { %v733_v10 = vmax.f32 %v731_v7, 0.0  ;;  %v1694_v49 = vpack.c.bf16 %v1037_v48, %v1035_v47  ;;  %v1174_v47 = vld [vmem:[%s2451_s8] sm:$0xff]  ;;  %v1175_v48 = vld [vmem:[%s2451_s8 + $0x8] sm:$0xff] }
 0x2f3   : > { %v734_v9 = vmax.f32 %v732_v8, 0.0  ;;  %1681 = vmatprep.subr.bf16.mxu1 %v1680_v50  ;;  %v1040_v50 = vld [vmem:[%s2450_s7 + $0x48] sm:$0xff] }
 0x2f4   : > { %1683 = vmatpush3.bf16.msra.mxu1 %v1682_v53  ;;  %v1696_v52 = vpack.c.bf16 %v1042_v51, %v1040_v50  ;;  %v1039_v53 = vld [vmem:[%s2450_s7 + $0x40] sm:$0xff]  ;;  %v1192_v50 = vld [vmem:[%s2451_s8 + $0x90] sm:$0xff]  ;;  %v1193_v51 = vld [vmem:[%s2451_s8 + $0x98] sm:$0xff] }
 0x2f5   : > { %863 = vmatprep.mubr.f32.mxu0 %v734_v9  ;;  %1685 = vmatprep.subr.bf16.mxu1 %v1684_v56  ;;  %v1698_v55 = vpack.c.bf16 %v1041_v54, %v1039_v53  ;;  %v1044_v56 = vld [vmem:[%s2450_s7 + $0x68] sm:$0xff]  ;;  %v1176_v53 = vld [vmem:[%s2451_s8 + $0x10] sm:$0xff]  ;;  %v1177_v54 = vld [vmem:[%s2451_s8 + $0x18] sm:$0xff] }
 0x2f6   : > { %864 = vmatmul.mubr.f32.vlgmr.msra.gmra.mrb[2].mxu0 %v733_v10  ;;  %v1700_v58 = vpack.c.bf16 %v1046_v57, %v1044_v56  ;;  %v1194_v56 = vld [vmem:[%s2451_s8 + $0xa0] sm:$0xff]  ;;  %v1195_v57 = vld [vmem:[%s2451_s8 + $0xa8] sm:$0xff] }
 0x2f8   : > { %1687 = vmatpush3.bf16.msra.mxu1 %v1686_v59  ;;  %v1043_v59 = vld [vmem:[%s2450_s7 + $0x60] sm:$0xff] }
 0x2f9   : > { %1689 = vmatprep.subr.bf16.mxu1 %v1688_v41 }
 0x3c9   : > { %v865_v60 = vpop.f32.mrb[2].mxu0 }
 0x3ca   : > { %v870_v61 = vrot.slane %v865_v60, 4  ;;  %v867_v62 = vpop.f32.mrb[3].mxu0 }
 0x3cb   : > { %v876_v63 = vrot.slane %v867_v62, 4 }
 0x3cc   : > { %v871_v0 = vadd.f32 %v870_v61, %v865_v60 }
 0x3cd   : > { %v877_v1 = vadd.f32 %v876_v63, %v867_v62  ;;  %v1050_v63 = vld [vmem:[%s2450_s7 + $0x98] sm:$0xff] }
 0x3ce   : > { %v872_v2 = vrot.slane %v871_v0, 2 }
 0x3cf   : > { %v878_v3 = vrot.slane %v877_v1, 2 }
 0x3d0   : > { %v873_v4 = vadd.f32 %v872_v2, %v871_v0  ;;  %v1049_v2 = vld [vmem:[%s2450_s7 + $0x90] sm:$0xff] }
 0x3d1   : > { %v879_v5 = vadd.f32 %v878_v3, %v877_v1  ;;  %v1047_v1 = vld [vmem:[%s2450_s7 + $0x80] sm:$0xff] }
 0x3d2   : > { %v874_v6 = vrot.slane %v873_v4, 1  ;;  %v1706_v3 = vpack.c.bf16 %v1049_v2, %v1047_v1  ;;  %v1180_v1 = vld [vmem:[%s2451_s8 + $0x30] sm:$0xff]  ;;  %v1181_v2 = vld [vmem:[%s2451_s8 + $0x38] sm:$0xff] }
 0x3d3   : > { %v880_v7 = vrot.slane %v879_v5, 1 }
 0x3d4   : > { %v875_v8 = vadd.f32 %v874_v6, %v873_v4  ;;  %v1052_v4 = vld [vmem:[%s2450_s7 + $0xa8] sm:$0xff] }
 0x3d5   : > { %v881_v9 = vadd.f32 %v880_v7, %v879_v5  ;;  %v1054_v5 = vld [vmem:[%s2450_s7 + $0xb8] sm:$0xff]  ;;  %v1051_v7 = vld [vmem:[%s2450_s7 + $0xa0] sm:$0xff] }
 0x3d6   : > { %v882_v10 = vmul.f32 0.125, %v875_v8  ;;  %v1708_v6 = vpack.c.bf16 %v1054_v5, %v1052_v4  ;;  %v1053_v8 = vld [vmem:[%s2450_s7 + $0xb0] sm:$0xff]  ;;  %v1198_v4 = vld [vmem:[%s2451_s8 + $0xc0] sm:$0xff]  ;;  %v1199_v5 = vld [vmem:[%s2451_s8 + $0xc8] sm:$0xff] }
 0x3d7   : > { %v883_v11 = vmul.f32 0.125, %v881_v9  ;;  %v1710_v9 = vpack.c.bf16 %v1053_v8, %v1051_v7  ;;  %v1182_v7 = vld [vmem:[%s2451_s8 + $0x40] sm:$0xff]  ;;  %v1183_v8 = vld [vmem:[%s2451_s8 + $0x48] sm:$0xff] }
 0x3d8   : > { %v884_v12 = vsub.f32 %v865_v60, %v882_v10  ;;  %v1045_v60 = vld [vmem:[%s2450_s7 + $0x70] sm:$0xff]  ;;  %v1056_v10 = vld [vmem:[%s2450_s7 + $0xc8] sm:$0xff] }
 0x3d9   : > { %v885_v13 = vsub.f32 %v867_v62, %v883_v11  ;;  %v1702_v61 = vpack.c.bf16 %v1045_v60, %v1043_v59  ;;  %v1048_v62 = vld [vmem:[%s2450_s7 + $0x88] sm:$0xff]  ;;  %v1058_v11 = vld [vmem:[%s2450_s7 + $0xd8] sm:$0xff]  ;;  %v1178_v59 = vld [vmem:[%s2451_s8 + $0x20] sm:$0xff] }
 0x3da   : > { %v886_v14 = vmul.f32 %v884_v12, %v884_v12  ;;  %v1704_v0 = vpack.c.bf16 %v1050_v63, %v1048_v62  ;;  %v1179_v60 = vld [vmem:[%s2451_s8 + $0x28] sm:$0xff]  ;;  %v1196_v62 = vld [vmem:[%s2451_s8 + $0xb0] sm:$0xff]  ;;  %v1197_v63 = vld [vmem:[%s2451_s8 + $0xb8] sm:$0xff] }
 0x3db   : > { %v887_v15 = vmul.f32 %v885_v13, %v885_v13 }
 0x3dc   : > { %v888_v16 = vrot.slane %v886_v14, 4 }
 0x3dd   : > { %v894_v17 = vrot.slane %v887_v15, 4 }
 0x3de   : > { %v889_v18 = vadd.f32 %v888_v16, %v886_v14  ;;  %v1057_v14 = vld [vmem:[%s2450_s7 + $0xd0] sm:$0xff]  ;;  %v1060_v16 = vld [vmem:[%s2450_s7 + $0xe8] sm:$0xff] }
 0x3df   : > { %v895_v19 = vadd.f32 %v894_v17, %v887_v15  ;;  %v1062_v17 = vld [vmem:[%s2450_s7 + $0xf8] sm:$0xff] }
 0x3e0   : > { %v890_v20 = vrot.slane %v889_v18, 2 }
 0x3e1   : > { %v896_v22 = vrot.slane %v895_v19, 2 }
 0x3e2   : > { %v891_v23 = vadd.f32 %v890_v20, %v889_v18  ;;  %v1716_v18 = vpack.c.bf16 %v1062_v17, %v1060_v16  ;;  %v1061_v20 = vld [vmem:[%s2450_s7 + $0xf0] sm:$0xff]  ;;  %v1202_v16 = vld [vmem:[%s2451_s8 + $0xe0] sm:$0xff]  ;;  %v1203_v17 = vld [vmem:[%s2451_s8 + $0xe8] sm:$0xff] }
 0x3e3   : > { %v897_v24 = vadd.f32 %v896_v22, %v895_v19  ;;  %v1059_v19 = vld [vmem:[%s2450_s7 + $0xe0] sm:$0xff] }
 0x3e4   : > { %v892_v25 = vrot.slane %v891_v23, 1  ;;  %v1718_v22 = vpack.c.bf16 %v1061_v20, %v1059_v19  ;;  %v1186_v19 = vld [vmem:[%s2451_s8 + $0x60] sm:$0xff]  ;;  %v1187_v20 = vld [vmem:[%s2451_s8 + $0x68] sm:$0xff] }
 0x3e5   : > { %v898_v26 = vrot.slane %v897_v24, 1 }
 0x3e6   : > { %v893_v27 = vadd.f32 %v892_v25, %v891_v23 }
 0x3e7   : > { %v899_v28 = vadd.f32 %v898_v26, %v897_v24 }
 0x3e8   : > { %v900_v29 = vmul.f32 0.125, %v893_v27 }
 0x3e9   : > { %v901_v30 = vmul.f32 0.125, %v899_v28 }
 0x3ea   : > { %v902_v31 = vadd.f32 1e-05, %v900_v29 }
 0x3eb   : > { %v903_v32 = vadd.f32 1e-05, %v901_v30 }
 0x3ec   : > { %1767 = vrsqrt.f32 %v902_v31 }
 0x3ed   : > { %1769 = vrsqrt.f32 %v903_v32 }
 0x3f6   : > { %v1768_v33 = vpop.eup %1767 }
 0x3f7   : > { %v1770_v34 = vpop.eup %1769  ;;  %v906_v35 = vmul.f32 %v1768_v33, %v884_v12  ;;  %v1712_v12 = vpack.c.bf16 %v1058_v11, %v1056_v10  ;;  %v1200_v10 = vld [vmem:[%s2451_s8 + $0xd0] sm:$0xff]  ;;  %v1201_v11 = vld [vmem:[%s2451_s8 + $0xd8] sm:$0xff] }
 0x3f8   : > { %v907_v36 = vmul.f32 %v1770_v34, %v885_v13  ;;  %v1055_v13 = vld [vmem:[%s2450_s7 + $0xc0] sm:$0xff] }
 0x3f9   : > { %v908_v38 = vmax.f32 %v906_v35, 0.0  ;;  %v1714_v15 = vpack.c.bf16 %v1057_v14, %v1055_v13  ;;  %v1184_v13 = vld [vmem:[%s2451_s8 + $0x50] sm:$0xff]  ;;  %v1185_v14 = vld [vmem:[%s2451_s8 + $0x58] sm:$0xff] }
 0x3fa   : > { %v909_v37 = vmax.f32 %v907_v36, 0.0 }
 0x3fc   : > { %1006 = vmatprep.mubr.f32.mxu1 %v909_v37 }
 0x3fd   : > { %1007 = vmatmul.mubr.f32.vlgmr.msra.gmra.mrb[10].mxu1 %v908_v38 }
 0x3fe   : > { %1127 = vmatprep.mubr.f32.mxu1 %v1789_v21  ;;  %1691 = vmatpush1.bf16.msra.mxu1 %v1690_v44  ;;  %v1036_v21 = vld [vmem:[%s2450_s7 + $0x28] sm:$0xff] }
 0x3ff   : > { %v1692_v46 = vpack.c.bf16 %v1038_v45, %v1036_v21  ;;  %v1190_v21 = vld [vmem:[%s2451_s8 + $0x80] sm:$0xff]  ;;  %v1191_v45 = vld [vmem:[%s2451_s8 + $0x88] sm:$0xff] }
 0x401   : > { %1693 = vmatprep.subr.bf16.mxu1 %v1692_v46  ;;  %v1720_v46 = vpack.c.bf16 %v1191_v45, %v1190_v21 }
 0x402   : > { %1695 = vmatpush1.bf16.msra.mxu1 %v1694_v49  ;;  %v1722_v49 = vpack.c.bf16 %v1175_v48, %v1174_v47 }
 0x403   : > { %1697 = vmatprep.subr.bf16.mxu1 %v1696_v52  ;;  %1721 = vmatprep.subr.bf16.mxu0 %v1720_v46  ;;  %v1724_v52 = vpack.c.bf16 %v1193_v51, %v1192_v50 }
 0x404   : > { %1723 = vmatpush3.bf16.msra.mxu0 %v1722_v49 }
 0x405   : > { %1725 = vmatprep.subr.bf16.mxu0 %v1724_v52 }
 0x406   : > { %1699 = vmatpush1.bf16.msra.mxu1 %v1698_v55  ;;  %v1726_v55 = vpack.c.bf16 %v1177_v54, %v1176_v53 }
 0x407   : > { %1701 = vmatprep.subr.bf16.mxu1 %v1700_v58  ;;  %v1728_v58 = vpack.c.bf16 %v1195_v57, %v1194_v56 }
 0x408   : > { %1727 = vmatpush3.bf16.msra.mxu0 %v1726_v55 }
 0x409   : > { %1729 = vmatprep.subr.bf16.mxu0 %v1728_v58 }
 0x40a   : > { %1703 = vmatpush1.bf16.msra.mxu1 %v1702_v61  ;;  %v1730_v61 = vpack.c.bf16 %v1179_v60, %v1178_v59 }
 0x40b   : > { %1705 = vmatprep.subr.bf16.mxu1 %v1704_v0  ;;  %v1732_v0 = vpack.c.bf16 %v1197_v63, %v1196_v62 }
 0x40c   : > { %1731 = vmatpush3.bf16.msra.mxu0 %v1730_v61 }
 0x40d   : > { %1733 = vmatprep.subr.bf16.mxu0 %v1732_v0 }
 0x40e   : > { %1707 = vmatpush1.bf16.msra.mxu1 %v1706_v3  ;;  %v1734_v3 = vpack.c.bf16 %v1181_v2, %v1180_v1 }
 0x40f   : > { %1709 = vmatprep.subr.bf16.mxu1 %v1708_v6  ;;  %v1736_v6 = vpack.c.bf16 %v1199_v5, %v1198_v4 }
 0x410   : > { %1735 = vmatpush3.bf16.msra.mxu0 %v1734_v3 }
 0x411   : > { %1737 = vmatprep.subr.bf16.mxu0 %v1736_v6 }
 0x412   : > { %1711 = vmatpush1.bf16.msra.mxu1 %v1710_v9  ;;  %v1738_v9 = vpack.c.bf16 %v1183_v8, %v1182_v7 }
 0x413   : > { %1713 = vmatprep.subr.bf16.mxu1 %v1712_v12  ;;  %v1740_v12 = vpack.c.bf16 %v1201_v11, %v1200_v10 }
 0x414   : > { %1739 = vmatpush3.bf16.msra.mxu0 %v1738_v9 }
 0x415   : > { %1741 = vmatprep.subr.bf16.mxu0 %v1740_v12 }
 0x416   : > { %1715 = vmatpush1.bf16.msra.mxu1 %v1714_v15  ;;  %v1742_v15 = vpack.c.bf16 %v1185_v14, %v1184_v13 }
 0x417   : > { %1717 = vmatprep.subr.bf16.mxu1 %v1716_v18  ;;  %v1744_v18 = vpack.c.bf16 %v1203_v17, %v1202_v16 }
 0x418   : > { %1743 = vmatpush3.bf16.msra.mxu0 %v1742_v15 }
 0x419   : > { %1745 = vmatprep.subr.bf16.mxu0 %v1744_v18 }
 0x41a   : > { %1719 = vmatpush1.bf16.msra.mxu1 %v1718_v22  ;;  %v1746_v22 = vpack.c.bf16 %v1187_v20, %v1186_v19 }
 0x41c   : > { %1747 = vmatpush3.bf16.msra.mxu0 %v1746_v22 }
 0x4d0   : > { %v1463_v23 = vpop.f32.mrb[10].mxu1 }
 0x4d1   : > { %v1464_v24 = vpop.f32.mrb[11].mxu1 }
 0x4d2   : > { %v1465_v25 = vadd.f32 %v1464_v24, %v1463_v23  ;;  %v1204_v23 = vld [vmem:[%s2451_s8 + $0xf0] sm:$0xff]  ;;  %v1205_v24 = vld [vmem:[%s2451_s8 + $0xf8] sm:$0xff] }
 0x4d4   : > { %v1012_v26 = vrot.slane %v1465_v25, 4 }
 0x4d6   : > { %v1013_v27 = vadd.f32 %v1465_v25, %v1012_v26  ;;  %v1188_v26 = vld [vmem:[%s2451_s8 + $0x70] sm:$0xff] }
 0x4d8   : > { %v1014_v28 = vrot.slane %v1013_v27, 2 }
 0x4da   : > { %v1015_v29 = vadd.f32 %v1014_v28, %v1013_v27  ;;  %v1189_v27 = vld [vmem:[%s2451_s8 + $0x78] sm:$0xff] }
 0x4db   : > { %v1750_v28 = vpack.c.bf16 %v1189_v27, %v1188_v26 }
 0x4dc   : > { %v1016_v30 = vrot.slane %v1015_v29, 1 }
 0x4de   : > { %v1017_v31 = vadd.f32 %v1016_v30, %v1015_v29 }
 0x4e0   : > { %v1018_v32 = vmul.f32 0.125, %v1017_v31 }
 0x4e2   : > { %v1019_v33 = vsub.f32 %v1465_v25, %v1018_v32  ;;  %v1748_v25 = vpack.c.bf16 %v1205_v24, %v1204_v23 }
 0x4e4   : > { %v1020_v34 = vmul.f32 %v1019_v33, %v1019_v33  ;;  %1749 = vmatprep.subr.bf16.mxu0 %v1748_v25 }
 0x4e5   : > { %1751 = vmatpush3.bf16.msra.mxu0 %v1750_v28 }
 0x4e6   : > { %v1021_v35 = vrot.slane %v1020_v34, 4 }
 0x4e8   : > { %v1022_v36 = vadd.f32 %v1021_v35, %v1020_v34 }
 0x4ea   : > { %v1023_v37 = vrot.slane %v1022_v36, 2 }
 0x4ec   : > { %v1024_v38 = vadd.f32 %v1023_v37, %v1022_v36 }
 0x4ee   : > { %v1025_v39 = vrot.slane %v1024_v38, 1 }
 0x4f0   : > { %v1026_v40 = vadd.f32 %v1025_v39, %v1024_v38 }
 0x4f2   : > { %v1027_v41 = vmul.f32 0.125, %v1026_v40 }
 0x4f4   : > { %v1028_v42 = vadd.f32 1e-05, %v1027_v41 }
 0x4f6   : > { %1771 = vrsqrt.f32 %v1028_v42 }
 0x500   : > { %v1772_v43 = vpop.eup %1771 }
 0x501   : > { %v1030_v44 = vmul.f32 %v1772_v43, %v1019_v33 }
 0x503   : > { %1128 = vmatmul.mubr.f32.vlgmr.msra.gmra.mrb[12].mxu1 %v1030_v44 }
 0x5d6   : > { %v1129_v29 = vpop.f32.mrb[12].mxu1 }
 0x5d7   : > { %v1134_v30 = vrot.slane %v1129_v29, 4  ;;  %v1131_v31 = vpop.f32.mrb[13].mxu1 }
 0x5d8   : > { %v1140_v32 = vrot.slane %v1131_v31, 4 }
 0x5d9   : > { %v1135_v33 = vadd.f32 %v1134_v30, %v1129_v29 }
 0x5da   : > { %v1141_v34 = vadd.f32 %v1140_v32, %v1131_v31 }
 0x5db   : > { %v1136_v35 = vrot.slane %v1135_v33, 2 }
 0x5dc   : > { %v1142_v36 = vrot.slane %v1141_v34, 2 }
 0x5dd   : > { %v1137_v37 = vadd.f32 %v1136_v35, %v1135_v33 }
 0x5de   : > { %v1143_v38 = vadd.f32 %v1142_v36, %v1141_v34 }
 0x5df   : > { %v1138_v39 = vrot.slane %v1137_v37, 1 }
 0x5e0   : > { %v1144_v40 = vrot.slane %v1143_v38, 1 }
 0x5e1   : > { %v1139_v41 = vadd.f32 %v1138_v39, %v1137_v37 }
 0x5e2   : > { %v1145_v42 = vadd.f32 %v1144_v40, %v1143_v38 }
 0x5e3   : > { %v1146_v43 = vmul.f32 0.125, %v1139_v41 }
 0x5e4   : > { %v1147_v44 = vmul.f32 0.125, %v1145_v42 }
 0x5e5   : > { %v1148_v21 = vsub.f32 %v1129_v29, %v1146_v43 }
 0x5e6   : > { %v1149_v45 = vsub.f32 %v1131_v31, %v1147_v44 }
 0x5e7   : > { %v1150_v46 = vmul.f32 %v1148_v21, %v1148_v21 }
 0x5e8   : > { %v1151_v47 = vmul.f32 %v1149_v45, %v1149_v45 }
 0x5e9   : > { %v1152_v48 = vrot.slane %v1150_v46, 4 }
 0x5ea   : > { %v1158_v49 = vrot.slane %v1151_v47, 4 }
 0x5eb   : > { %v1153_v50 = vadd.f32 %v1152_v48, %v1150_v46 }
 0x5ec   : > { %v1159_v51 = vadd.f32 %v1158_v49, %v1151_v47 }
 0x5ed   : > { %v1154_v52 = vrot.slane %v1153_v50, 2 }
 0x5ee   : > { %v1160_v53 = vrot.slane %v1159_v51, 2 }
 0x5ef   : > { %v1155_v54 = vadd.f32 %v1154_v52, %v1153_v50 }
 0x5f0   : > { %v1161_v55 = vadd.f32 %v1160_v53, %v1159_v51 }
 0x5f1   : > { %v1156_v56 = vrot.slane %v1155_v54, 1 }
 0x5f2   : > { %v1162_v57 = vrot.slane %v1161_v55, 1 }
 0x5f3   : > { %v1157_v58 = vadd.f32 %v1156_v56, %v1155_v54 }
 0x5f4   : > { %v1163_v59 = vadd.f32 %v1162_v57, %v1161_v55 }
 0x5f5   : > { %v1164_v60 = vmul.f32 0.125, %v1157_v58 }
 0x5f6   : > { %v1165_v61 = vmul.f32 0.125, %v1163_v59 }
 0x5f7   : > { %v1166_v62 = vadd.f32 1e-05, %v1164_v60 }
 0x5f8   : > { %v1167_v63 = vadd.f32 1e-05, %v1165_v61 }
 0x5f9   : > { %1773 = vrsqrt.f32 %v1166_v62 }
 0x5fa   : > { %1775 = vrsqrt.f32 %v1167_v63 }
 0x603   : > { %v1774_v0 = vpop.eup %1773 }
 0x604   : > { %v1776_v1 = vpop.eup %1775  ;;  %v1170_v2 = vmul.f32 %v1774_v0, %v1148_v21 }
 0x605   : > { %v1171_v3 = vmul.f32 %v1776_v1, %v1149_v45 }
 0x606   : > { %v1172_v5 = vmax.f32 %v1170_v2, 0.0 }
 0x607   : > { %v1173_v4 = vmax.f32 %v1171_v3, 0.0 }
 0x609   : > { %1270 = vmatprep.mubr.f32.mxu0 %v1173_v4 }
 0x60a   : > { %1271 = vmatmul.mubr.f32.vlgmr.msra.gmra.mrb[4].mxu0 %v1172_v5 }
 0x6dd   : > { %v1498_v6 = vpop.f32.mrb[4].mxu0 }
 0x6de   : > { %v1499_v7 = vpop.f32.mrb[5].mxu0 }
 0x6df   : > { %v1500_v8 = vadd.f32 %v1499_v7, %v1498_v6 }
 0x6e1   : > { %v1276_v9 = vrot.slane %v1500_v8, 4 }
 0x6e3   : > { %v1277_v10 = vadd.f32 %v1500_v8, %v1276_v9 }
 0x6e5   : > { %v1278_v11 = vrot.slane %v1277_v10, 2 }
 0x6e7   : > { %v1279_v12 = vadd.f32 %v1278_v11, %v1277_v10 }
 0x6e9   : > { %v1280_v13 = vrot.slane %v1279_v12, 1 }
 0x6eb   : > { %v1281_v14 = vadd.f32 %v1280_v13, %v1279_v12 }
 0x6ed   : > { %v1282_v15 = vmul.f32 0.125, %v1281_v14 }
 0x6ef   : > { %v1283_v16 = vsub.f32 %v1500_v8, %v1282_v15 }
 0x6f1   : > { %v1284_v17 = vmul.f32 %v1283_v16, %v1283_v16 }
 0x6f3   : > { %v1285_v18 = vrot.slane %v1284_v17, 4 }
 0x6f5   : > { %v1286_v19 = vadd.f32 %v1285_v18, %v1284_v17 }
 0x6f7   : > { %v1287_v20 = vrot.slane %v1286_v19, 2 }
 0x6f9   : > { %v1288_v22 = vadd.f32 %v1287_v20, %v1286_v19 }
 0x6fb   : > { %v1289_v23 = vrot.slane %v1288_v22, 1 }
 0x6fd   : > { %v1290_v24 = vadd.f32 %v1289_v23, %v1288_v22 }
 0x6ff   : > { %v1291_v25 = vmul.f32 0.125, %v1290_v24 }
 0x701   : > { %v1292_v26 = vadd.f32 1e-05, %v1291_v25 }
 0x703   : > { %1777 = vrsqrt.f32 %v1292_v26 }
 0x70d   : > { %v1778_v27 = vpop.eup %1777 }
 0x70e   : > { %v1294_v28 = vmul.f32 %v1778_v27, %v1283_v16 }
 0x710   : > { %1295 = vst [vmem:[%s365_s21] sm:$0xff] %v1294_v28 }
 0x711 PF: > { %s21_s13 = sadd.s32 1, %s1785_s13  }
 0x712   : > { %p18_p4 = scmp.ge.s32.totalorder %s21_s13, 4  }
 0x714   :  { %20 = sbr.rel (!%p18_p4) target bundleno = 1 (0x1), region = 98 }

// kernel: gssl_forward.5
= control target key start
LH: loop header
LB: loop body
LE: loop exit
PB: predicated region body
PF: predicated region fallthrough
CT: control target
= control target key end

     0   :  { %s1407_s27 = smov 0   ;;  %s1811_s0 = inlined_call_operand.vmem [shape: f32[2,64,128], index: 0, kind: input, shape index: {}]   ;;  %s1812_s1 = inlined_call_operand.vmem [shape: f32[64,64], index: 1, kind: input, shape index: {}]   ;;  %s1813_s2 = inlined_call_operand.vmem [shape: f32[1,64], index: 2, kind: input, shape index: {}]   ;;  %s1814_s3 = inlined_call_operand.vmem [shape: f32[8,128], index: 3, kind: input, shape index: {}]   ;;  %s1815_s4 = inlined_call_operand.vmem [shape: f32[64,256], index: 4, kind: input, shape index: {}]   ;;  %s1816_s5 = inlined_call_operand.vmem [shape: f32[256,256], index: 5, kind: input, shape index: {}]   ;;  %s1817_s6 = inlined_call_operand.vmem [shape: f32[256,128], index: 6, kind: input, shape index: {}]   ;;  %s1818_s7 = inlined_call_operand.vmem [shape: f32[2,16,128], index: 7, kind: input, shape index: {}]   ;;  %s1819_s8 = inlined_call_operand.vmem [shape: f32[2,8,128], index: 8, kind: output, shape index: {}]  }
   0x1 LB: > { %s1059_s28 = sadd.s32 4294967295, %s1357_s27   ;;  %p1063_p0 = scmp.ge.s32.totalorder %s1357_s27, 1  ;;  %s1357_s27 = sphi %s1407_s27, %s18_s27  }
   0x2   : > { %p272_p1 = scmp.lt.s32.totalorder %s1357_s27, 3 }
   0x4   : > { %p273_p2 = pnand %p1063_p0, %p272_p1 }
   0x5   : > { %p310_p3 = scmp.lt.s32.totalorder (!%p273_p2), %s1059_s28, 1  ;;  %v324_v0 = vld [vmem:[%s1812_s1] sm:$0xff] (!%p273_p2)  ;;  %vm340_vm0 = vcmask (!%p273_p2), 523264   ;;  %v325_v13 = vld [vmem:[%s1812_s1 + $0x8] sm:$0xff] (!%p273_p2)  ;;  %v326_v14 = vld [vmem:[%s1812_s1 + $0x10] sm:$0xff] (!%p273_p2)  ;;  %v1359_v20 = vmov (!%p273_p2), 0.0|0.0  }
   0x6   : > { %276 = sbr.rel (%p273_p2) target bundleno = 1286 (0x506), region = 52  ;;  %1159 = vmatprep.mubr.msk.f32.mxu1 (!%p273_p2), %vm340_vm0, %v324_v0  ;;  %v327_v15 = vld [vmem:[%s1812_s1 + $0x18] sm:$0xff] (!%p273_p2)  ;;  %v328_v16 = vld [vmem:[%s1812_s1 + $0x20] sm:$0xff] (!%p273_p2)  ;;  %v329_v17 = vld [vmem:[%s1812_s1 + $0x28] sm:$0xff] (!%p273_p2)  ;;  %vm1360_vm1 = vmmov (!%p273_p2), 0   ;;  %v1361_v21 = vmov (!%p273_p2), 0.0  }
   0x7   : > { %v330_v18 = vld [vmem:[%s1812_s1 + $0x30] sm:$0xff] (!%p273_p2)  ;;  %v331_v19 = vld [vmem:[%s1812_s1 + $0x38] sm:$0xff] (!%p273_p2)  ;;  %649 = vmatprep.mubr.f32.mxu0 (!%p273_p2), %v1361_v21  ;;  %v567_v22 = vld [vmem:[%s1815_s4 + $0x8] sm:$0xff] (!%p273_p2) }
   0x8   : > { %v569_v23 = vld [vmem:[%s1815_s4 + $0x18] sm:$0xff] (!%p273_p2)  ;;  %v566_v24 = vld [vmem:[%s1815_s4] sm:$0xff] (!%p273_p2)  ;;  %v568_v26 = vld [vmem:[%s1815_s4 + $0x10] sm:$0xff] (!%p273_p2) }
   0x9   : > { %v1218_v25 = vpack.c.bf16 (!%p273_p2), %v569_v23, %v567_v22  ;;  %v571_v27 = vld [vmem:[%s1815_s4 + $0x28] sm:$0xff] (!%p273_p2)  ;;  %v573_v28 = vld [vmem:[%s1815_s4 + $0x38] sm:$0xff] (!%p273_p2)  ;;  %v1220_v29 = vpack.c.bf16 (!%p273_p2), %v568_v26, %v566_v24  ;;  %v570_v31 = vld [vmem:[%s1815_s4 + $0x20] sm:$0xff] (!%p273_p2) }
   0xa   : > { %v1222_v30 = vpack.c.bf16 (!%p273_p2), %v573_v28, %v571_v27  ;;  %v572_v32 = vld [vmem:[%s1815_s4 + $0x30] sm:$0xff] (!%p273_p2)  ;;  %v575_v33 = vld [vmem:[%s1815_s4 + $0x48] sm:$0xff] (!%p273_p2)  ;;  %v577_v34 = vld [vmem:[%s1815_s4 + $0x58] sm:$0xff] (!%p273_p2) }
   0xb   : > { %1219 = vmatprep.subr.bf16.mxu0 (!%p273_p2), %v1218_v25  ;;  %v1224_v35 = vpack.c.bf16 (!%p273_p2), %v572_v32, %v570_v31  ;;  %v1226_v36 = vpack.c.bf16 (!%p273_p2), %v577_v34, %v575_v33  ;;  %v574_v37 = vld [vmem:[%s1815_s4 + $0x40] sm:$0xff] (!%p273_p2)  ;;  %v576_v38 = vld [vmem:[%s1815_s4 + $0x50] sm:$0xff] (!%p273_p2)  ;;  %v579_v39 = vld [vmem:[%s1815_s4 + $0x68] sm:$0xff] (!%p273_p2) }
   0xc   : > { %1221 = vmatpush1.bf16.msra.mxu0 (!%p273_p2), %v1220_v29  ;;  %v581_v40 = vld [vmem:[%s1815_s4 + $0x78] sm:$0xff] (!%p273_p2)  ;;  %v1228_v41 = vpack.c.bf16 (!%p273_p2), %v576_v38, %v574_v37  ;;  %v701_v25 = vld [vmem:[%s1816_s5 + $0x20] sm:$0xff] (!%p273_p2)  ;;  %v703_v26 = vld [vmem:[%s1816_s5 + $0x30] sm:$0xff] (!%p273_p2) }
   0xd   : > { %s1821_s28 = smov (!%p310_p3, %s1059_s28), 1  ;;  %1223 = vmatprep.subr.bf16.mxu0 %v1222_v30  ;;  %v1230_v42 = vpack.c.bf16 %v581_v40, %v579_v39  ;;  %v706_v27 = vld [vmem:[%s1816_s5 + $0x48] sm:$0xff]  ;;  %v708_v28 = vld [vmem:[%s1816_s5 + $0x58] sm:$0xff]  ;;  %v1240_v29 = vpack.c.bf16 %v703_v26, %v701_v25  ;;  %v705_v31 = vld [vmem:[%s1816_s5 + $0x40] sm:$0xff] }
   0xe   : > { %s1081_s9 = sshll.u32 %s1821_s28, 6  ;;  %s1082_s15 = sshll.u32 %s1821_s28, 4  ;;  %v1242_v30 = vpack.c.bf16 %v708_v28, %v706_v27  ;;  %v707_v32 = vld [vmem:[%s1816_s5 + $0x50] sm:$0xff]  ;;  %v710_v34 = vld [vmem:[%s1816_s5 + $0x68] sm:$0xff]  ;;  %v709_v37 = vld [vmem:[%s1816_s5 + $0x60] sm:$0xff] }
   0xf   : > { %s314_s12 = scalar_lea.vmem %s1811_s0, %s1081_s9  ;;  %s319_s18 = scalar_lea.vmem %s1818_s7, %s1082_s15  ;;  %v1244_v33 = vpack.c.bf16 %v707_v32, %v705_v31  ;;  %v711_v38 = vld [vmem:[%s1816_s5 + $0x70] sm:$0xff]  ;;  %v714_v40 = vld [vmem:[%s1816_s5 + $0x88] sm:$0xff]  ;;  %v748_v25 = vld [vmem:[%s1816_s5 + $0x198] sm:$0xff] }
  0x10   : > { %v332_v1 = vld [vmem:[%s314_s12] sm:$0xff]  ;;  %v333_v2 = vld [vmem:[%s314_s12 + $0x8] sm:$0xff]  ;;  %v334_v4 = vld [vmem:[%s314_s12 + $0x10] sm:$0xff]  ;;  %1225 = vmatpush1.bf16.msra.mxu0 %v1224_v35  ;;  %v1248_v39 = vpack.c.bf16 %v711_v38, %v709_v37  ;;  %s1068_s19 = sshll.u32 %s1821_s28, 3 }
  0x11   : > { %v1190_v3 = vpack.c.bf16 %v333_v2, %v332_v1  ;;  %v335_v5 = vld [vmem:[%s314_s12 + $0x18] sm:$0xff]  ;;  %v336_v7 = vld [vmem:[%s314_s12 + $0x20] sm:$0xff]  ;;  %v337_v8 = vld [vmem:[%s314_s12 + $0x28] sm:$0xff]  ;;  %1227 = vmatprep.subr.bf16.mxu0 %v1226_v36  ;;  %s323_s22 = scalar_lea.vmem %s1819_s8, %s1068_s19 }
  0x12   : > { %v1194_v6 = vpack.c.bf16 %v335_v5, %v334_v4  ;;  %v1198_v9 = vpack.c.bf16 %v337_v8, %v336_v7  ;;  %v338_v10 = vld [vmem:[%s314_s12 + $0x30] sm:$0xff]  ;;  %v339_v11 = vld [vmem:[%s314_s12 + $0x38] sm:$0xff]  ;;  %v470_v43 = vld [vmem:[%s319_s18] sm:$0xff] }
  0x13   : > { %1191 = vmatprep.subr.bf16.mxu1 %v1190_v3  ;;  %v1202_v12 = vpack.c.bf16 %v339_v11, %v338_v10  ;;  %v471_v44 = vld [vmem:[%s319_s18 + $0x8] sm:$0xff]  ;;  %v487_v8 = vld [vmem:[%s1814_s3] sm:$0xff]  ;;  %v580_v10 = vld [vmem:[%s1815_s4 + $0x70] sm:$0xff] }
  0x14   : > { %1193 = vmatpush3.bf16.msra.mxu1 %v1190_v3  ;;  %1229 = vmatpush1.bf16.msra.mxu0 %v1228_v41  ;;  %v472_v45 = vmax.f32 %v470_v43, %v471_v44  ;;  %v712_v35 = vld [vmem:[%s1816_s5 + $0x78] sm:$0xff]  ;;  %v713_v43 = vld [vmem:[%s1816_s5 + $0x80] sm:$0xff]  ;;  %v715_v44 = vld [vmem:[%s1816_s5 + $0x90] sm:$0xff] }
  0x15   : > { %1195 = vmatprep.subr.bf16.mxu1 %v1194_v6  ;;  %1231 = vmatprep.subr.bf16.mxu0 %v1230_v42  ;;  %v1246_v36 = vpack.c.bf16 %v712_v35, %v710_v34  ;;  %v716_v41 = vld [vmem:[%s1816_s5 + $0x98] sm:$0xff]  ;;  %v745_v27 = vld [vmem:[%s1816_s5 + $0x180] sm:$0xff]  ;;  %v747_v28 = vld [vmem:[%s1816_s5 + $0x190] sm:$0xff] }
  0x16   : > { %v473_v46 = vrot.slane %v472_v45, 4  ;;  %v1250_v42 = vpack.c.bf16 %v716_v41, %v714_v40  ;;  %v752_v31 = vld [vmem:[%s1816_s5 + $0x1b8] sm:$0xff]  ;;  %v751_v34 = vld [vmem:[%s1816_s5 + $0x1b0] sm:$0xff] }
  0x17   : > { %v756_v37 = vld [vmem:[%s1816_s5 + $0x1d8] sm:$0xff]  ;;  %v755_v40 = vld [vmem:[%s1816_s5 + $0x1d0] sm:$0xff] }
  0x18   : > { %1197 = vmatpush3.bf16.msra.mxu1 %v1194_v6  ;;  %v474_v47 = vmax.f32 %v472_v45, %v473_v46  ;;  %v1252_v45 = vpack.c.bf16 %v715_v44, %v713_v43  ;;  %v718_v46 = vld [vmem:[%s1816_s5 + $0xa8] sm:$0xff]  ;;  %v760_v43 = vld [vmem:[%s1816_s5 + $0x1f8] sm:$0xff] }
  0x19   : > { %1199 = vmatprep.subr.bf16.mxu1 %v1198_v9 }
  0x1a   : > { %v475_v48 = vrot.slane %v474_v47, 2 }
  0x1c   : > { %1201 = vmatpush3.bf16.msra.mxu1 %v1198_v9  ;;  %v476_v49 = vmax.f32 %v474_v47, %v475_v48  ;;  %v578_v9 = vld [vmem:[%s1815_s4 + $0x60] sm:$0xff]  ;;  %v720_v47 = vld [vmem:[%s1816_s5 + $0xb8] sm:$0xff] }
  0x1d   : > { %1203 = vmatprep.subr.bf16.mxu1 %v1202_v12  ;;  %v1232_v11 = vpack.c.bf16 %v580_v10, %v578_v9  ;;  %v1254_v48 = vpack.c.bf16 %v720_v47, %v718_v46  ;;  %v733_v9 = vld [vmem:[%s1816_s5 + $0x120] sm:$0xff]  ;;  %v735_v10 = vld [vmem:[%s1816_s5 + $0x130] sm:$0xff] }
  0x1e   : > { %v477_v50 = vrot.slane %v476_v49, 1  ;;  %v759_v46 = vld [vmem:[%s1816_s5 + $0x1f0] sm:$0xff] }
  0x1f   : > { %1233 = vmatpush1.bf16.msra.mxu0 %v1232_v11  ;;  %v1272_v11 = vpack.c.bf16 %v735_v10, %v733_v9 }
  0x20   : > { %1205 = vmatpush3.bf16.msra.mxu1 %v1202_v12  ;;  %v478_v51 = vmax.f32 %v476_v49, %v477_v50  ;;  %v698_v12 = vld [vmem:[%s1816_s5 + $0x8] sm:$0xff]  ;;  %v717_v49 = vld [vmem:[%s1816_s5 + $0xa0] sm:$0xff]  ;;  %v719_v50 = vld [vmem:[%s1816_s5 + $0xb0] sm:$0xff] }
  0x21   : > { %1206 = vmatprep.subr.bf16.mxu1 %v1359_v20 }
  0x23   : > { %1160 = vmatmul.mubr.msk.f32.vlgmr.msra.gmra.mrb[0].mxu1 %vm340_vm0, %v325_v13  ;;  %v700_v13 = vld [vmem:[%s1816_s5 + $0x18] sm:$0xff] }
  0x24   : > { %1162 = vmatprep.mubr.msk.f32.mxu1 %vm340_vm0, %v326_v14  ;;  %v1234_v14 = vpack.c.bf16 %v700_v13, %v698_v12  ;;  %v738_v12 = vld [vmem:[%s1816_s5 + $0x148] sm:$0xff]  ;;  %v740_v13 = vld [vmem:[%s1816_s5 + $0x158] sm:$0xff] }
  0x26   : > { %1235 = vmatprep.subr.bf16.mxu0 %v1234_v14  ;;  %v1274_v14 = vpack.c.bf16 %v740_v13, %v738_v12 }
  0x27   : > { %1163 = vmatmul.mubr.msk.f32.gmra.mrb[2].mxu1 %vm340_vm0, %v327_v15  ;;  %v697_v15 = vld [vmem:[%s1816_s5] sm:$0xff] }
  0x28   : > { %1165 = vmatprep.mubr.msk.f32.mxu1 %vm340_vm0, %v328_v16  ;;  %v699_v16 = vld [vmem:[%s1816_s5 + $0x10] sm:$0xff] }
  0x2b   : > { %1166 = vmatmul.mubr.msk.f32.gmra.mrb[4].mxu1 %vm340_vm0, %v329_v17  ;;  %v1077_v17 = vld [vmem:[%s1813_s2] ss:$0 sm:$0xff] }
  0x2c   : > { %1168 = vmatprep.mubr.msk.f32.mxu1 %vm340_vm0, %v330_v18  ;;  %v702_v18 = vld [vmem:[%s1816_s5 + $0x28] sm:$0xff] }
  0x2f   : > { %1169 = vmatmul.mubr.msk.f32.gmra.mrb[6].mxu1 %vm340_vm0, %v331_v19  ;;  %v704_v19 = vld [vmem:[%s1816_s5 + $0x38] sm:$0xff] }
  0x30   : > { %1187 = vmatprep.mubr.msk.f32.mxu1 %vm1360_vm1, %v1361_v21  ;;  %v1236_v21 = vpack.c.bf16 %v699_v16, %v697_v15  ;;  %v1238_v24 = vpack.c.bf16 %v704_v19, %v702_v18  ;;  %v737_v15 = vld [vmem:[%s1816_s5 + $0x140] sm:$0xff]  ;;  %v739_v16 = vld [vmem:[%s1816_s5 + $0x150] sm:$0xff]  ;;  %v742_v18 = vld [vmem:[%s1816_s5 + $0x168] sm:$0xff] }
  0x31   : > { %v744_v19 = vld [vmem:[%s1816_s5 + $0x178] sm:$0xff] }
  0xf6   : > { %v1161_v52 = vpop.f32.mrb[0].mxu1 }
  0xf7   : > { %v480_v53 = vmul.f32 %v1161_v52, %v478_v51  ;;  %v431_v54 = vpop.f32.mrb[1].mxu1  ;;  %v722_v52 = vld [vmem:[%s1816_s5 + $0xc8] sm:$0xff] }
  0xf8   : > { %v479_v55 = vmul.f32 %v478_v51, %v431_v54 }
  0xfa   : > { %v1207_v56 = vpack.c.bf16 %v480_v53, %v479_v55  ;;  %v1164_v57 = vpop.f32.mrb[2].mxu1  ;;  %v724_v53 = vld [vmem:[%s1816_s5 + $0xd8] sm:$0xff]  ;;  %v721_v55 = vld [vmem:[%s1816_s5 + $0xc0] sm:$0xff] }
  0xfb   : > { %v482_v58 = vmul.f32 %v1164_v57, %v478_v51  ;;  %v441_v59 = vpop.f32.mrb[3].mxu1  ;;  %v1258_v54 = vpack.c.bf16 %v724_v53, %v722_v52 }
  0xfc   : > { %1208 = vmatpush3.bf16.xpose.msra.mxu1 %v1207_v56  ;;  %v481_v60 = vmul.f32 %v478_v51, %v441_v59  ;;  %v723_v56 = vld [vmem:[%s1816_s5 + $0xd0] sm:$0xff]  ;;  %v728_v59 = vld [vmem:[%s1816_s5 + $0xf8] sm:$0xff] }
  0xfd   : > { %1209 = vmatprep.subr.bf16.mxu1 %v1359_v20  ;;  %v1260_v57 = vpack.c.bf16 %v723_v56, %v721_v55 }
  0xfe   : > { %v1210_v61 = vpack.c.bf16 %v482_v58, %v481_v60  ;;  %v1167_v62 = vpop.f32.mrb[4].mxu1  ;;  %v726_v58 = vld [vmem:[%s1816_s5 + $0xe8] sm:$0xff] }
  0xff   : > { %v484_v63 = vmul.f32 %v1167_v62, %v478_v51  ;;  %v451_v0 = vpop.f32.mrb[5].mxu1  ;;  %v1262_v60 = vpack.c.bf16 %v728_v59, %v726_v58  ;;  %v727_v62 = vld [vmem:[%s1816_s5 + $0xf0] sm:$0xff] }
 0x100   : > { %v483_v1 = vmul.f32 %v478_v51, %v451_v0  ;;  %v730_v0 = vld [vmem:[%s1816_s5 + $0x108] sm:$0xff] }
 0x102   : > { %v1213_v2 = vpack.c.bf16 %v484_v63, %v483_v1  ;;  %v1170_v3 = vpop.f32.mrb[6].mxu1  ;;  %v732_v1 = vld [vmem:[%s1816_s5 + $0x118] sm:$0xff] }
 0x103   : > { %v486_v4 = vmul.f32 %v1170_v3, %v478_v51  ;;  %v461_v5 = vpop.f32.mrb[7].mxu1  ;;  %v729_v3 = vld [vmem:[%s1816_s5 + $0x100] sm:$0xff] }
 0x104   : > { %1211 = vmatpush3.bf16.xpose.msra.mxu1 %v1210_v61  ;;  %v485_v6 = vmul.f32 %v478_v51, %v461_v5  ;;  %v1256_v51 = vpack.c.bf16 %v719_v50, %v717_v49  ;;  %v725_v61 = vld [vmem:[%s1816_s5 + $0xe0] sm:$0xff] }
 0x105   : > { %1212 = vmatprep.subr.bf16.mxu1 %v1359_v20  ;;  %v1264_v63 = vpack.c.bf16 %v727_v62, %v725_v61 }
 0x106   : > { %v1216_v7 = vpack.c.bf16 %v486_v4, %v485_v6  ;;  %v731_v4 = vld [vmem:[%s1816_s5 + $0x110] sm:$0xff]  ;;  %v734_v6 = vld [vmem:[%s1816_s5 + $0x128] sm:$0xff] }
 0x107   : > { %v1268_v5 = vpack.c.bf16 %v731_v4, %v729_v3 }
 0x10c   : > { %1214 = vmatpush3.bf16.xpose.msra.mxu1 %v1213_v2  ;;  %v1266_v2 = vpack.c.bf16 %v732_v1, %v730_v0 }
 0x10d   : > { %1215 = vmatprep.subr.bf16.mxu1 %v1359_v20 }
 0x114   : > { %1217 = vmatpush3.bf16.xpose.msra.mxu1 %v1216_v7  ;;  %v736_v7 = vld [vmem:[%s1816_s5 + $0x138] sm:$0xff] }
 0x11b   : > { %1188 = vmatmul.mubr.f32.vlgmr.msra.gmra.mrb[8].mxu1 %v487_v8  ;;  %v1270_v8 = vpack.c.bf16 %v736_v7, %v734_v6 }
 0x1ee   : > { %v554_v20 = vpop.f32.mrb[8].mxu1 }
 0x1ef   : > { %v565_v22 = vadd.f32 %v1077_v17, %v554_v20  ;;  %v1189_v23 = vpop.f32.mrb[9].mxu1  ;;  %v1276_v17 = vpack.c.bf16 %v739_v16, %v737_v15  ;;  %v1278_v20 = vpack.c.bf16 %v744_v19, %v742_v18 }
 0x1f1   : > { %1078 = vmatmul.mubr.msk.f32.vlgmr.msra.gmra.mrb[0].mxu0 %vm340_vm0, %v565_v22  ;;  %v743_v22 = vld [vmem:[%s1816_s5 + $0x170] sm:$0xff] }
 0x1f2   : > { %1237 = vmatpush1.bf16.msra.mxu0 %v1236_v21  ;;  %v741_v21 = vld [vmem:[%s1816_s5 + $0x160] sm:$0xff] }
 0x1f3   : > { %1239 = vmatprep.subr.bf16.mxu0 %v1238_v24  ;;  %v1280_v23 = vpack.c.bf16 %v743_v22, %v741_v21  ;;  %v746_v24 = vld [vmem:[%s1816_s5 + $0x188] sm:$0xff] }
 0x1f4   : > { %v1282_v26 = vpack.c.bf16 %v748_v25, %v746_v24 }
 0x1f6   : > { %1241 = vmatpush1.bf16.msra.mxu0 %v1240_v29  ;;  %v1284_v29 = vpack.c.bf16 %v747_v28, %v745_v27  ;;  %v889_v27 = vld [vmem:[%s1817_s6 + $0x88] sm:$0xff] }
 0x1f7   : > { %1243 = vmatprep.subr.bf16.mxu0 %v1242_v30  ;;  %v750_v30 = vld [vmem:[%s1816_s5 + $0x1a8] sm:$0xff] }
 0x1f8   : > { %v1286_v32 = vpack.c.bf16 %v752_v31, %v750_v30  ;;  %v873_v30 = vld [vmem:[%s1817_s6 + $0x8] sm:$0xff] }
 0x1fa   : > { %1245 = vmatpush1.bf16.msra.mxu0 %v1244_v33  ;;  %v749_v33 = vld [vmem:[%s1816_s5 + $0x1a0] sm:$0xff] }
 0x1fb   : > { %1247 = vmatprep.subr.bf16.mxu0 %v1246_v36  ;;  %v1288_v35 = vpack.c.bf16 %v751_v34, %v749_v33  ;;  %v754_v36 = vld [vmem:[%s1816_s5 + $0x1c8] sm:$0xff]  ;;  %v891_v33 = vld [vmem:[%s1817_s6 + $0x98] sm:$0xff] }
 0x1fc   : > { %v1290_v38 = vpack.c.bf16 %v756_v37, %v754_v36  ;;  %v875_v36 = vld [vmem:[%s1817_s6 + $0x18] sm:$0xff] }
 0x1fe   : > { %1249 = vmatpush1.bf16.msra.mxu0 %v1248_v39  ;;  %v753_v39 = vld [vmem:[%s1816_s5 + $0x1c0] sm:$0xff] }
 0x1ff   : > { %1251 = vmatprep.subr.bf16.mxu0 %v1250_v42  ;;  %v1292_v41 = vpack.c.bf16 %v755_v40, %v753_v39  ;;  %v758_v42 = vld [vmem:[%s1816_s5 + $0x1e8] sm:$0xff] }
 0x200   : > { %v1294_v44 = vpack.c.bf16 %v760_v43, %v758_v42  ;;  %v893_v39 = vld [vmem:[%s1817_s6 + $0xa8] sm:$0xff] }
 0x201   : > { %v877_v42 = vld [vmem:[%s1817_s6 + $0x28] sm:$0xff] }
 0x202   : > { %1253 = vmatpush1.bf16.msra.mxu0 %v1252_v45  ;;  %v757_v45 = vld [vmem:[%s1816_s5 + $0x1e0] sm:$0xff] }
 0x203   : > { %1255 = vmatprep.subr.bf16.mxu0 %v1254_v48  ;;  %v1296_v47 = vpack.c.bf16 %v759_v46, %v757_v45  ;;  %v895_v45 = vld [vmem:[%s1817_s6 + $0xb8] sm:$0xff] }
 0x206   : > { %1257 = vmatpush1.bf16.msra.mxu0 %v1256_v51 }
 0x207   : > { %1259 = vmatprep.subr.bf16.mxu0 %v1258_v54 }
 0x20a   : > { %1261 = vmatpush1.bf16.msra.mxu0 %v1260_v57 }
 0x20b   : > { %1263 = vmatprep.subr.bf16.mxu0 %v1262_v60 }
 0x20e   : > { %1265 = vmatpush1.bf16.msra.mxu0 %v1264_v63 }
 0x20f   : > { %1267 = vmatprep.subr.bf16.mxu0 %v1266_v2 }
 0x212   : > { %1269 = vmatpush1.bf16.msra.mxu0 %v1268_v5 }
 0x213   : > { %1271 = vmatprep.subr.bf16.mxu0 %v1270_v8 }
 0x216   : > { %1273 = vmatpush1.bf16.msra.mxu0 %v1272_v11 }
 0x217   : > { %1275 = vmatprep.subr.bf16.mxu0 %v1274_v14 }
 0x21a   : > { %1277 = vmatpush1.bf16.msra.mxu0 %v1276_v17 }
 0x21b   : > { %1279 = vmatprep.subr.bf16.mxu0 %v1278_v20 }
 0x21e   : > { %1281 = vmatpush1.bf16.msra.mxu0 %v1280_v23 }
 0x21f   : > { %1283 = vmatprep.subr.bf16.mxu0 %v1282_v26  ;;  %v888_v26 = vld [vmem:[%s1817_s6 + $0x80] sm:$0xff] }
 0x220   : > { %v1298_v28 = vpack.c.bf16 %v889_v27, %v888_v26 }
 0x222   : > { %1285 = vmatpush1.bf16.msra.mxu0 %v1284_v29  ;;  %v872_v29 = vld [vmem:[%s1817_s6] sm:$0xff]  ;;  %1299 = vmatprep.subr.bf16.mxu1 %v1298_v28 }
 0x223   : > { %1287 = vmatprep.subr.bf16.mxu0 %v1286_v32  ;;  %v1300_v31 = vpack.c.bf16 %v873_v30, %v872_v29  ;;  %v890_v32 = vld [vmem:[%s1817_s6 + $0x90] sm:$0xff] }
 0x224   : > { %v1302_v34 = vpack.c.bf16 %v891_v33, %v890_v32 }
 0x225   : > { %1301 = vmatpush3.bf16.msra.mxu1 %v1300_v31 }
 0x226   : > { %1289 = vmatpush1.bf16.msra.mxu0 %v1288_v35  ;;  %v874_v35 = vld [vmem:[%s1817_s6 + $0x10] sm:$0xff]  ;;  %1303 = vmatprep.subr.bf16.mxu1 %v1302_v34 }
 0x227   : > { %1291 = vmatprep.subr.bf16.mxu0 %v1290_v38  ;;  %v1304_v37 = vpack.c.bf16 %v875_v36, %v874_v35  ;;  %v892_v38 = vld [vmem:[%s1817_s6 + $0xa0] sm:$0xff] }
 0x228   : > { %v1306_v40 = vpack.c.bf16 %v893_v39, %v892_v38 }
 0x229   : > { %1305 = vmatpush3.bf16.msra.mxu1 %v1304_v37 }
 0x22a   : > { %1293 = vmatpush1.bf16.msra.mxu0 %v1292_v41  ;;  %v876_v41 = vld [vmem:[%s1817_s6 + $0x20] sm:$0xff]  ;;  %1307 = vmatprep.subr.bf16.mxu1 %v1306_v40 }
 0x22b   : > { %1295 = vmatprep.subr.bf16.mxu0 %v1294_v44  ;;  %v1308_v43 = vpack.c.bf16 %v877_v42, %v876_v41  ;;  %v894_v44 = vld [vmem:[%s1817_s6 + $0xb0] sm:$0xff] }
 0x22c   : > { %v1310_v46 = vpack.c.bf16 %v895_v45, %v894_v44 }
 0x22d   : > { %1309 = vmatpush3.bf16.msra.mxu1 %v1308_v43 }
 0x22e   : > { %1297 = vmatpush1.bf16.msra.mxu0 %v1296_v47  ;;  %v878_v47 = vld [vmem:[%s1817_s6 + $0x30] sm:$0xff]  ;;  %1311 = vmatprep.subr.bf16.mxu1 %v1310_v46 }
 0x2c4   : > { %v651_v48 = vpop.f32.mrb[0].mxu0 }
 0x2c5   : > { %v656_v49 = vrot.slane %v651_v48, 4  ;;  %v653_v50 = vpop.f32.mrb[1].mxu0 }
 0x2c6   : > { %v662_v51 = vrot.slane %v653_v50, 4 }
 0x2c7   : > { %v657_v52 = vadd.f32 %v656_v49, %v651_v48 }
 0x2c8   : > { %v663_v53 = vadd.f32 %v662_v51, %v653_v50  ;;  %v897_v51 = vld [vmem:[%s1817_s6 + $0xc8] sm:$0xff] }
 0x2c9   : > { %v658_v54 = vrot.slane %v657_v52, 2 }
 0x2ca   : > { %v664_v55 = vrot.slane %v663_v53, 2 }
 0x2cb   : > { %v659_v56 = vadd.f32 %v658_v54, %v657_v52  ;;  %v881_v54 = vld [vmem:[%s1817_s6 + $0x48] sm:$0xff] }
 0x2cc   : > { %v665_v57 = vadd.f32 %v664_v55, %v663_v53  ;;  %v880_v53 = vld [vmem:[%s1817_s6 + $0x40] sm:$0xff] }
 0x2cd   : > { %v660_v58 = vrot.slane %v659_v56, 1  ;;  %v1316_v55 = vpack.c.bf16 %v881_v54, %v880_v53 }
 0x2ce   : > { %v666_v59 = vrot.slane %v665_v57, 1 }
 0x2cf   : > { %v661_v60 = vadd.f32 %v660_v58, %v659_v56  ;;  %v898_v56 = vld [vmem:[%s1817_s6 + $0xd0] sm:$0xff] }
 0x2d0   : > { %v667_v61 = vadd.f32 %v666_v59, %v665_v57  ;;  %v899_v57 = vld [vmem:[%s1817_s6 + $0xd8] sm:$0xff]  ;;  %v882_v59 = vld [vmem:[%s1817_s6 + $0x50] sm:$0xff] }
 0x2d1   : > { %v669_v62 = vmul.f32 0.125, %v661_v60  ;;  %v1318_v58 = vpack.c.bf16 %v899_v57, %v898_v56  ;;  %v883_v60 = vld [vmem:[%s1817_s6 + $0x58] sm:$0xff] }
 0x2d2   : > { %v670_v63 = vmul.f32 0.125, %v667_v61  ;;  %v1320_v61 = vpack.c.bf16 %v883_v60, %v882_v59 }
 0x2d3   : > { %v671_v0 = vsub.f32 %v651_v48, %v669_v62  ;;  %v879_v48 = vld [vmem:[%s1817_s6 + $0x38] sm:$0xff]  ;;  %v900_v62 = vld [vmem:[%s1817_s6 + $0xe0] sm:$0xff] }
 0x2d4   : > { %v672_v1 = vsub.f32 %v653_v50, %v670_v63  ;;  %v1312_v49 = vpack.c.bf16 %v879_v48, %v878_v47  ;;  %v896_v50 = vld [vmem:[%s1817_s6 + $0xc0] sm:$0xff]  ;;  %v901_v63 = vld [vmem:[%s1817_s6 + $0xe8] sm:$0xff] }
 0x2d5   : > { %v673_v2 = vmul.f32 %v671_v0, %v671_v0  ;;  %v1314_v52 = vpack.c.bf16 %v897_v51, %v896_v50 }
 0x2d6   : > { %v674_v3 = vmul.f32 %v672_v1, %v672_v1  ;;  %1313 = vmatpush3.bf16.msra.mxu1 %v1312_v49 }
 0x2d7   : > { %v675_v4 = vrot.slane %v673_v2, 4  ;;  %1315 = vmatprep.subr.bf16.mxu1 %v1314_v52 }
 0x2d8   : > { %v681_v5 = vrot.slane %v674_v3, 4 }
 0x2d9   : > { %v676_v6 = vadd.f32 %v675_v4, %v673_v2  ;;  %v885_v2 = vld [vmem:[%s1817_s6 + $0x68] sm:$0xff]  ;;  %v902_v4 = vld [vmem:[%s1817_s6 + $0xf0] sm:$0xff] }
 0x2da   : > { %v682_v7 = vadd.f32 %v681_v5, %v674_v3  ;;  %1317 = vmatpush3.bf16.msra.mxu1 %v1316_v55  ;;  %v903_v5 = vld [vmem:[%s1817_s6 + $0xf8] sm:$0xff] }
 0x2db   : > { %v677_v8 = vrot.slane %v676_v6, 2  ;;  %1319 = vmatprep.subr.bf16.mxu1 %v1318_v58 }
 0x2dc   : > { %v683_v9 = vrot.slane %v682_v7, 2 }
 0x2dd   : > { %v678_v10 = vadd.f32 %v677_v8, %v676_v6  ;;  %v1326_v6 = vpack.c.bf16 %v903_v5, %v902_v4  ;;  %v887_v8 = vld [vmem:[%s1817_s6 + $0x78] sm:$0xff] }
 0x2de   : > { %v684_v11 = vadd.f32 %v683_v9, %v682_v7  ;;  %1321 = vmatpush3.bf16.msra.mxu1 %v1320_v61  ;;  %v886_v7 = vld [vmem:[%s1817_s6 + $0x70] sm:$0xff] }
 0x2df   : > { %v679_v12 = vrot.slane %v678_v10, 1  ;;  %v1328_v9 = vpack.c.bf16 %v887_v8, %v886_v7 }
 0x2e0   : > { %v685_v13 = vrot.slane %v684_v11, 1 }
 0x2e1   : > { %v680_v14 = vadd.f32 %v679_v12, %v678_v10 }
 0x2e2   : > { %v686_v15 = vadd.f32 %v685_v13, %v684_v11 }
 0x2e3   : > { %v687_v16 = vmul.f32 0.125, %v680_v14 }
 0x2e4   : > { %v688_v17 = vmul.f32 0.125, %v686_v15 }
 0x2e5   : > { %v689_v18 = vadd.f32 1e-05, %v687_v16 }
 0x2e6   : > { %v690_v19 = vadd.f32 1e-05, %v688_v17 }
 0x2e7   : > { %1341 = vrsqrt.f32 %v689_v18 }
 0x2e8   : > { %1343 = vrsqrt.f32 %v690_v19 }
 0x2f1   : > { %v1342_v20 = vpop.eup %1341 }
 0x2f2   : > { %v1344_v21 = vpop.eup %1343  ;;  %v693_v22 = vmul.f32 %v1342_v20, %v671_v0  ;;  %v1322_v0 = vpack.c.bf16 %v901_v63, %v900_v62 }
 0x2f3   : > { %v694_v23 = vmul.f32 %v1344_v21, %v672_v1  ;;  %v884_v1 = vld [vmem:[%s1817_s6 + $0x60] sm:$0xff] }
 0x2f4   : > { %v695_v25 = vmax.f32 %v693_v22, 0.0  ;;  %v1324_v3 = vpack.c.bf16 %v885_v2, %v884_v1  ;;  %1323 = vmatprep.subr.bf16.mxu1 %v1322_v0 }
 0x2f5   : > { %v696_v24 = vmax.f32 %v694_v23, 0.0 }
 0x2f6   : > { %1325 = vmatpush3.bf16.msra.mxu1 %v1324_v3 }
 0x2f7   : > { %825 = vmatprep.mubr.f32.mxu0 %v696_v24  ;;  %1327 = vmatprep.subr.bf16.mxu1 %v1326_v6 }
 0x2f8   : > { %826 = vmatmul.mubr.f32.vlgmr.msra.gmra.mrb[2].mxu0 %v695_v25 }
 0x2fa   : > { %1329 = vmatpush3.bf16.msra.mxu1 %v1328_v9 }
 0x3cb   : > { %v827_v10 = vpop.f32.mrb[2].mxu0 }
 0x3cc   : > { %v832_v11 = vrot.slane %v827_v10, 4  ;;  %v829_v12 = vpop.f32.mrb[3].mxu0 }
 0x3cd   : > { %v838_v13 = vrot.slane %v829_v12, 4 }
 0x3ce   : > { %v833_v14 = vadd.f32 %v832_v11, %v827_v10 }
 0x3cf   : > { %v839_v15 = vadd.f32 %v838_v13, %v829_v12 }
 0x3d0   : > { %v834_v16 = vrot.slane %v833_v14, 2 }
 0x3d1   : > { %v840_v17 = vrot.slane %v839_v15, 2 }
 0x3d2   : > { %v835_v18 = vadd.f32 %v834_v16, %v833_v14 }
 0x3d3   : > { %v841_v19 = vadd.f32 %v840_v17, %v839_v15 }
 0x3d4   : > { %v836_v20 = vrot.slane %v835_v18, 1 }
 0x3d5   : > { %v842_v21 = vrot.slane %v841_v19, 1 }
 0x3d6   : > { %v837_v22 = vadd.f32 %v836_v20, %v835_v18 }
 0x3d7   : > { %v843_v23 = vadd.f32 %v842_v21, %v841_v19 }
 0x3d8   : > { %v844_v24 = vmul.f32 0.125, %v837_v22 }
 0x3d9   : > { %v845_v25 = vmul.f32 0.125, %v843_v23 }
 0x3da   : > { %v846_v26 = vsub.f32 %v827_v10, %v844_v24 }
 0x3db   : > { %v847_v27 = vsub.f32 %v829_v12, %v845_v25 }
 0x3dc   : > { %v848_v28 = vmul.f32 %v846_v26, %v846_v26 }
 0x3dd   : > { %v849_v29 = vmul.f32 %v847_v27, %v847_v27 }
 0x3de   : > { %v850_v30 = vrot.slane %v848_v28, 4 }
 0x3df   : > { %v856_v31 = vrot.slane %v849_v29, 4 }
 0x3e0   : > { %v851_v32 = vadd.f32 %v850_v30, %v848_v28 }
 0x3e1   : > { %v857_v33 = vadd.f32 %v856_v31, %v849_v29 }
 0x3e2   : > { %v852_v34 = vrot.slane %v851_v32, 2 }
 0x3e3   : > { %v858_v35 = vrot.slane %v857_v33, 2 }
 0x3e4   : > { %v853_v36 = vadd.f32 %v852_v34, %v851_v32 }
 0x3e5   : > { %v859_v37 = vadd.f32 %v858_v35, %v857_v33 }
 0x3e6   : > { %v854_v38 = vrot.slane %v853_v36, 1 }
 0x3e7   : > { %v860_v39 = vrot.slane %v859_v37, 1 }
 0x3e8   : > { %v855_v40 = vadd.f32 %v854_v38, %v853_v36 }
 0x3e9   : > { %v861_v41 = vadd.f32 %v860_v39, %v859_v37 }
 0x3ea   : > { %v862_v42 = vmul.f32 0.125, %v855_v40 }
 0x3eb   : > { %v863_v43 = vmul.f32 0.125, %v861_v41 }
 0x3ec   : > { %v864_v44 = vadd.f32 1e-05, %v862_v42 }
 0x3ed   : > { %v865_v45 = vadd.f32 1e-05, %v863_v43 }
 0x3ee   : > { %1345 = vrsqrt.f32 %v864_v44 }
 0x3ef   : > { %1347 = vrsqrt.f32 %v865_v45 }
 0x3f8   : > { %v1346_v46 = vpop.eup %1345 }
 0x3f9   : > { %v1348_v47 = vpop.eup %1347  ;;  %v868_v48 = vmul.f32 %v1346_v46, %v846_v26 }
 0x3fa   : > { %v869_v49 = vmul.f32 %v1348_v47, %v847_v27 }
 0x3fb   : > { %v870_v51 = vmax.f32 %v868_v48, 0.0 }
 0x3fc   : > { %v871_v50 = vmax.f32 %v869_v49, 0.0 }
 0x3fe   : > { %968 = vmatprep.mubr.f32.mxu1 %v871_v50 }
 0x3ff   : > { %969 = vmatmul.mubr.f32.vlgmr.msra.gmra.mrb[10].mxu1 %v870_v51 }
 0x4d2   : > { %v1140_v52 = vpop.f32.mrb[10].mxu1 }
 0x4d3   : > { %v1141_v53 = vpop.f32.mrb[11].mxu1 }
 0x4d4   : > { %v1142_v54 = vadd.f32 %v1141_v53, %v1140_v52 }
 0x4d6   : > { %v974_v55 = vrot.slane %v1142_v54, 4 }
 0x4d8   : > { %v975_v56 = vadd.f32 %v1142_v54, %v974_v55 }
 0x4da   : > { %v976_v57 = vrot.slane %v975_v56, 2 }
 0x4dc   : > { %v977_v58 = vadd.f32 %v976_v57, %v975_v56 }
 0x4de   : > { %v978_v59 = vrot.slane %v977_v58, 1 }
 0x4e0   : > { %v979_v60 = vadd.f32 %v978_v59, %v977_v58 }
 0x4e2   : > { %v980_v61 = vmul.f32 0.125, %v979_v60 }
 0x4e4   : > { %v981_v62 = vsub.f32 %v1142_v54, %v980_v61 }
 0x4e6   : > { %v982_v63 = vmul.f32 %v981_v62, %v981_v62 }
 0x4e8   : > { %v983_v0 = vrot.slane %v982_v63, 4 }
 0x4ea   : > { %v984_v1 = vadd.f32 %v983_v0, %v982_v63 }
 0x4ec   : > { %v985_v2 = vrot.slane %v984_v1, 2 }
 0x4ee   : > { %v986_v3 = vadd.f32 %v985_v2, %v984_v1 }
 0x4f0   : > { %v987_v4 = vrot.slane %v986_v3, 1 }
 0x4f2   : > { %v988_v5 = vadd.f32 %v987_v4, %v986_v3 }
 0x4f4   : > { %v989_v6 = vmul.f32 0.125, %v988_v5 }
 0x4f6   : > { %v990_v7 = vadd.f32 1e-05, %v989_v6 }
 0x4f8   : > { %1349 = vrsqrt.f32 %v990_v7 }
 0x502   : > { %v1350_v8 = vpop.eup %1349 }
 0x503   : > { %v992_v9 = vmul.f32 %v1350_v8, %v981_v62 }
 0x505   : > { %993 = vst [vmem:[%s323_s22] sm:$0xff] %v992_v9 }
 0x506 PF: > { %s18_s27 = sadd.s32 1, %s1357_s27  }
 0x507   : > { %p15_p4 = scmp.ge.s32.totalorder %s18_s27, 4  }
 0x509   :  { %17 = sbr.rel (!%p15_p4) target bundleno = 1 (0x1), region = 85 }

// kernel: gssl_forward.6
= control target key start
LH: loop header
LB: loop body
LE: loop exit
PB: predicated region body
PF: predicated region fallthrough
CT: control target
= control target key end

     0   :  { %s366_s0 = inlined_call_operand.vmem [shape: f32[2,8,128], index: 0, kind: input, shape index: {}]   ;;  %s367_s1 = inlined_call_operand.vmem [shape: f32[2,8,128], index: 1, kind: input, shape index: {}]   ;;  %s368_s2 = inlined_call_operand.hbm [shape: f32[1,1], index: 2, kind: output, shape index: {}]  }
   0x1   :  { %v267_v0 = vld [vmem:[%s367_s1 + $0x8] sm:$0xff]  ;;  %v12_v1 = vld [vmem:[%s366_s0] sm:$0xff] }
   0x2   :  { %v137_v2 = vld [vmem:[%s367_s1] sm:$0xff]  ;;  %v21_v3 = vmul.f32 %v267_v0, %v267_v0  ;;  %v15_v4 = vmul.f32 %v12_v1, %v12_v1  ;;  %v268_v5 = vld [vmem:[%s366_s0 + $0x8] sm:$0xff] }
   0x3   :  { %7 = vsyncpa [#allocation3], 0  ;;  %v144_v6 = vmul.f32 %v137_v2, %v137_v2  ;;  %v138_v7 = vmul.f32 %v268_v5, %v268_v5  ;;  %v318_v8 = vmov 0.0   ;;  %vm319_vm0 = vmmov 0   ;;  %s306_s24 = scalar_lea.hbm %s368_s2, 16 }
   0x4   :  { %22 = vadd.xlane.f32.xlu0 %v21_v3  ;;  %16 = vadd.xlane.f32.xlu1 %v15_v4  ;;  %vm97_vm1 = vcmask 64512   ;;  %v110_v36 = vlaneseq  ;;  %vm120_vm3 = vcmask 7168   ;;  %p307_p0 = scmp.ne.s32.totalorder %s368_s2, %s306_s24  ;;  %p310_p1 = scmp.lt.u32.totalorder %s306_s24, %s368_s2 }
   0x5   :  { %273 = vmatprep.subr.mxu0 %v318_v8  ;;  %278 = vmatprep.subr.mxu1 %v318_v8 }
   0x6   :  { %275 = vmatprep.mubr.msk.f32.mxu0 %vm319_vm0, %v318_v8  ;;  %280 = vmatprep.mubr.msk.f32.mxu1 %vm319_vm0, %v318_v8  ;;  %v111_v38 = vshrl.u32 %v110_v36, 7  ;;  %v113_v39 = vand.u32 127, %v110_v36  ;;  %p312_p2 = pnand %p310_p1, %p307_p0 }
   0x8   :  { %145 = vadd.xlane.f32.xlu0 %v144_v6  ;;  %139 = vadd.xlane.f32.xlu1 %v138_v7  ;;  %vm114_vm2 = vcmp.eq.s32.totalorder %v111_v38, %v113_v39 }
  0x91   :  { %v23_v9 = vpop.xlane.xlu0 %22  ;;  %v17_v10 = vpop.xlane.xlu1 %16 }
  0x92   :  { %v24_v11 = vmax.f32 %v23_v9, 1e-24  ;;  %v18_v12 = vmax.f32 %v17_v10, 1e-24 }
  0x94   :  { %290 = vrsqrt.f32 %v24_v11 }
  0x95   :  { %292 = vrsqrt.f32 %v18_v12  ;;  %v146_v13 = vpop.xlane.xlu0 %145  ;;  %v140_v14 = vpop.xlane.xlu1 %139 }
  0x96   :  { %v147_v15 = vmax.f32 %v146_v13, 1e-24  ;;  %v141_v16 = vmax.f32 %v140_v14, 1e-24 }
  0x98   :  { %294 = vrsqrt.f32 %v147_v15 }
  0x99   :  { %296 = vrsqrt.f32 %v141_v16 }
  0x9e   :  { %v291_v17 = vpop.eup %290 }
  0x9f   :  { %v293_v18 = vpop.eup %292  ;;  %v26_v19 = vmul.f32 %v291_v17, %v267_v0 }
  0xa0   :  { %v20_v20 = vmul.f32 %v293_v18, %v12_v1 }
  0xa1   :  { %274 = vmatpush3.xpose.msra.mxu0 %v26_v19 }
  0xa2   :  { %v295_v21 = vpop.eup %294 }
  0xa3   :  { %v297_v22 = vpop.eup %296  ;;  %v149_v23 = vmul.f32 %v295_v21, %v137_v2 }
  0xa4   :  { %276 = vmatmul.mubr.f32.vlgmr.msra.gmra.mrb[0].mxu0 %v20_v20  ;;  %v143_v24 = vmul.f32 %v297_v22, %v268_v5 }
  0xa5   :  { %279 = vmatpush3.xpose.msra.mxu1 %v149_v23 }
  0xa8   :  { %281 = vmatmul.mubr.f32.vlgmr.msra.gmra.mrb[0].mxu1 %v143_v24 }
 0x177   :  { %v93_v25 = vpop.f32.mrb[0].mxu0 }
 0x178   :  { %v277_v26 = vpop.f32.mrb[1].mxu0  ;;  %v98_v27 = vsel %vm97_vm1, %v93_v25, -inf  ;;  %v115_v42 = vsel %vm114_vm2, %v93_v25, 0.0 }
 0x179   :  { %99 = vmax.xlane.f32.xlu0 %v98_v27  ;;  %v116_v44 = vsel %vm97_vm1, %v115_v42, 0.0 }
 0x17b   :  { %v216_v28 = vpop.f32.mrb[0].mxu1 }
 0x17c   :  { %v282_v29 = vpop.f32.mrb[1].mxu1  ;;  %v220_v30 = vsel %vm97_vm1, %v216_v28, -inf  ;;  %v232_v46 = vsel %vm114_vm2, %v216_v28, 0.0 }
 0x17d   :  { %221 = vmax.xlane.f32.xlu1 %v220_v30  ;;  %v233_v47 = vsel %vm97_vm1, %v232_v46, 0.0 }
 0x206   :  { %v100_v31 = vpop.xlane.xlu0 %99 }
 0x207   :  { %v101_v32 = vsub.f32 %v93_v25, %v100_v31 }
 0x209   :  { %v102_v33 = vmul.f32 1.442695, %v101_v32 }
 0x20a   :  { %v222_v34 = vpop.xlane.xlu1 %221 }
 0x20b   :  { %298 = vpow2.f32 %v102_v33  ;;  %v223_v35 = vsub.f32 %v216_v28, %v222_v34 }
 0x20d   :  { %v224_v37 = vmul.f32 1.442695, %v223_v35 }
 0x20f   :  { %300 = vpow2.f32 %v224_v37 }
 0x215   :  { %v299_v40 = vpop.eup %298 }
 0x216   :  { %v104_v41 = vsel %vm97_vm1, %v299_v40, 0.0 }
 0x217   :  { %105 = vadd.xlane.f32.xlu0 %v104_v41 }
 0x219   :  { %v301_v43 = vpop.eup %300 }
 0x21a   :  { %v226_v45 = vsel %vm97_vm1, %v301_v43, 0.0 }
 0x21b   :  { %117 = vadd.xlane.f32.xlu0 %v116_v44  ;;  %227 = vadd.xlane.f32.xlu1 %v226_v45 }
 0x21f   :  { %234 = vadd.xlane.f32.xlu1 %v233_v47 }
 0x2a4   :  { %v106_v48 = vpop.xlane.xlu0 %105 }
 0x2a5   :  { %302 = vlog2.f32 %v106_v48 }
 0x2a8   :  { %v228_v49 = vpop.xlane.xlu1 %227  ;;  %v118_v54 = vpop.xlane.xlu0 %117 }
 0x2a9   :  { %304 = vlog2.f32 %v228_v49 }
 0x2ac   :  { %v235_v59 = vpop.xlane.xlu1 %234 }
 0x2af   :  { %v303_v50 = vpop.eup %302 }
 0x2b0   :  { %v108_v51 = vmul.f32 0.6931472, %v303_v50 }
 0x2b2   :  { %v109_v52 = vadd.f32 %v108_v51, %v100_v31 }
 0x2b3   :  { %v305_v53 = vpop.eup %304 }
 0x2b4   :  { %v119_v55 = vsub.f32 %v109_v52, %v118_v54  ;;  %v230_v56 = vmul.f32 0.6931472, %v305_v53 }
 0x2b6   :  { %v231_v57 = vadd.f32 %v230_v56, %v222_v34  ;;  %v121_v58 = vsel %vm120_vm3, %v119_v55, 0.0 }
 0x2b7   :  { %122 = vadd.xlane.f32.xlu0 %v121_v58 }
 0x2b8   :  { %v236_v60 = vsub.f32 %v231_v57, %v235_v59 }
 0x2ba   :  { %v237_v61 = vsel %vm120_vm3, %v236_v60, 0.0 }
 0x2bb   :  { %238 = vadd.xlane.f32.xlu1 %v237_v61 }
 0x344   :  { %v123_v62 = vpop.xlane.xlu0 %122 }
 0x345   :  { %v124_v63 = vrot.slane %v123_v62, 4 }
 0x347   :  { %v125_v0 = vadd.f32 %v124_v63, %v123_v62 }
 0x348   :  { %v239_v1 = vpop.xlane.xlu1 %238 }
 0x349   :  { %v126_v2 = vrot.slane %v125_v0, 2  ;;  %v240_v3 = vrot.slane %v239_v1, 4 }
 0x34b   :  { %v241_v4 = vadd.f32 %v240_v3, %v239_v1  ;;  %v127_v5 = vadd.f32 %v126_v2, %v125_v0 }
 0x34d   :  { %v242_v6 = vrot.slane %v241_v4, 2  ;;  %v128_v7 = vrot.slane %v127_v5, 1 }
 0x34f   :  { %v243_v8 = vadd.f32 %v242_v6, %v241_v4  ;;  %v129_v9 = vadd.f32 %v128_v7, %v127_v5 }
 0x351   :  { %283 = vpush %v129_v9  ;;  %v244_v10 = vrot.slane %v243_v8, 1 }
 0x353   :  { %v245_v11 = vadd.f32 %v244_v10, %v243_v8 }
 0x355   :  { %285 = vpush %v245_v11 }
 0x382   :  { %s284_s0 = spop %283 }
 0x383   :  { %s133_s1 = smul.f32 0.125, %s284_s0 }
 0x385   :  { %s134_s19 = smul.f32 2.0, %s133_s1 }
 0x386   :  { %s286_s17 = spop %285 }
 0x387   :  { %s249_s18 = smul.f32 0.125, %s286_s17 }
 0x389   :  { %s250_s20 = smul.f32 2.0, %s249_s18 }
 0x38b   :  { %s251_s21 = sadd.f32 %s250_s20, %s134_s19 }
 0x38d   :  { %253 = sst [smem:[#allocation2]] %s251_s21 }
 0x38e   :  { %315 = shalt.err (!%p312_p2)
}
 0x38f   :  { %s320_s29 = smov [#allocation2]  }
 0x390   :  { %261 = dma.smem_to_hbm %s320_s29, 16, %s368_s2, [#allocation3]  }
 0x391   :  { %316 = dma.done.wait [#allocation3], 16  }
 0x392   :  { %317 = vsyncadd [#allocation3], 4294967280 }
 0x393   :  { %265 = sfence }
 0x394   :  { %266 = vsyncpa [#allocation3], 1 }

// kernel: gssl_forward.7
= control target key start
LH: loop header
LB: loop body
LE: loop exit
PB: predicated region body
PF: predicated region fallthrough
CT: control target
= control target key end

     0   :  { %v453_v7 = vmov 0   ;;  %vm40_vm0 = vcmask 523264   ;;  %s569_s0 = inlined_call_operand.vmem [shape: f32[2,64,128], index: 0, kind: input, shape index: {}]   ;;  %s570_s1 = inlined_call_operand.vmem [shape: f32[16,64], index: 1, kind: input, shape index: {}]   ;;  %s571_s2 = inlined_call_operand.vmem [shape: f32[16,1], index: 2, kind: input, shape index: {}]   ;;  %s572_s3 = inlined_call_operand.vmem [shape: f32[2,16,128], index: 3, kind: input, shape index: {}]   ;;  %s573_s4 = inlined_call_operand.hbm [shape: f32[1,1], index: 4, kind: output, shape index: {}]  }
   0x1   :  { %v20_v0 = vld [vmem:[%s569_s0] sm:$0xff]  ;;  %v21_v1 = vld [vmem:[%s569_s0 + $0x8] sm:$0xff]  ;;  %v22_v5 = vld [vmem:[%s569_s0 + $0x10] sm:$0xff]  ;;  %424 = vset.pattern.permute.xlu0 %v453_v7 }
   0x2   :  { %v313_v2 = vld [vmem:[%s569_s0 + $0x40] sm:$0xff]  ;;  %v385_v3 = vpack.c.bf16 %v21_v1, %v20_v0  ;;  %v314_v4 = vld [vmem:[%s569_s0 + $0x48] sm:$0xff]  ;;  %v23_v6 = vld [vmem:[%s569_s0 + $0x18] sm:$0xff] }
   0x3   :  { %v401_v8 = vpack.c.bf16 %v314_v4, %v313_v2  ;;  %v389_v9 = vpack.c.bf16 %v23_v6, %v22_v5  ;;  %v315_v10 = vld [vmem:[%s569_s0 + $0x50] sm:$0xff]  ;;  %v316_v11 = vld [vmem:[%s569_s0 + $0x58] sm:$0xff]  ;;  %v24_v12 = vld [vmem:[%s569_s0 + $0x20] sm:$0xff] }
   0x4   :  { %386 = vmatprep.subr.bf16.mxu0 %v385_v3  ;;  %v405_v13 = vpack.c.bf16 %v316_v11, %v315_v10  ;;  %v25_v14 = vld [vmem:[%s569_s0 + $0x28] sm:$0xff]  ;;  %v317_v15 = vld [vmem:[%s569_s0 + $0x60] sm:$0xff]  ;;  %v26_v18 = vld [vmem:[%s569_s0 + $0x30] sm:$0xff] }
   0x5   :  { %v318_v16 = vld [vmem:[%s569_s0 + $0x68] sm:$0xff]  ;;  %402 = vmatprep.subr.bf16.mxu1 %v401_v8  ;;  %388 = vmatpush3.bf16.msra.mxu0 %v385_v3  ;;  %v393_v17 = vpack.c.bf16 %v25_v14, %v24_v12  ;;  %v18_v19 = vld [vmem:[%s570_s1] sm:$0xff]  ;;  %v27_v21 = vld [vmem:[%s569_s0 + $0x38] sm:$0xff] }
   0x6   :  { %404 = vmatpush3.bf16.msra.mxu1 %v401_v8  ;;  %390 = vmatprep.subr.bf16.mxu0 %v389_v9  ;;  %v409_v20 = vpack.c.bf16 %v318_v16, %v317_v15  ;;  %v28_v22 = vld [vmem:[%s571_s2] sm:$0xff] }
   0x7   :  { %406 = vmatprep.subr.bf16.mxu1 %v405_v13  ;;  %363 = vmatprep.mubr.msk.f32.mxu0 %vm40_vm0, %v18_v19 }
   0x8   :  { %9 = vsyncpa [#allocation3], 0  ;;  %v319_v23 = vld [vmem:[%s569_s0 + $0x70] sm:$0xff]  ;;  %v320_v24 = vld [vmem:[%s569_s0 + $0x78] sm:$0xff]  ;;  %382 = vmatprep.mubr.msk.f32.mxu1 %vm40_vm0, %v18_v19  ;;  %32 = vperm.xlu0 %424, %v28_v22   ;;  %v397_v26 = vpack.c.bf16 %v27_v21, %v26_v18  ;;  %v454_v63 = vmov 0.0   ;;  %s441_s14 = scalar_lea.hbm %s573_s4, 16 }
   0x9   :  { %392 = vmatpush3.bf16.msra.mxu0 %v389_v9  ;;  %v29_v25 = vld [vmem:[%s571_s2 + $0x8] sm:$0xff]  ;;  %v413_v27 = vpack.c.bf16 %v320_v24, %v319_v23  ;;  %v324_v56 = vld [vmem:[%s572_s3 + $0x18] sm:$0xff]  ;;  %v122_v59 = vld [vmem:[%s572_s3] sm:$0xff]  ;;  %p442_p0 = scmp.ne.s32.totalorder %s573_s4, %s441_s14  ;;  %p445_p1 = scmp.lt.u32.totalorder %s441_s14, %s573_s4 }
   0xa   :  { %408 = vmatpush3.bf16.msra.mxu1 %v405_v13  ;;  %394 = vmatprep.subr.bf16.mxu0 %v393_v17  ;;  %v19_v28 = vld [vmem:[%s570_s1 + $0x8] sm:$0xff]  ;;  %v323_v61 = vld [vmem:[%s572_s3 + $0x10] sm:$0xff]  ;;  %vm253_vm2 = vcmp.gt.f32.partialorder %v324_v56, 0.25  ;;  %vm124_vm3 = vcmp.gt.f32.partialorder %v122_v59, 0.25 }
   0xb   :  { %410 = vmatprep.subr.bf16.mxu1 %v409_v20  ;;  %v123_v53 = vld [vmem:[%s572_s3 + $0x8] sm:$0xff]  ;;  %vm252_vm4 = vcmp.gt.f32.partialorder %v323_v61, 0.25  ;;  %v326_v1 = vsel %vm253_vm2, 1.0, %v454_v63  ;;  %v311_v2 = vsel %vm124_vm3, 1.0, %v454_v63  ;;  %p447_p2 = pnand %p445_p1, %p442_p0 }
   0xc   :  { %37 = vperm.xlu0 %424, %v29_v25   ;;  %vm125_vm1 = vcmp.gt.f32.partialorder %v123_v53, 0.25  ;;  %v325_v5 = vsel %vm252_vm4, 1.0, %v454_v63 }
   0xd   :  { %396 = vmatpush3.bf16.msra.mxu0 %v393_v17  ;;  %v312_v0 = vsel %vm125_vm1, 1.0, %v454_v63 }
   0xe   :  { %412 = vmatpush3.bf16.msra.mxu1 %v409_v20  ;;  %398 = vmatprep.subr.bf16.mxu0 %v397_v26 }
   0xf   :  { %414 = vmatprep.subr.bf16.mxu1 %v413_v27 }
  0x11   :  { %400 = vmatpush3.bf16.msra.mxu0 %v397_v26 }
  0x12   :  { %416 = vmatpush3.bf16.msra.mxu1 %v413_v27 }
  0x14   :  { %364 = vmatmul.mubr.msk.f32.vlgmr.msra.gmra.mrb[0].mxu0 %vm40_vm0, %v19_v28 }
  0x15   :  { %383 = vmatmul.mubr.msk.f32.vlgmr.msra.gmra.mrb[0].mxu1 %vm40_vm0, %v19_v28 }
  0x87   :  { %v33_v29 = vpop.permute.xlu0 %32 }
  0x8b   :  { %v38_v30 = vpop.permute.xlu0 %37 }
  0xe7   :  { %v365_v31 = vpop.f32.mrb[0].mxu0 }
  0xe8   :  { %v119_v32 = vadd.f32 %v365_v31, %v38_v30  ;;  %v384_v33 = vpop.f32.mrb[0].mxu1  ;;  %v113_v34 = vpop.f32.mrb[1].mxu0 }
  0xe9   :  { %v246_v35 = vadd.f32 %v384_v33, %v38_v30  ;;  %v114_v36 = vadd.f32 %v113_v34, %v33_v29  ;;  %v240_v37 = vpop.f32.mrb[1].mxu1 }
  0xea   :  { %v137_v38 = vand.u32 2147483647, %v119_v32  ;;  %v241_v39 = vadd.f32 %v240_v37, %v33_v29  ;;  %v131_v3 = vmax.f32 %v119_v32, 0.0  ;;  %v133_v4 = vmul.f32 %v312_v0, %v119_v32 }
  0xeb   :  { %v265_v40 = vand.u32 2147483647, %v246_v35  ;;  %v136_v42 = vand.u32 2147483647, %v114_v36  ;;  %v259_v6 = vmax.f32 %v246_v35, 0.0  ;;  %v261_v7 = vmul.f32 %v326_v1, %v246_v35 }
  0xec   :  { %v139_v41 = vsub.f32 0.0, %v137_v38  ;;  %v264_v44 = vand.u32 2147483647, %v241_v39  ;;  %v130_v8 = vmax.f32 %v114_v36, 0.0  ;;  %v132_v9 = vmul.f32 %v311_v2, %v114_v36 }
  0xed   :  { %v267_v43 = vsub.f32 0.0, %v265_v40  ;;  %v138_v46 = vsub.f32 0.0, %v136_v42  ;;  %v258_v11 = vmax.f32 %v241_v39, 0.0  ;;  %v260_v12 = vmul.f32 %v325_v5, %v241_v39 }
  0xee   :  { %v142_v45 = vmul.f32 1.442695, %v139_v41  ;;  %v266_v48 = vsub.f32 0.0, %v264_v44  ;;  %v135_v14 = vsub.f32 %v131_v3, %v133_v4  ;;  %v263_v17 = vsub.f32 %v259_v6, %v261_v7 }
  0xef   :  { %v270_v47 = vmul.f32 1.442695, %v267_v43  ;;  %v140_v49 = vmul.f32 1.442695, %v138_v46  ;;  %v134_v20 = vsub.f32 %v130_v8, %v132_v9  ;;  %v262_v23 = vsub.f32 %v258_v11, %v260_v12 }
  0xf0   :  { %425 = vpow2.f32 %v142_v45  ;;  %v268_v50 = vmul.f32 1.442695, %v266_v48 }
  0xf1   :  { %427 = vpow2.f32 %v270_v47 }
  0xf2   :  { %429 = vpow2.f32 %v140_v49 }
  0xf3   :  { %431 = vpow2.f32 %v268_v50 }
  0xfa   :  { %v426_v51 = vpop.eup %425 }
  0xfb   :  { %v428_v52 = vpop.eup %427  ;;  %v145_v54 = vadd.f32 1.0, %v426_v51 }
  0xfc   :  { %v430_v55 = vpop.eup %429  ;;  %v273_v57 = vadd.f32 1.0, %v428_v52 }
  0xfd   :  { %v432_v58 = vpop.eup %431  ;;  %v144_v60 = vadd.f32 1.0, %v430_v55  ;;  %433 = vlog2.f32 %v145_v54 }
  0xfe   :  { %v272_v62 = vadd.f32 1.0, %v432_v58  ;;  %435 = vlog2.f32 %v273_v57 }
  0xff   :  { %437 = vlog2.f32 %v144_v60 }
 0x100   :  { %439 = vlog2.f32 %v272_v62 }
 0x107   :  { %v434_v10 = vpop.eup %433 }
 0x108   :  { %v436_v13 = vpop.eup %435  ;;  %v149_v15 = vmul.f32 0.6931472, %v434_v10 }
 0x109   :  { %v438_v16 = vpop.eup %437  ;;  %v277_v18 = vmul.f32 0.6931472, %v436_v13 }
 0x10a   :  { %v440_v19 = vpop.eup %439  ;;  %v147_v21 = vmul.f32 0.6931472, %v438_v16  ;;  %v151_v22 = vadd.f32 %v149_v15, %v135_v14 }
 0x10b   :  { %v275_v24 = vmul.f32 0.6931472, %v440_v19  ;;  %v279_v25 = vadd.f32 %v277_v18, %v263_v17 }
 0x10c   :  { %v150_v26 = vadd.f32 %v147_v21, %v134_v20 }
 0x10d   :  { %v278_v27 = vadd.f32 %v275_v24, %v262_v23 }
 0x10e   :  { %v152_v28 = vadd.f32 %v151_v22, %v150_v26 }
 0x10f   :  { %v280_v29 = vadd.f32 %v279_v25, %v278_v27 }
 0x110   :  { %153 = vadd.xlane.f32.xlu1 %v152_v28 }
 0x114   :  { %281 = vadd.xlane.f32.xlu1 %v280_v29 }
 0x19d   :  { %v154_v30 = vpop.xlane.xlu1 %153 }
 0x19e   :  { %v155_v31 = vrot.slane %v154_v30, 4 }
 0x1a0   :  { %v156_v32 = vadd.f32 %v155_v31, %v154_v30 }
 0x1a1   :  { %v282_v33 = vpop.xlane.xlu1 %281 }
 0x1a2   :  { %v157_v34 = vrot.slane %v156_v32, 2  ;;  %v283_v35 = vrot.slane %v282_v33, 4 }
 0x1a4   :  { %v284_v36 = vadd.f32 %v283_v35, %v282_v33  ;;  %v158_v37 = vadd.f32 %v157_v34, %v156_v32 }
 0x1a6   :  { %v285_v38 = vrot.slane %v284_v36, 2  ;;  %v159_v39 = vrot.slane %v158_v37, 1 }
 0x1a8   :  { %v286_v40 = vadd.f32 %v285_v38, %v284_v36  ;;  %v160_v41 = vadd.f32 %v159_v39, %v158_v37 }
 0x1aa   :  { %417 = vpush %v160_v41  ;;  %v287_v42 = vrot.slane %v286_v40, 1 }
 0x1ac   :  { %v288_v43 = vadd.f32 %v287_v42, %v286_v40 }
 0x1ae   :  { %419 = vpush %v288_v43 }
 0x1db   :  { %s418_s3 = spop %417 }
 0x1dc   :  { %s164_s8 = smul.f32 0.00048828125, %s418_s3 }
 0x1df   :  { %s420_s9 = spop %419 }
 0x1e0   :  { %s292_s10 = smul.f32 0.00048828125, %s420_s9 }
 0x1e2   :  { %s293_s11 = sadd.f32 %s292_s10, %s164_s8 }
 0x1e4   :  { %295 = sst [smem:[#allocation2]] %s293_s11 }
 0x1e5   :  { %450 = shalt.err (!%p447_p2)
}
 0x1e6   :  { %s455_s19 = smov [#allocation2]  }
 0x1e7   :  { %303 = dma.smem_to_hbm %s455_s19, 16, %s573_s4, [#allocation3]  }
 0x1e8   :  { %451 = dma.done.wait [#allocation3], 16  }
 0x1e9   :  { %452 = vsyncadd [#allocation3], 4294967280 }
 0x1ea   :  { %307 = sfence }
 0x1eb   :  { %308 = vsyncpa [#allocation3], 1 }

</bundles_post_ra>
